<compile_context>
chip_gen: v7x
topology: tpu7x:2x2x1
jax: 0.10.0
libtpu: 0.0.40
codegen_flags: <defaults>
</compile_context>

<pallas_src>
import math
from functools import partial

import jax
import jax.numpy as jnp
from jax import lax
from jax.experimental import pallas as pl
from jax.experimental.pallas import tpu as pltpu


_MM_DTYPE = jnp.bfloat16      # stored weights / matmul inputs
_SEQ_DTYPE = jnp.bfloat16     # inter-layer hidden sequences (halves HBM traffic)
_GX_DTYPE = jnp.bfloat16      # hoisted gate-projection scratch (halves its VMEM)
_LANE = 128                   # lane width: H is padded to a multiple of this
_SUBLANE_PACK = 16            # batch padded to a multiple of this (bf16 sublane packing)


def _round_up(x, m):
    return ((x + m - 1) // m) * m


def _dtype_bytes(dt):
    return jnp.dtype(dt).itemsize


_VMEM_LIMIT_CACHE = None


def _vmem_limit_bytes():
    """Per-generation scoped VMEM limit: ~3/4 of physical VMEM, capped at 100 MiB.

    v5e/v6e (128 MiB physical) -> 96 MiB; v7x (64 MiB physical) -> 48 MiB;
    conservative 48 MiB fallback if the query is unavailable.
    """
    global _VMEM_LIMIT_CACHE
    if _VMEM_LIMIT_CACHE is None:
        try:
            cap = int(pltpu.get_tpu_info().vmem_capacity_bytes)
        except Exception:
            cap = 64 * 1024 * 1024
        _VMEM_LIMIT_CACHE = min((cap * 3) // 4, 100 * 1024 * 1024)
    return _VMEM_LIMIT_CACHE


def _choose_time_block(T, Bp, Fin, Hp, n_out, vmem_limit):
    """Largest divisor of T whose working set fits the VMEM budget.

    Accounts for: double-buffered x/y tiles, double-buffered resident weight blocks
    (W_ih, W_hh, bias, h0, c0, fc), h/c state scratch, gx scratch, and headroom for
    Mosaic internal scratch.
    """
    G = 4 * Hp
    bw = _dtype_bytes(_MM_DTYPE)
    f4 = 4
    resident = 2 * (Fin * G * bw             # W_ih (bf16), double-buffered by Pallas
                    + Hp * G * bw            # W_hh (bf16)
                    + G * f4                 # bias (f32)
                    + 2 * Hp * f4            # h0 / c0 (f32)
                    + Hp * max(n_out, 1) * bw  # fc weight (last layer only)
                    + max(n_out, 1) * f4)      # fc bias
    state = Bp * Hp * (bw + f4)              # h (bf16) + c (f32) scratch
    headroom = 2 * 1024 * 1024               # Mosaic internal scratch / output / misc
    budget = vmem_limit - resident - state - headroom
    per_t = (2 * Bp * Fin * _dtype_bytes(_SEQ_DTYPE)    # x tile, double-buffered
             + 2 * Bp * Hp * _dtype_bytes(_SEQ_DTYPE)   # y tile, double-buffered
             + Bp * G * _dtype_bytes(_GX_DTYPE))        # hoisted gate projection
    cap = max(1, min(T, budget // max(per_t, 1)))
    tb = 1
    for d in range(1, T + 1):
        if T % d == 0 and d <= cap:
            tb = d
    return tb


# ----------------------------------------------------------------------------
# Pallas kernels
# ----------------------------------------------------------------------------
def lstm_seq_kernel(x_ref, wih_ref, whh_ref, b_ref, h0_ref, c0_ref,
                    y_ref, h_scr, c_scr, gx_scr, *, H, Bp, TB, unroll):
    """One T-block of a single LSTM layer; writes the (bf16) hidden sequence block.

    x_ref : (TB*Bp, Fin) bf16 flattened time-major input block
    wih   : (Fin, 4H) bf16, whh: (H, 4H) bf16, b: (1, 4H) f32 (gate order i,f,o,g)
    h0/c0 : (1, H) f32 initial state rows (broadcast inside the kernel)
    y_ref : (TB*Bp, H) bf16 hidden-state sequence block (next layer's input)
    h_scr : (Bp, H) bf16, c_scr: (Bp, H) f32 -- recurrent state carried across grid steps
    gx_scr: (TB*Bp, 4H) bf16 hoisted input projection for this block
    """
    t_blk = pl.program_id(0)

    @pl.when(t_blk == 0)
    def _():
        h_scr[...] = jnp.broadcast_to(h0_ref[...], h_scr.shape).astype(h_scr.dtype)
        c_scr[...] = jnp.broadcast_to(c0_ref[...], c_scr.shape)

    # Hoisted input projection + bias for every timestep of this block (one big matmul).
    gx_scr[...] = (jnp.dot(x_ref[...], wih_ref[...],
                           preferred_element_type=jnp.float32)
                   + b_ref[...]).astype(gx_scr.dtype)

    def step(tt, carry):
        row = pl.multiple_of(tt * Bp, Bp)
        gates = (gx_scr[pl.ds(row, Bp), :].astype(jnp.float32)
                 + jnp.dot(h_scr[...], whh_ref[...],
                           preferred_element_type=jnp.float32))      # (Bp, 4H) f32
        act = jax.nn.sigmoid(gates[:, :3 * H])                       # i | f | o in one pass
        i_g = act[:, 0:H]
        f_g = act[:, H:2 * H]
        o_g = act[:, 2 * H:3 * H]
        g_g = jnp.tanh(gates[:, 3 * H:])
        c_new = f_g * c_scr[...] + i_g * g_g
        h_new = (o_g * jnp.tanh(c_new)).astype(h_scr.dtype)          # bf16 once
        c_scr[...] = c_new
        h_scr[...] = h_new
        y_ref[pl.ds(row, Bp), :] = h_new                             # lane-dense bf16 store
        return carry

    lax.fori_loop(0, TB, step, 0, unroll=unroll)


def lstm_last_kernel(x_ref, wih_ref, whh_ref, b_ref, h0_ref, c0_ref,
                     wfc_ref, bfc_ref, out_ref, h_scr, c_scr, gx_scr,
                     *, H, Bp, TB, unroll):
    """Last LSTM layer: no hidden-sequence output; final Linear fused in the epilogue."""
    t_blk = pl.program_id(0)

    @pl.when(t_blk == 0)
    def _():
        h_scr[...] = jnp.broadcast_to(h0_ref[...], h_scr.shape).astype(h_scr.dtype)
        c_scr[...] = jnp.broadcast_to(c0_ref[...], c_scr.shape)

    gx_scr[...] = (jnp.dot(x_ref[...], wih_ref[...],
                           preferred_element_type=jnp.float32)
                   + b_ref[...]).astype(gx_scr.dtype)

    def step(tt, carry):
        row = pl.multiple_of(tt * Bp, Bp)
        gates = (gx_scr[pl.ds(row, Bp), :].astype(jnp.float32)
                 + jnp.dot(h_scr[...], whh_ref[...],
                           preferred_element_type=jnp.float32))
        act = jax.nn.sigmoid(gates[:, :3 * H])
        i_g = act[:, 0:H]
        f_g = act[:, H:2 * H]
        o_g = act[:, 2 * H:3 * H]
        g_g = jnp.tanh(gates[:, 3 * H:])
        c_new = f_g * c_scr[...] + i_g * g_g
        h_new = (o_g * jnp.tanh(c_new)).astype(h_scr.dtype)
        c_scr[...] = c_new
        h_scr[...] = h_new
        return carry

    lax.fori_loop(0, TB, step, 0, unroll=unroll)

    @pl.when(t_blk == pl.num_programs(0) - 1)
    def _():
        out_ref[...] = (jnp.dot(h_scr[...], wfc_ref[...],
                                preferred_element_type=jnp.float32)
                        + bfc_ref[...]).astype(out_ref.dtype)


# ----------------------------------------------------------------------------
# Wrappers around pallas_call
# ----------------------------------------------------------------------------
def lstm_layer_seq(x2d, T, Bp, layer):
    """Intermediate LSTM layer: (T*Bp, Fin) bf16 -> (T*Bp, Hp) bf16 hidden sequence."""
    w_ih_t, w_hh_t = layer["w_ih_t"], layer["w_hh_t"]
    b, h0, c0 = layer["b"], layer["h0"], layer["c0"]
    Fin, G = w_ih_t.shape
    Hp = w_hh_t.shape[0]
    vmem_limit = _vmem_limit_bytes()
    TB = _choose_time_block(T, Bp, Fin, Hp, 0, vmem_limit)
    R = TB * Bp
    unroll = TB if TB <= 8 else 8
    kern = partial(lstm_seq_kernel, H=Hp, Bp=Bp, TB=TB, unroll=unroll)
    return pl.pallas_call(
        kern,
        out_shape=jax.ShapeDtypeStruct((T * Bp, Hp), _SEQ_DTYPE),
        grid_spec=pltpu.PrefetchScalarGridSpec(
            num_scalar_prefetch=0,
            grid=(T // TB,),
            in_specs=[
                pl.BlockSpec((R, Fin), lambda t: (t, 0)),     # x block (pipelined)
                pl.BlockSpec((Fin, G), lambda t: (0, 0)),     # W_ih resident
                pl.BlockSpec((Hp, G), lambda t: (0, 0)),      # W_hh resident
                pl.BlockSpec((1, G), lambda t: (0, 0)),       # bias
                pl.BlockSpec((1, Hp), lambda t: (0, 0)),      # h0
                pl.BlockSpec((1, Hp), lambda t: (0, 0)),      # c0
            ],
            out_specs=pl.BlockSpec((R, Hp), lambda t: (t, 0)),
            scratch_shapes=[
                pltpu.VMEM((Bp, Hp), _MM_DTYPE),              # h (bf16)
                pltpu.VMEM((Bp, Hp), jnp.float32),            # c (f32)
                pltpu.VMEM((R, G), _GX_DTYPE),                # hoisted input projection
            ]),
        compiler_params=pltpu.CompilerParams(
            dimension_semantics=("arbitrary",),
            vmem_limit_bytes=vmem_limit),
    )(x2d, w_ih_t, w_hh_t, b, h0, c0)


def lstm_layer_last(x2d, T, Bp, layer, fc_w_t, fc_b):
    """Last LSTM layer fused with the final Linear: (T*Bp, Fin) bf16 -> (Bp, nOut) f32."""
    w_ih_t, w_hh_t = layer["w_ih_t"], layer["w_hh_t"]
    b, h0, c0 = layer["b"], layer["h0"], layer["c0"]
    Fin, G = w_ih_t.shape
    Hp = w_hh_t.shape[0]
    n_out = fc_w_t.shape[1]
    vmem_limit = _vmem_limit_bytes()
    TB = _choose_time_block(T, Bp, Fin, Hp, n_out, vmem_limit)
    R = TB * Bp
    unroll = TB if TB <= 8 else 8
    kern = partial(lstm_last_kernel, H=Hp, Bp=Bp, TB=TB, unroll=unroll)
    return pl.pallas_call(
        kern,
        out_shape=jax.ShapeDtypeStruct((Bp, n_out), jnp.float32),
        grid_spec=pltpu.PrefetchScalarGridSpec(
            num_scalar_prefetch=0,
            grid=(T // TB,),
            in_specs=[
                pl.BlockSpec((R, Fin), lambda t: (t, 0)),
                pl.BlockSpec((Fin, G), lambda t: (0, 0)),
                pl.BlockSpec((Hp, G), lambda t: (0, 0)),
                pl.BlockSpec((1, G), lambda t: (0, 0)),
                pl.BlockSpec((1, Hp), lambda t: (0, 0)),
                pl.BlockSpec((1, Hp), lambda t: (0, 0)),
                pl.BlockSpec((Hp, n_out), lambda t: (0, 0)),  # fc weight
                pl.BlockSpec((1, n_out), lambda t: (0, 0)),   # fc bias
            ],
            out_specs=pl.BlockSpec((Bp, n_out), lambda t: (0, 0)),
            scratch_shapes=[
                pltpu.VMEM((Bp, Hp), _MM_DTYPE),
                pltpu.VMEM((Bp, Hp), jnp.float32),
                pltpu.VMEM((R, G), _GX_DTYPE),
            ]),
        compiler_params=pltpu.CompilerParams(
            dimension_semantics=("arbitrary",),
            vmem_limit_bytes=vmem_limit),
    )(x2d, w_ih_t, w_hh_t, b, h0, c0, fc_w_t, fc_b)


# ----------------------------------------------------------------------------
# Model: deterministic parameter init + forward (glue in plain JAX)
# ----------------------------------------------------------------------------
def init_params(key, feature_dim, state_dims, n_output):
    params = {"layers": []}
    in_dim = feature_dim
    in_p = feature_dim          # first layer keeps F (block = full dim; lane padding not needed)
    for H in state_dims:
        Hp = _round_up(H, _LANE)
        key, k1, k2, k3, k4, k5, k6 = jax.random.split(key, 7)
        k = 1.0 / math.sqrt(H)
        w_ih = jax.random.uniform(k1, (4 * H, in_dim), jnp.float32, -k, k)
        w_hh = jax.random.uniform(k2, (4 * H, H), jnp.float32, -k, k)
        b_ih = jax.random.uniform(k3, (4 * H,), jnp.float32, -k, k)
        b_hh = jax.random.uniform(k4, (4 * H,), jnp.float32, -k, k)
        # Repack PyTorch gate order (i, f, g, o) -> (i, f, o, g) so the kernel applies a
        # single sigmoid to [0:3H] and a single tanh to [3H:4H].
        perm = jnp.concatenate([jnp.arange(0, 2 * H),
                                jnp.arange(3 * H, 4 * H),
                                jnp.arange(2 * H, 3 * H)])
        w_ih = w_ih[perm]
        w_hh = w_hh[perm]
        bias = (b_ih + b_hh)[perm]
        # Zero-pad each gate block H -> Hp (lane multiple) and the input dim in_dim -> in_p.
        # Padded gates get pre-activation 0 => i=f=o=0.5, g=0, and with zero-padded c0/h0 the
        # padded state columns stay exactly 0, so the math on the real columns is unchanged.
        w_ih = jnp.pad(w_ih.reshape(4, H, in_dim),
                       ((0, 0), (0, Hp - H), (0, in_p - in_dim))).reshape(4 * Hp, in_p)
        w_hh = jnp.pad(w_hh.reshape(4, H, H),
                       ((0, 0), (0, Hp - H), (0, Hp - H))).reshape(4 * Hp, Hp)
        bias = jnp.pad(bias.reshape(4, H), ((0, 0), (0, Hp - H))).reshape(4 * Hp)
        # registered buffers l{i+1}, c{i+1}: randn broadcast over batch
        h0 = jnp.pad(jax.random.normal(k5, (1, H), jnp.float32), ((0, 0), (0, Hp - H)))
        c0 = jnp.pad(jax.random.normal(k6, (1, H), jnp.float32), ((0, 0), (0, Hp - H)))
        params["layers"].append(dict(
            w_ih_t=jnp.transpose(w_ih).astype(_MM_DTYPE),   # (in_p, 4Hp) bf16
            w_hh_t=jnp.transpose(w_hh).astype(_MM_DTYPE),   # (Hp, 4Hp) bf16
            b=bias.reshape(1, 4 * Hp).astype(jnp.float32),  # (1, 4Hp) f32
            h0=h0, c0=c0,
        ))
        in_dim = H
        in_p = Hp
    key, k1, k2 = jax.random.split(key, 3)
    H_last = state_dims[-1]
    Hp_last = _round_up(H_last, _LANE)
    k = 1.0 / math.sqrt(H_last)
    fc_w = jax.random.uniform(k1, (n_output, H_last), jnp.float32, -k, k)
    fc_b = jax.random.uniform(k2, (n_output,), jnp.float32, -k, k)
    fc_w_t = jnp.pad(jnp.transpose(fc_w), ((0, Hp_last - H_last), (0, 0)))
    params["fc_w_t"] = fc_w_t.astype(_MM_DTYPE)             # (Hp_last, nOut) bf16
    params["fc_b"] = fc_b.reshape(1, n_output).astype(jnp.float32)
    return params


@jax.jit
def lstm_model_forward(x, params):
    """x: (B, T, F) batch_first -> (B, nOutput); mirrors LSTMModel.forward."""
    B, T, F = x.shape
    Bp = _round_up(max(B, 1), _SUBLANE_PACK)                 # pad batch (bf16 sublane pack)
    # TODO(synk): fold this transpose/pad/cast into the first layer's index_map with a 3-D
    #             (Bp, TB, F) BlockSpec to save one HBM pass over x.
    xt = jnp.transpose(x, (1, 0, 2)).astype(_SEQ_DTYPE)      # time-major (T, B, F) bf16
    if Bp > B:
        xt = jnp.pad(xt, ((0, 0), (0, Bp - B), (0, 0)))
    seq2d = xt.reshape(T * Bp, F)                            # flattened time-major

    layers = params["layers"]
    for layer in layers[:-1]:
        seq2d = lstm_layer_seq(seq2d, T, Bp, layer)
    out_p = lstm_layer_last(seq2d, T, Bp, layers[-1],
                            params["fc_w_t"], params["fc_b"])
    return out_p[:B]


# ----------------------------------------------------------------------------
if __name__ == "__main__":
    B, T, F = 2, 8, 4
    state_dims = [32, 32]
    n_output = 4

    key = jax.random.PRNGKey(0)
    key, kx, kp = jax.random.split(key, 3)
    x = jax.random.normal(kx, (B, T, F), jnp.float32)
    params = init_params(kp, F, state_dims, n_output)

    out = lstm_model_forward(x, params)
    jax.block_until_ready(out)
    assert out.shape == (B, n_output)
    assert bool(jnp.all(jnp.isfinite(out)))
    print("KERNEL_OK")
</pallas_src>

<mosaic_0001>
module attributes {stable_mosaic.version = 11 : i64} {
  func.func @lstm_seq_kernel(%arg0: i32, %arg1: memref<128x4xbf16, #tpu.memory_space<vmem>>, %arg2: memref<4x512xbf16, #tpu.memory_space<vmem>>, %arg3: memref<128x512xbf16, #tpu.memory_space<vmem>>, %arg4: memref<1x512xf32, #tpu.memory_space<vmem>>, %arg5: memref<1x128xf32, #tpu.memory_space<vmem>>, %arg6: memref<1x128xf32, #tpu.memory_space<vmem>>, %arg7: memref<128x128xbf16, #tpu.memory_space<vmem>>, %arg8: memref<16x128xbf16, #tpu.memory_space<vmem>>, %arg9: memref<16x128xf32, #tpu.memory_space<vmem>>, %arg10: memref<128x512xbf16, #tpu.memory_space<vmem>>) attributes {dimension_semantics = [#tpu.dimension_semantics<arbitrary>], iteration_bounds = array<i64: 1>, scalar_prefetch = 0 : i64, scratch_operands = 3 : i64, tpu.core_type = #tpu.core_type<tc>, window_params = [{transform_indices = @transform_0, window_bounds = array<i64: 128, 4>}, {pipeline_mode = #tpu.pipeline_mode<synchronous>, transform_indices = @transform_1, window_bounds = array<i64: 4, 512>}, {pipeline_mode = #tpu.pipeline_mode<synchronous>, transform_indices = @transform_2, window_bounds = array<i64: 128, 512>}, {pipeline_mode = #tpu.pipeline_mode<synchronous>, transform_indices = @transform_3, window_bounds = array<i64: 1, 512>}, {pipeline_mode = #tpu.pipeline_mode<synchronous>, transform_indices = @transform_4, window_bounds = array<i64: 1, 128>}, {pipeline_mode = #tpu.pipeline_mode<synchronous>, transform_indices = @transform_5, window_bounds = array<i64: 1, 128>}, {transform_indices = @transform_6, window_bounds = array<i64: 128, 128>}]} {
    %c0_i32 = arith.constant 0 : i32
    %0 = arith.cmpi eq, %arg0, %c0_i32 : i32
    %1 = arith.extui %0 : i1 to i32
    %c0_i32_0 = arith.constant 0 : i32
    %2 = arith.cmpi ne, %1, %c0_i32_0 : i32
    scf.if %2 {
      %c0_128 = arith.constant 0 : index
      %c0_129 = arith.constant 0 : index
      %259 = vector.load %arg5[%c0_128, %c0_129] : memref<1x128xf32, #tpu.memory_space<vmem>>, vector<1x128xf32>
      %260 = vector.shape_cast %259 : vector<1x128xf32> to vector<1x128xf32>
      %261 = vector.broadcast %260 : vector<1x128xf32> to vector<16x128xf32>
      %262 = arith.truncf %261 : vector<16x128xf32> to vector<16x128xbf16>
      %c0_130 = arith.constant 0 : index
      %c0_131 = arith.constant 0 : index
      %263 = vector.load %arg8[%c0_130, %c0_131] : memref<16x128xbf16, #tpu.memory_space<vmem>>, vector<16x128xbf16>
      tpu.vector_store %arg8[%c0_130, %c0_131], %262 {strides = array<i32>} : memref<16x128xbf16, #tpu.memory_space<vmem>>, vector<16x128xbf16>,
      %c0_132 = arith.constant 0 : index
      %c0_133 = arith.constant 0 : index
      %264 = vector.load %arg6[%c0_132, %c0_133] : memref<1x128xf32, #tpu.memory_space<vmem>>, vector<1x128xf32>
      %265 = vector.shape_cast %264 : vector<1x128xf32> to vector<1x128xf32>
      %266 = vector.broadcast %265 : vector<1x128xf32> to vector<16x128xf32>
      %c0_134 = arith.constant 0 : index
      %c0_135 = arith.constant 0 : index
      %267 = vector.load %arg9[%c0_134, %c0_135] : memref<16x128xf32, #tpu.memory_space<vmem>>, vector<16x128xf32>
      tpu.vector_store %arg9[%c0_134, %c0_135], %266 {strides = array<i32>} : memref<16x128xf32, #tpu.memory_space<vmem>>, vector<16x128xf32>,
    } else {
    }
    %c0 = arith.constant 0 : index
    %c0_1 = arith.constant 0 : index
    %3 = vector.load %arg1[%c0, %c0_1] : memref<128x4xbf16, #tpu.memory_space<vmem>>, vector<128x4xbf16>
    %c0_2 = arith.constant 0 : index
    %c0_3 = arith.constant 0 : index
    %4 = vector.load %arg2[%c0_2, %c0_3] : memref<4x512xbf16, #tpu.memory_space<vmem>>, vector<4x512xbf16>
    %cst = arith.constant dense<0.000000e+00> : vector<128x512xf32>
    %5 = tpu.matmul %3, %4, %cst {dimension_numbers = #tpu.dot_dimension_numbers<[1], [0], [0], [1], [0, 0, 1, 1], [], []>} : vector<128x4xbf16>, vector<4x512xbf16>, vector<128x512xf32> -> vector<128x512xf32>
    %c0_4 = arith.constant 0 : index
    %c0_5 = arith.constant 0 : index
    %6 = vector.load %arg4[%c0_4, %c0_5] : memref<1x512xf32, #tpu.memory_space<vmem>>, vector<1x512xf32>
    %7 = vector.broadcast %6 : vector<1x512xf32> to vector<128x512xf32>
    %8 = arith.addf %5, %7 : vector<128x512xf32>
    %9 = arith.truncf %8 : vector<128x512xf32> to vector<128x512xbf16>
    %c0_6 = arith.constant 0 : index
    %c0_7 = arith.constant 0 : index
    %10 = vector.load %arg10[%c0_6, %c0_7] : memref<128x512xbf16, #tpu.memory_space<vmem>>, vector<128x512xbf16>
    tpu.vector_store %arg10[%c0_6, %c0_7], %9 {strides = array<i32>} : memref<128x512xbf16, #tpu.memory_space<vmem>>, vector<128x512xbf16>,
    %c0_i32_8 = arith.constant 0 : i32
    %c16_i32 = arith.constant 16 : i32
    %11 = arith.muli %c0_i32_8, %c16_i32 : i32
    %12 = tpu.assume_multiple %11, 16 : i32
    %13 = arith.index_cast %12 : i32 to index
    %c0_9 = arith.constant 0 : index
    %14 = vector.load %arg10[%13, %c0_9] : memref<128x512xbf16, #tpu.memory_space<vmem>>, vector<16x512xbf16>
    %15 = arith.extf %14 : vector<16x512xbf16> to vector<16x512xf32>
    %c0_10 = arith.constant 0 : index
    %c0_11 = arith.constant 0 : index
    %16 = vector.load %arg8[%c0_10, %c0_11] : memref<16x128xbf16, #tpu.memory_space<vmem>>, vector<16x128xbf16>
    %c0_12 = arith.constant 0 : index
    %c0_13 = arith.constant 0 : index
    %17 = vector.load %arg3[%c0_12, %c0_13] : memref<128x512xbf16, #tpu.memory_space<vmem>>, vector<128x512xbf16>
    %cst_14 = arith.constant dense<0.000000e+00> : vector<16x512xf32>
    %18 = tpu.matmul %16, %17, %cst_14 {dimension_numbers = #tpu.dot_dimension_numbers<[1], [0], [0], [1], [0, 0, 1, 1], [], []>} : vector<16x128xbf16>, vector<128x512xbf16>, vector<16x512xf32> -> vector<16x512xf32>
    %19 = arith.addf %15, %18 : vector<16x512xf32>
    %20 = vector.extract_strided_slice %19 {offsets = [0, 0], sizes = [16, 384], strides = [1, 1]} : vector<16x512xf32> to vector<16x384xf32>
    %21 = arith.negf %20 : vector<16x384xf32>
    %22 = math.exp %21 : vector<16x384xf32>
    %cst_15 = arith.constant 1.000000e+00 : f32
    %23 = vector.broadcast %cst_15 : f32 to vector<16x384xf32>
    %24 = arith.addf %23, %22 : vector<16x384xf32>
    %25 = arith.divf %23, %24 : vector<16x384xf32>
    %26 = vector.extract_strided_slice %25 {offsets = [0, 0], sizes = [16, 128], strides = [1, 1]} : vector<16x384xf32> to vector<16x128xf32>
    %27 = vector.extract_strided_slice %25 {offsets = [0, 128], sizes = [16, 128], strides = [1, 1]} : vector<16x384xf32> to vector<16x128xf32>
    %28 = vector.extract_strided_slice %25 {offsets = [0, 256], sizes = [16, 128], strides = [1, 1]} : vector<16x384xf32> to vector<16x128xf32>
    %29 = vector.extract_strided_slice %19 {offsets = [0, 384], sizes = [16, 128], strides = [1, 1]} : vector<16x512xf32> to vector<16x128xf32>
    %30 = math.tanh %29 : vector<16x128xf32>
    %c0_16 = arith.constant 0 : index
    %c0_17 = arith.constant 0 : index
    %31 = vector.load %arg9[%c0_16, %c0_17] : memref<16x128xf32, #tpu.memory_space<vmem>>, vector<16x128xf32>
    %32 = arith.mulf %27, %31 : vector<16x128xf32>
    %33 = arith.mulf %26, %30 : vector<16x128xf32>
    %34 = arith.addf %32, %33 : vector<16x128xf32>
    %35 = math.tanh %34 : vector<16x128xf32>
    %36 = arith.mulf %28, %35 : vector<16x128xf32>
    %37 = arith.truncf %36 : vector<16x128xf32> to vector<16x128xbf16>
    %c0_18 = arith.constant 0 : index
    %c0_19 = arith.constant 0 : index
    %38 = vector.load %arg9[%c0_18, %c0_19] : memref<16x128xf32, #tpu.memory_space<vmem>>, vector<16x128xf32>
    tpu.vector_store %arg9[%c0_18, %c0_19], %34 {strides = array<i32>} : memref<16x128xf32, #tpu.memory_space<vmem>>, vector<16x128xf32>,
    %c0_20 = arith.constant 0 : index
    %c0_21 = arith.constant 0 : index
    %39 = vector.load %arg8[%c0_20, %c0_21] : memref<16x128xbf16, #tpu.memory_space<vmem>>, vector<16x128xbf16>
    tpu.vector_store %arg8[%c0_20, %c0_21], %37 {strides = array<i32>} : memref<16x128xbf16, #tpu.memory_space<vmem>>, vector<16x128xbf16>,
    %40 = arith.index_cast %12 : i32 to index
    %c0_22 = arith.constant 0 : index
    %41 = vector.load %arg7[%40, %c0_22] : memref<128x128xbf16, #tpu.memory_space<vmem>>, vector<16x128xbf16>
    tpu.vector_store %arg7[%40, %c0_22], %37 {strides = array<i32>} : memref<128x128xbf16, #tpu.memory_space<vmem>>, vector<16x128xbf16>,
    %c1_i32 = arith.constant 1 : i32
    %c16_i32_23 = arith.constant 16 : i32
    %42 = arith.muli %c1_i32, %c16_i32_23 : i32
    %43 = tpu.assume_multiple %42, 16 : i32
    %44 = arith.index_cast %43 : i32 to index
    %c0_24 = arith.constant 0 : index
    %45 = vector.load %arg10[%44, %c0_24] : memref<128x512xbf16, #tpu.memory_space<vmem>>, vector<16x512xbf16>
    %46 = arith.extf %45 : vector<16x512xbf16> to vector<16x512xf32>
    %c0_25 = arith.constant 0 : index
    %c0_26 = arith.constant 0 : index
    %47 = vector.load %arg8[%c0_25, %c0_26] : memref<16x128xbf16, #tpu.memory_space<vmem>>, vector<16x128xbf16>
    %c0_27 = arith.constant 0 : index
    %c0_28 = arith.constant 0 : index
    %48 = vector.load %arg3[%c0_27, %c0_28] : memref<128x512xbf16, #tpu.memory_space<vmem>>, vector<128x512xbf16>
    %cst_29 = arith.constant dense<0.000000e+00> : vector<16x512xf32>
    %49 = tpu.matmul %47, %48, %cst_29 {dimension_numbers = #tpu.dot_dimension_numbers<[1], [0], [0], [1], [0, 0, 1, 1], [], []>} : vector<16x128xbf16>, vector<128x512xbf16>, vector<16x512xf32> -> vector<16x512xf32>
    %50 = arith.addf %46, %49 : vector<16x512xf32>
    %51 = vector.extract_strided_slice %50 {offsets = [0, 0], sizes = [16, 384], strides = [1, 1]} : vector<16x512xf32> to vector<16x384xf32>
    %52 = arith.negf %51 : vector<16x384xf32>
    %53 = math.exp %52 : vector<16x384xf32>
    %cst_30 = arith.constant 1.000000e+00 : f32
    %54 = vector.broadcast %cst_30 : f32 to vector<16x384xf32>
    %55 = arith.addf %54, %53 : vector<16x384xf32>
    %56 = arith.divf %54, %55 : vector<16x384xf32>
    %57 = vector.extract_strided_slice %56 {offsets = [0, 0], sizes = [16, 128], strides = [1, 1]} : vector<16x384xf32> to vector<16x128xf32>
    %58 = vector.extract_strided_slice %56 {offsets = [0, 128], sizes = [16, 128], strides = [1, 1]} : vector<16x384xf32> to vector<16x128xf32>
    %59 = vector.extract_strided_slice %56 {offsets = [0, 256], sizes = [16, 128], strides = [1, 1]} : vector<16x384xf32> to vector<16x128xf32>
    %60 = vector.extract_strided_slice %50 {offsets = [0, 384], sizes = [16, 128], strides = [1, 1]} : vector<16x512xf32> to vector<16x128xf32>
    %61 = math.tanh %60 : vector<16x128xf32>
    %c0_31 = arith.constant 0 : index
    %c0_32 = arith.constant 0 : index
    %62 = vector.load %arg9[%c0_31, %c0_32] : memref<16x128xf32, #tpu.memory_space<vmem>>, vector<16x128xf32>
    %63 = arith.mulf %58, %62 : vector<16x128xf32>
    %64 = arith.mulf %57, %61 : vector<16x128xf32>
    %65 = arith.addf %63, %64 : vector<16x128xf32>
    %66 = math.tanh %65 : vector<16x128xf32>
    %67 = arith.mulf %59, %66 : vector<16x128xf32>
    %68 = arith.truncf %67 : vector<16x128xf32> to vector<16x128xbf16>
    %c0_33 = arith.constant 0 : index
    %c0_34 = arith.constant 0 : index
    %69 = vector.load %arg9[%c0_33, %c0_34] : memref<16x128xf32, #tpu.memory_space<vmem>>, vector<16x128xf32>
    tpu.vector_store %arg9[%c0_33, %c0_34], %65 {strides = array<i32>} : memref<16x128xf32, #tpu.memory_space<vmem>>, vector<16x128xf32>,
    %c0_35 = arith.constant 0 : index
    %c0_36 = arith.constant 0 : index
    %70 = vector.load %arg8[%c0_35, %c0_36] : memref<16x128xbf16, #tpu.memory_space<vmem>>, vector<16x128xbf16>
    tpu.vector_store %arg8[%c0_35, %c0_36], %68 {strides = array<i32>} : memref<16x128xbf16, #tpu.memory_space<vmem>>, vector<16x128xbf16>,
    %71 = arith.index_cast %43 : i32 to index
    %c0_37 = arith.constant 0 : index
    %72 = vector.load %arg7[%71, %c0_37] : memref<128x128xbf16, #tpu.memory_space<vmem>>, vector<16x128xbf16>
    tpu.vector_store %arg7[%71, %c0_37], %68 {strides = array<i32>} : memref<128x128xbf16, #tpu.memory_space<vmem>>, vector<16x128xbf16>,
    %c2_i32 = arith.constant 2 : i32
    %c16_i32_38 = arith.constant 16 : i32
    %73 = arith.muli %c2_i32, %c16_i32_38 : i32
    %74 = tpu.assume_multiple %73, 16 : i32
    %75 = arith.index_cast %74 : i32 to index
    %c0_39 = arith.constant 0 : index
    %76 = vector.load %arg10[%75, %c0_39] : memref<128x512xbf16, #tpu.memory_space<vmem>>, vector<16x512xbf16>
    %77 = arith.extf %76 : vector<16x512xbf16> to vector<16x512xf32>
    %c0_40 = arith.constant 0 : index
    %c0_41 = arith.constant 0 : index
    %78 = vector.load %arg8[%c0_40, %c0_41] : memref<16x128xbf16, #tpu.memory_space<vmem>>, vector<16x128xbf16>
    %c0_42 = arith.constant 0 : index
    %c0_43 = arith.constant 0 : index
    %79 = vector.load %arg3[%c0_42, %c0_43] : memref<128x512xbf16, #tpu.memory_space<vmem>>, vector<128x512xbf16>
    %cst_44 = arith.constant dense<0.000000e+00> : vector<16x512xf32>
    %80 = tpu.matmul %78, %79, %cst_44 {dimension_numbers = #tpu.dot_dimension_numbers<[1], [0], [0], [1], [0, 0, 1, 1], [], []>} : vector<16x128xbf16>, vector<128x512xbf16>, vector<16x512xf32> -> vector<16x512xf32>
    %81 = arith.addf %77, %80 : vector<16x512xf32>
    %82 = vector.extract_strided_slice %81 {offsets = [0, 0], sizes = [16, 384], strides = [1, 1]} : vector<16x512xf32> to vector<16x384xf32>
    %83 = arith.negf %82 : vector<16x384xf32>
    %84 = math.exp %83 : vector<16x384xf32>
    %cst_45 = arith.constant 1.000000e+00 : f32
    %85 = vector.broadcast %cst_45 : f32 to vector<16x384xf32>
    %86 = arith.addf %85, %84 : vector<16x384xf32>
    %87 = arith.divf %85, %86 : vector<16x384xf32>
    %88 = vector.extract_strided_slice %87 {offsets = [0, 0], sizes = [16, 128], strides = [1, 1]} : vector<16x384xf32> to vector<16x128xf32>
    %89 = vector.extract_strided_slice %87 {offsets = [0, 128], sizes = [16, 128], strides = [1, 1]} : vector<16x384xf32> to vector<16x128xf32>
    %90 = vector.extract_strided_slice %87 {offsets = [0, 256], sizes = [16, 128], strides = [1, 1]} : vector<16x384xf32> to vector<16x128xf32>
    %91 = vector.extract_strided_slice %81 {offsets = [0, 384], sizes = [16, 128], strides = [1, 1]} : vector<16x512xf32> to vector<16x128xf32>
    %92 = math.tanh %91 : vector<16x128xf32>
    %c0_46 = arith.constant 0 : index
    %c0_47 = arith.constant 0 : index
    %93 = vector.load %arg9[%c0_46, %c0_47] : memref<16x128xf32, #tpu.memory_space<vmem>>, vector<16x128xf32>
    %94 = arith.mulf %89, %93 : vector<16x128xf32>
    %95 = arith.mulf %88, %92 : vector<16x128xf32>
    %96 = arith.addf %94, %95 : vector<16x128xf32>
    %97 = math.tanh %96 : vector<16x128xf32>
    %98 = arith.mulf %90, %97 : vector<16x128xf32>
    %99 = arith.truncf %98 : vector<16x128xf32> to vector<16x128xbf16>
    %c0_48 = arith.constant 0 : index
    %c0_49 = arith.constant 0 : index
    %100 = vector.load %arg9[%c0_48, %c0_49] : memref<16x128xf32, #tpu.memory_space<vmem>>, vector<16x128xf32>
    tpu.vector_store %arg9[%c0_48, %c0_49], %96 {strides = array<i32>} : memref<16x128xf32, #tpu.memory_space<vmem>>, vector<16x128xf32>,
    %c0_50 = arith.constant 0 : index
    %c0_51 = arith.constant 0 : index
    %101 = vector.load %arg8[%c0_50, %c0_51] : memref<16x128xbf16, #tpu.memory_space<vmem>>, vector<16x128xbf16>
    tpu.vector_store %arg8[%c0_50, %c0_51], %99 {strides = array<i32>} : memref<16x128xbf16, #tpu.memory_space<vmem>>, vector<16x128xbf16>,
    %102 = arith.index_cast %74 : i32 to index
    %c0_52 = arith.constant 0 : index
    %103 = vector.load %arg7[%102, %c0_52] : memref<128x128xbf16, #tpu.memory_space<vmem>>, vector<16x128xbf16>
    tpu.vector_store %arg7[%102, %c0_52], %99 {strides = array<i32>} : memref<128x128xbf16, #tpu.memory_space<vmem>>, vector<16x128xbf16>,
    %c3_i32 = arith.constant 3 : i32
    %c16_i32_53 = arith.constant 16 : i32
    %104 = arith.muli %c3_i32, %c16_i32_53 : i32
    %105 = tpu.assume_multiple %104, 16 : i32
    %106 = arith.index_cast %105 : i32 to index
    %c0_54 = arith.constant 0 : index
    %107 = vector.load %arg10[%106, %c0_54] : memref<128x512xbf16, #tpu.memory_space<vmem>>, vector<16x512xbf16>
    %108 = arith.extf %107 : vector<16x512xbf16> to vector<16x512xf32>
    %c0_55 = arith.constant 0 : index
    %c0_56 = arith.constant 0 : index
    %109 = vector.load %arg8[%c0_55, %c0_56] : memref<16x128xbf16, #tpu.memory_space<vmem>>, vector<16x128xbf16>
    %c0_57 = arith.constant 0 : index
    %c0_58 = arith.constant 0 : index
    %110 = vector.load %arg3[%c0_57, %c0_58] : memref<128x512xbf16, #tpu.memory_space<vmem>>, vector<128x512xbf16>
    %cst_59 = arith.constant dense<0.000000e+00> : vector<16x512xf32>
    %111 = tpu.matmul %109, %110, %cst_59 {dimension_numbers = #tpu.dot_dimension_numbers<[1], [0], [0], [1], [0, 0, 1, 1], [], []>} : vector<16x128xbf16>, vector<128x512xbf16>, vector<16x512xf32> -> vector<16x512xf32>
    %112 = arith.addf %108, %111 : vector<16x512xf32>
    %113 = vector.extract_strided_slice %112 {offsets = [0, 0], sizes = [16, 384], strides = [1, 1]} : vector<16x512xf32> to vector<16x384xf32>
    %114 = arith.negf %113 : vector<16x384xf32>
    %115 = math.exp %114 : vector<16x384xf32>
    %cst_60 = arith.constant 1.000000e+00 : f32
    %116 = vector.broadcast %cst_60 : f32 to vector<16x384xf32>
    %117 = arith.addf %116, %115 : vector<16x384xf32>
    %118 = arith.divf %116, %117 : vector<16x384xf32>
    %119 = vector.extract_strided_slice %118 {offsets = [0, 0], sizes = [16, 128], strides = [1, 1]} : vector<16x384xf32> to vector<16x128xf32>
    %120 = vector.extract_strided_slice %118 {offsets = [0, 128], sizes = [16, 128], strides = [1, 1]} : vector<16x384xf32> to vector<16x128xf32>
    %121 = vector.extract_strided_slice %118 {offsets = [0, 256], sizes = [16, 128], strides = [1, 1]} : vector<16x384xf32> to vector<16x128xf32>
    %122 = vector.extract_strided_slice %112 {offsets = [0, 384], sizes = [16, 128], strides = [1, 1]} : vector<16x512xf32> to vector<16x128xf32>
    %123 = math.tanh %122 : vector<16x128xf32>
    %c0_61 = arith.constant 0 : index
    %c0_62 = arith.constant 0 : index
    %124 = vector.load %arg9[%c0_61, %c0_62] : memref<16x128xf32, #tpu.memory_space<vmem>>, vector<16x128xf32>
    %125 = arith.mulf %120, %124 : vector<16x128xf32>
    %126 = arith.mulf %119, %123 : vector<16x128xf32>
    %127 = arith.addf %125, %126 : vector<16x128xf32>
    %128 = math.tanh %127 : vector<16x128xf32>
    %129 = arith.mulf %121, %128 : vector<16x128xf32>
    %130 = arith.truncf %129 : vector<16x128xf32> to vector<16x128xbf16>
    %c0_63 = arith.constant 0 : index
    %c0_64 = arith.constant 0 : index
    %131 = vector.load %arg9[%c0_63, %c0_64] : memref<16x128xf32, #tpu.memory_space<vmem>>, vector<16x128xf32>
    tpu.vector_store %arg9[%c0_63, %c0_64], %127 {strides = array<i32>} : memref<16x128xf32, #tpu.memory_space<vmem>>, vector<16x128xf32>,
    %c0_65 = arith.constant 0 : index
    %c0_66 = arith.constant 0 : index
    %132 = vector.load %arg8[%c0_65, %c0_66] : memref<16x128xbf16, #tpu.memory_space<vmem>>, vector<16x128xbf16>
    tpu.vector_store %arg8[%c0_65, %c0_66], %130 {strides = array<i32>} : memref<16x128xbf16, #tpu.memory_space<vmem>>, vector<16x128xbf16>,
    %133 = arith.index_cast %105 : i32 to index
    %c0_67 = arith.constant 0 : index
    %134 = vector.load %arg7[%133, %c0_67] : memref<128x128xbf16, #tpu.memory_space<vmem>>, vector<16x128xbf16>
    tpu.vector_store %arg7[%133, %c0_67], %130 {strides = array<i32>} : memref<128x128xbf16, #tpu.memory_space<vmem>>, vector<16x128xbf16>,
    %c4_i32 = arith.constant 4 : i32
    %c16_i32_68 = arith.constant 16 : i32
    %135 = arith.muli %c4_i32, %c16_i32_68 : i32
    %136 = tpu.assume_multiple %135, 16 : i32
    %137 = arith.index_cast %136 : i32 to index
    %c0_69 = arith.constant 0 : index
    %138 = vector.load %arg10[%137, %c0_69] : memref<128x512xbf16, #tpu.memory_space<vmem>>, vector<16x512xbf16>
    %139 = arith.extf %138 : vector<16x512xbf16> to vector<16x512xf32>
    %c0_70 = arith.constant 0 : index
    %c0_71 = arith.constant 0 : index
    %140 = vector.load %arg8[%c0_70, %c0_71] : memref<16x128xbf16, #tpu.memory_space<vmem>>, vector<16x128xbf16>
    %c0_72 = arith.constant 0 : index
    %c0_73 = arith.constant 0 : index
    %141 = vector.load %arg3[%c0_72, %c0_73] : memref<128x512xbf16, #tpu.memory_space<vmem>>, vector<128x512xbf16>
    %cst_74 = arith.constant dense<0.000000e+00> : vector<16x512xf32>
    %142 = tpu.matmul %140, %141, %cst_74 {dimension_numbers = #tpu.dot_dimension_numbers<[1], [0], [0], [1], [0, 0, 1, 1], [], []>} : vector<16x128xbf16>, vector<128x512xbf16>, vector<16x512xf32> -> vector<16x512xf32>
    %143 = arith.addf %139, %142 : vector<16x512xf32>
    %144 = vector.extract_strided_slice %143 {offsets = [0, 0], sizes = [16, 384], strides = [1, 1]} : vector<16x512xf32> to vector<16x384xf32>
    %145 = arith.negf %144 : vector<16x384xf32>
    %146 = math.exp %145 : vector<16x384xf32>
    %cst_75 = arith.constant 1.000000e+00 : f32
    %147 = vector.broadcast %cst_75 : f32 to vector<16x384xf32>
    %148 = arith.addf %147, %146 : vector<16x384xf32>
    %149 = arith.divf %147, %148 : vector<16x384xf32>
    %150 = vector.extract_strided_slice %149 {offsets = [0, 0], sizes = [16, 128], strides = [1, 1]} : vector<16x384xf32> to vector<16x128xf32>
    %151 = vector.extract_strided_slice %149 {offsets = [0, 128], sizes = [16, 128], strides = [1, 1]} : vector<16x384xf32> to vector<16x128xf32>
    %152 = vector.extract_strided_slice %149 {offsets = [0, 256], sizes = [16, 128], strides = [1, 1]} : vector<16x384xf32> to vector<16x128xf32>
    %153 = vector.extract_strided_slice %143 {offsets = [0, 384], sizes = [16, 128], strides = [1, 1]} : vector<16x512xf32> to vector<16x128xf32>
    %154 = math.tanh %153 : vector<16x128xf32>
    %c0_76 = arith.constant 0 : index
    %c0_77 = arith.constant 0 : index
    %155 = vector.load %arg9[%c0_76, %c0_77] : memref<16x128xf32, #tpu.memory_space<vmem>>, vector<16x128xf32>
    %156 = arith.mulf %151, %155 : vector<16x128xf32>
    %157 = arith.mulf %150, %154 : vector<16x128xf32>
    %158 = arith.addf %156, %157 : vector<16x128xf32>
    %159 = math.tanh %158 : vector<16x128xf32>
    %160 = arith.mulf %152, %159 : vector<16x128xf32>
    %161 = arith.truncf %160 : vector<16x128xf32> to vector<16x128xbf16>
    %c0_78 = arith.constant 0 : index
    %c0_79 = arith.constant 0 : index
    %162 = vector.load %arg9[%c0_78, %c0_79] : memref<16x128xf32, #tpu.memory_space<vmem>>, vector<16x128xf32>
    tpu.vector_store %arg9[%c0_78, %c0_79], %158 {strides = array<i32>} : memref<16x128xf32, #tpu.memory_space<vmem>>, vector<16x128xf32>,
    %c0_80 = arith.constant 0 : index
    %c0_81 = arith.constant 0 : index
    %163 = vector.load %arg8[%c0_80, %c0_81] : memref<16x128xbf16, #tpu.memory_space<vmem>>, vector<16x128xbf16>
    tpu.vector_store %arg8[%c0_80, %c0_81], %161 {strides = array<i32>} : memref<16x128xbf16, #tpu.memory_space<vmem>>, vector<16x128xbf16>,
    %164 = arith.index_cast %136 : i32 to index
    %c0_82 = arith.constant 0 : index
    %165 = vector.load %arg7[%164, %c0_82] : memref<128x128xbf16, #tpu.memory_space<vmem>>, vector<16x128xbf16>
    tpu.vector_store %arg7[%164, %c0_82], %161 {strides = array<i32>} : memref<128x128xbf16, #tpu.memory_space<vmem>>, vector<16x128xbf16>,
    %c5_i32 = arith.constant 5 : i32
    %c16_i32_83 = arith.constant 16 : i32
    %166 = arith.muli %c5_i32, %c16_i32_83 : i32
    %167 = tpu.assume_multiple %166, 16 : i32
    %168 = arith.index_cast %167 : i32 to index
    %c0_84 = arith.constant 0 : index
    %169 = vector.load %arg10[%168, %c0_84] : memref<128x512xbf16, #tpu.memory_space<vmem>>, vector<16x512xbf16>
    %170 = arith.extf %169 : vector<16x512xbf16> to vector<16x512xf32>
    %c0_85 = arith.constant 0 : index
    %c0_86 = arith.constant 0 : index
    %171 = vector.load %arg8[%c0_85, %c0_86] : memref<16x128xbf16, #tpu.memory_space<vmem>>, vector<16x128xbf16>
    %c0_87 = arith.constant 0 : index
    %c0_88 = arith.constant 0 : index
    %172 = vector.load %arg3[%c0_87, %c0_88] : memref<128x512xbf16, #tpu.memory_space<vmem>>, vector<128x512xbf16>
    %cst_89 = arith.constant dense<0.000000e+00> : vector<16x512xf32>
    %173 = tpu.matmul %171, %172, %cst_89 {dimension_numbers = #tpu.dot_dimension_numbers<[1], [0], [0], [1], [0, 0, 1, 1], [], []>} : vector<16x128xbf16>, vector<128x512xbf16>, vector<16x512xf32> -> vector<16x512xf32>
    %174 = arith.addf %170, %173 : vector<16x512xf32>
    %175 = vector.extract_strided_slice %174 {offsets = [0, 0], sizes = [16, 384], strides = [1, 1]} : vector<16x512xf32> to vector<16x384xf32>
    %176 = arith.negf %175 : vector<16x384xf32>
    %177 = math.exp %176 : vector<16x384xf32>
    %cst_90 = arith.constant 1.000000e+00 : f32
    %178 = vector.broadcast %cst_90 : f32 to vector<16x384xf32>
    %179 = arith.addf %178, %177 : vector<16x384xf32>
    %180 = arith.divf %178, %179 : vector<16x384xf32>
    %181 = vector.extract_strided_slice %180 {offsets = [0, 0], sizes = [16, 128], strides = [1, 1]} : vector<16x384xf32> to vector<16x128xf32>
    %182 = vector.extract_strided_slice %180 {offsets = [0, 128], sizes = [16, 128], strides = [1, 1]} : vector<16x384xf32> to vector<16x128xf32>
    %183 = vector.extract_strided_slice %180 {offsets = [0, 256], sizes = [16, 128], strides = [1, 1]} : vector<16x384xf32> to vector<16x128xf32>
    %184 = vector.extract_strided_slice %174 {offsets = [0, 384], sizes = [16, 128], strides = [1, 1]} : vector<16x512xf32> to vector<16x128xf32>
    %185 = math.tanh %184 : vector<16x128xf32>
    %c0_91 = arith.constant 0 : index
    %c0_92 = arith.constant 0 : index
    %186 = vector.load %arg9[%c0_91, %c0_92] : memref<16x128xf32, #tpu.memory_space<vmem>>, vector<16x128xf32>
    %187 = arith.mulf %182, %186 : vector<16x128xf32>
    %188 = arith.mulf %181, %185 : vector<16x128xf32>
    %189 = arith.addf %187, %188 : vector<16x128xf32>
    %190 = math.tanh %189 : vector<16x128xf32>
    %191 = arith.mulf %183, %190 : vector<16x128xf32>
    %192 = arith.truncf %191 : vector<16x128xf32> to vector<16x128xbf16>
    %c0_93 = arith.constant 0 : index
    %c0_94 = arith.constant 0 : index
    %193 = vector.load %arg9[%c0_93, %c0_94] : memref<16x128xf32, #tpu.memory_space<vmem>>, vector<16x128xf32>
    tpu.vector_store %arg9[%c0_93, %c0_94], %189 {strides = array<i32>} : memref<16x128xf32, #tpu.memory_space<vmem>>, vector<16x128xf32>,
    %c0_95 = arith.constant 0 : index
    %c0_96 = arith.constant 0 : index
    %194 = vector.load %arg8[%c0_95, %c0_96] : memref<16x128xbf16, #tpu.memory_space<vmem>>, vector<16x128xbf16>
    tpu.vector_store %arg8[%c0_95, %c0_96], %192 {strides = array<i32>} : memref<16x128xbf16, #tpu.memory_space<vmem>>, vector<16x128xbf16>,
    %195 = arith.index_cast %167 : i32 to index
    %c0_97 = arith.constant 0 : index
    %196 = vector.load %arg7[%195, %c0_97] : memref<128x128xbf16, #tpu.memory_space<vmem>>, vector<16x128xbf16>
    tpu.vector_store %arg7[%195, %c0_97], %192 {strides = array<i32>} : memref<128x128xbf16, #tpu.memory_space<vmem>>, vector<16x128xbf16>,
    %c6_i32 = arith.constant 6 : i32
    %c16_i32_98 = arith.constant 16 : i32
    %197 = arith.muli %c6_i32, %c16_i32_98 : i32
    %198 = tpu.assume_multiple %197, 16 : i32
    %199 = arith.index_cast %198 : i32 to index
    %c0_99 = arith.constant 0 : index
    %200 = vector.load %arg10[%199, %c0_99] : memref<128x512xbf16, #tpu.memory_space<vmem>>, vector<16x512xbf16>
    %201 = arith.extf %200 : vector<16x512xbf16> to vector<16x512xf32>
    %c0_100 = arith.constant 0 : index
    %c0_101 = arith.constant 0 : index
    %202 = vector.load %arg8[%c0_100, %c0_101] : memref<16x128xbf16, #tpu.memory_space<vmem>>, vector<16x128xbf16>
    %c0_102 = arith.constant 0 : index
    %c0_103 = arith.constant 0 : index
    %203 = vector.load %arg3[%c0_102, %c0_103] : memref<128x512xbf16, #tpu.memory_space<vmem>>, vector<128x512xbf16>
    %cst_104 = arith.constant dense<0.000000e+00> : vector<16x512xf32>
    %204 = tpu.matmul %202, %203, %cst_104 {dimension_numbers = #tpu.dot_dimension_numbers<[1], [0], [0], [1], [0, 0, 1, 1], [], []>} : vector<16x128xbf16>, vector<128x512xbf16>, vector<16x512xf32> -> vector<16x512xf32>
    %205 = arith.addf %201, %204 : vector<16x512xf32>
    %206 = vector.extract_strided_slice %205 {offsets = [0, 0], sizes = [16, 384], strides = [1, 1]} : vector<16x512xf32> to vector<16x384xf32>
    %207 = arith.negf %206 : vector<16x384xf32>
    %208 = math.exp %207 : vector<16x384xf32>
    %cst_105 = arith.constant 1.000000e+00 : f32
    %209 = vector.broadcast %cst_105 : f32 to vector<16x384xf32>
    %210 = arith.addf %209, %208 : vector<16x384xf32>
    %211 = arith.divf %209, %210 : vector<16x384xf32>
    %212 = vector.extract_strided_slice %211 {offsets = [0, 0], sizes = [16, 128], strides = [1, 1]} : vector<16x384xf32> to vector<16x128xf32>
    %213 = vector.extract_strided_slice %211 {offsets = [0, 128], sizes = [16, 128], strides = [1, 1]} : vector<16x384xf32> to vector<16x128xf32>
    %214 = vector.extract_strided_slice %211 {offsets = [0, 256], sizes = [16, 128], strides = [1, 1]} : vector<16x384xf32> to vector<16x128xf32>
    %215 = vector.extract_strided_slice %205 {offsets = [0, 384], sizes = [16, 128], strides = [1, 1]} : vector<16x512xf32> to vector<16x128xf32>
    %216 = math.tanh %215 : vector<16x128xf32>
    %c0_106 = arith.constant 0 : index
    %c0_107 = arith.constant 0 : index
    %217 = vector.load %arg9[%c0_106, %c0_107] : memref<16x128xf32, #tpu.memory_space<vmem>>, vector<16x128xf32>
    %218 = arith.mulf %213, %217 : vector<16x128xf32>
    %219 = arith.mulf %212, %216 : vector<16x128xf32>
    %220 = arith.addf %218, %219 : vector<16x128xf32>
    %221 = math.tanh %220 : vector<16x128xf32>
    %222 = arith.mulf %214, %221 : vector<16x128xf32>
    %223 = arith.truncf %222 : vector<16x128xf32> to vector<16x128xbf16>
    %c0_108 = arith.constant 0 : index
    %c0_109 = arith.constant 0 : index
    %224 = vector.load %arg9[%c0_108, %c0_109] : memref<16x128xf32, #tpu.memory_space<vmem>>, vector<16x128xf32>
    tpu.vector_store %arg9[%c0_108, %c0_109], %220 {strides = array<i32>} : memref<16x128xf32, #tpu.memory_space<vmem>>, vector<16x128xf32>,
    %c0_110 = arith.constant 0 : index
    %c0_111 = arith.constant 0 : index
    %225 = vector.load %arg8[%c0_110, %c0_111] : memref<16x128xbf16, #tpu.memory_space<vmem>>, vector<16x128xbf16>
    tpu.vector_store %arg8[%c0_110, %c0_111], %223 {strides = array<i32>} : memref<16x128xbf16, #tpu.memory_space<vmem>>, vector<16x128xbf16>,
    %226 = arith.index_cast %198 : i32 to index
    %c0_112 = arith.constant 0 : index
    %227 = vector.load %arg7[%226, %c0_112] : memref<128x128xbf16, #tpu.memory_space<vmem>>, vector<16x128xbf16>
    tpu.vector_store %arg7[%226, %c0_112], %223 {strides = array<i32>} : memref<128x128xbf16, #tpu.memory_space<vmem>>, vector<16x128xbf16>,
    %c7_i32 = arith.constant 7 : i32
    %c16_i32_113 = arith.constant 16 : i32
    %228 = arith.muli %c7_i32, %c16_i32_113 : i32
    %229 = tpu.assume_multiple %228, 16 : i32
    %230 = arith.index_cast %229 : i32 to index
    %c0_114 = arith.constant 0 : index
    %231 = vector.load %arg10[%230, %c0_114] : memref<128x512xbf16, #tpu.memory_space<vmem>>, vector<16x512xbf16>
    %232 = arith.extf %231 : vector<16x512xbf16> to vector<16x512xf32>
    %c0_115 = arith.constant 0 : index
    %c0_116 = arith.constant 0 : index
    %233 = vector.load %arg8[%c0_115, %c0_116] : memref<16x128xbf16, #tpu.memory_space<vmem>>, vector<16x128xbf16>
    %c0_117 = arith.constant 0 : index
    %c0_118 = arith.constant 0 : index
    %234 = vector.load %arg3[%c0_117, %c0_118] : memref<128x512xbf16, #tpu.memory_space<vmem>>, vector<128x512xbf16>
    %cst_119 = arith.constant dense<0.000000e+00> : vector<16x512xf32>
    %235 = tpu.matmul %233, %234, %cst_119 {dimension_numbers = #tpu.dot_dimension_numbers<[1], [0], [0], [1], [0, 0, 1, 1], [], []>} : vector<16x128xbf16>, vector<128x512xbf16>, vector<16x512xf32> -> vector<16x512xf32>
    %236 = arith.addf %232, %235 : vector<16x512xf32>
    %237 = vector.extract_strided_slice %236 {offsets = [0, 0], sizes = [16, 384], strides = [1, 1]} : vector<16x512xf32> to vector<16x384xf32>
    %238 = arith.negf %237 : vector<16x384xf32>
    %239 = math.exp %238 : vector<16x384xf32>
    %cst_120 = arith.constant 1.000000e+00 : f32
    %240 = vector.broadcast %cst_120 : f32 to vector<16x384xf32>
    %241 = arith.addf %240, %239 : vector<16x384xf32>
    %242 = arith.divf %240, %241 : vector<16x384xf32>
    %243 = vector.extract_strided_slice %242 {offsets = [0, 0], sizes = [16, 128], strides = [1, 1]} : vector<16x384xf32> to vector<16x128xf32>
    %244 = vector.extract_strided_slice %242 {offsets = [0, 128], sizes = [16, 128], strides = [1, 1]} : vector<16x384xf32> to vector<16x128xf32>
    %245 = vector.extract_strided_slice %242 {offsets = [0, 256], sizes = [16, 128], strides = [1, 1]} : vector<16x384xf32> to vector<16x128xf32>
    %246 = vector.extract_strided_slice %236 {offsets = [0, 384], sizes = [16, 128], strides = [1, 1]} : vector<16x512xf32> to vector<16x128xf32>
    %247 = math.tanh %246 : vector<16x128xf32>
    %c0_121 = arith.constant 0 : index
    %c0_122 = arith.constant 0 : index
    %248 = vector.load %arg9[%c0_121, %c0_122] : memref<16x128xf32, #tpu.memory_space<vmem>>, vector<16x128xf32>
    %249 = arith.mulf %244, %248 : vector<16x128xf32>
    %250 = arith.mulf %243, %247 : vector<16x128xf32>
    %251 = arith.addf %249, %250 : vector<16x128xf32>
    %252 = math.tanh %251 : vector<16x128xf32>
    %253 = arith.mulf %245, %252 : vector<16x128xf32>
    %254 = arith.truncf %253 : vector<16x128xf32> to vector<16x128xbf16>
    %c0_123 = arith.constant 0 : index
    %c0_124 = arith.constant 0 : index
    %255 = vector.load %arg9[%c0_123, %c0_124] : memref<16x128xf32, #tpu.memory_space<vmem>>, vector<16x128xf32>
    tpu.vector_store %arg9[%c0_123, %c0_124], %251 {strides = array<i32>} : memref<16x128xf32, #tpu.memory_space<vmem>>, vector<16x128xf32>,
    %c0_125 = arith.constant 0 : index
    %c0_126 = arith.constant 0 : index
    %256 = vector.load %arg8[%c0_125, %c0_126] : memref<16x128xbf16, #tpu.memory_space<vmem>>, vector<16x128xbf16>
    tpu.vector_store %arg8[%c0_125, %c0_126], %254 {strides = array<i32>} : memref<16x128xbf16, #tpu.memory_space<vmem>>, vector<16x128xbf16>,
    %257 = arith.index_cast %229 : i32 to index
    %c0_127 = arith.constant 0 : index
    %258 = vector.load %arg7[%257, %c0_127] : memref<128x128xbf16, #tpu.memory_space<vmem>>, vector<16x128xbf16>
    tpu.vector_store %arg7[%257, %c0_127], %254 {strides = array<i32>} : memref<128x128xbf16, #tpu.memory_space<vmem>>, vector<16x128xbf16>,
    %c8_i32 = arith.constant 8 : i32
    return
  }
  func.func @transform_0(%arg0: i32) -> (i32, i32) {
    %c0_i32 = arith.constant 0 : i32
    %c0_i32_0 = arith.constant 0 : i32
    return %arg0, %c0_i32 : i32, i32
  }
  func.func @transform_1(%arg0: i32) -> (i32, i32) {
    %c0_i32 = arith.constant 0 : i32
    %c0_i32_0 = arith.constant 0 : i32
    %c0_i32_1 = arith.constant 0 : i32
    return %c0_i32, %c0_i32_0 : i32, i32
  }
  func.func @transform_2(%arg0: i32) -> (i32, i32) {
    %c0_i32 = arith.constant 0 : i32
    %c0_i32_0 = arith.constant 0 : i32
    %c0_i32_1 = arith.constant 0 : i32
    return %c0_i32, %c0_i32_0 : i32, i32
  }
  func.func @transform_3(%arg0: i32) -> (i32, i32) {
    %c0_i32 = arith.constant 0 : i32
    %c0_i32_0 = arith.constant 0 : i32
    %c0_i32_1 = arith.constant 0 : i32
    return %c0_i32, %c0_i32_0 : i32, i32
  }
  func.func @transform_4(%arg0: i32) -> (i32, i32) {
    %c0_i32 = arith.constant 0 : i32
    %c0_i32_0 = arith.constant 0 : i32
    %c0_i32_1 = arith.constant 0 : i32
    return %c0_i32, %c0_i32_0 : i32, i32
  }
  func.func @transform_5(%arg0: i32) -> (i32, i32) {
    %c0_i32 = arith.constant 0 : i32
    %c0_i32_0 = arith.constant 0 : i32
    %c0_i32_1 = arith.constant 0 : i32
    return %c0_i32, %c0_i32_0 : i32, i32
  }
  func.func @transform_6(%arg0: i32) -> (i32, i32) {
    %c0_i32 = arith.constant 0 : i32
    %c0_i32_0 = arith.constant 0 : i32
    return %arg0, %c0_i32 : i32, i32
  }
}

module attributes {stable_mosaic.version = 11 : i64} {
  func.func @lstm_last_kernel(%arg0: i32, %arg1: memref<128x128xbf16, #tpu.memory_space<vmem>>, %arg2: memref<128x512xbf16, #tpu.memory_space<vmem>>, %arg3: memref<128x512xbf16, #tpu.memory_space<vmem>>, %arg4: memref<1x512xf32, #tpu.memory_space<vmem>>, %arg5: memref<1x128xf32, #tpu.memory_space<vmem>>, %arg6: memref<1x128xf32, #tpu.memory_space<vmem>>, %arg7: memref<128x4xbf16, #tpu.memory_space<vmem>>, %arg8: memref<1x4xf32, #tpu.memory_space<vmem>>, %arg9: memref<16x4xf32, #tpu.memory_space<vmem>>, %arg10: memref<16x128xbf16, #tpu.memory_space<vmem>>, %arg11: memref<16x128xf32, #tpu.memory_space<vmem>>, %arg12: memref<128x512xbf16, #tpu.memory_space<vmem>>) attributes {dimension_semantics = [#tpu.dimension_semantics<arbitrary>], iteration_bounds = array<i64: 1>, scalar_prefetch = 0 : i64, scratch_operands = 3 : i64, tpu.core_type = #tpu.core_type<tc>, window_params = [{transform_indices = @transform_0, window_bounds = array<i64: 128, 128>}, {pipeline_mode = #tpu.pipeline_mode<synchronous>, transform_indices = @transform_1, window_bounds = array<i64: 128, 512>}, {pipeline_mode = #tpu.pipeline_mode<synchronous>, transform_indices = @transform_2, window_bounds = array<i64: 128, 512>}, {pipeline_mode = #tpu.pipeline_mode<synchronous>, transform_indices = @transform_3, window_bounds = array<i64: 1, 512>}, {pipeline_mode = #tpu.pipeline_mode<synchronous>, transform_indices = @transform_4, window_bounds = array<i64: 1, 128>}, {pipeline_mode = #tpu.pipeline_mode<synchronous>, transform_indices = @transform_5, window_bounds = array<i64: 1, 128>}, {pipeline_mode = #tpu.pipeline_mode<synchronous>, transform_indices = @transform_6, window_bounds = array<i64: 128, 4>}, {pipeline_mode = #tpu.pipeline_mode<synchronous>, transform_indices = @transform_7, window_bounds = array<i64: 1, 4>}, {pipeline_mode = #tpu.pipeline_mode<synchronous>, transform_indices = @transform_8, window_bounds = array<i64: 16, 4>}]} {
    %c0_i32 = arith.constant 0 : i32
    %0 = arith.cmpi eq, %arg0, %c0_i32 : i32
    %1 = arith.extui %0 : i1 to i32
    %c0_i32_0 = arith.constant 0 : i32
    %2 = arith.cmpi ne, %1, %c0_i32_0 : i32
    scf.if %2 {
      %c0_122 = arith.constant 0 : index
      %c0_123 = arith.constant 0 : index
      %246 = vector.load %arg5[%c0_122, %c0_123] : memref<1x128xf32, #tpu.memory_space<vmem>>, vector<1x128xf32>
      %247 = vector.shape_cast %246 : vector<1x128xf32> to vector<1x128xf32>
      %248 = vector.broadcast %247 : vector<1x128xf32> to vector<16x128xf32>
      %249 = arith.truncf %248 : vector<16x128xf32> to vector<16x128xbf16>
      %c0_124 = arith.constant 0 : index
      %c0_125 = arith.constant 0 : index
      %250 = vector.load %arg10[%c0_124, %c0_125] : memref<16x128xbf16, #tpu.memory_space<vmem>>, vector<16x128xbf16>
      tpu.vector_store %arg10[%c0_124, %c0_125], %249 {strides = array<i32>} : memref<16x128xbf16, #tpu.memory_space<vmem>>, vector<16x128xbf16>,
      %c0_126 = arith.constant 0 : index
      %c0_127 = arith.constant 0 : index
      %251 = vector.load %arg6[%c0_126, %c0_127] : memref<1x128xf32, #tpu.memory_space<vmem>>, vector<1x128xf32>
      %252 = vector.shape_cast %251 : vector<1x128xf32> to vector<1x128xf32>
      %253 = vector.broadcast %252 : vector<1x128xf32> to vector<16x128xf32>
      %c0_128 = arith.constant 0 : index
      %c0_129 = arith.constant 0 : index
      %254 = vector.load %arg11[%c0_128, %c0_129] : memref<16x128xf32, #tpu.memory_space<vmem>>, vector<16x128xf32>
      tpu.vector_store %arg11[%c0_128, %c0_129], %253 {strides = array<i32>} : memref<16x128xf32, #tpu.memory_space<vmem>>, vector<16x128xf32>,
    } else {
    }
    %c0 = arith.constant 0 : index
    %c0_1 = arith.constant 0 : index
    %3 = vector.load %arg1[%c0, %c0_1] : memref<128x128xbf16, #tpu.memory_space<vmem>>, vector<128x128xbf16>
    %c0_2 = arith.constant 0 : index
    %c0_3 = arith.constant 0 : index
    %4 = vector.load %arg2[%c0_2, %c0_3] : memref<128x512xbf16, #tpu.memory_space<vmem>>, vector<128x512xbf16>
    %cst = arith.constant dense<0.000000e+00> : vector<128x512xf32>
    %5 = tpu.matmul %3, %4, %cst {dimension_numbers = #tpu.dot_dimension_numbers<[1], [0], [0], [1], [0, 0, 1, 1], [], []>} : vector<128x128xbf16>, vector<128x512xbf16>, vector<128x512xf32> -> vector<128x512xf32>
    %c0_4 = arith.constant 0 : index
    %c0_5 = arith.constant 0 : index
    %6 = vector.load %arg4[%c0_4, %c0_5] : memref<1x512xf32, #tpu.memory_space<vmem>>, vector<1x512xf32>
    %7 = vector.broadcast %6 : vector<1x512xf32> to vector<128x512xf32>
    %8 = arith.addf %5, %7 : vector<128x512xf32>
    %9 = arith.truncf %8 : vector<128x512xf32> to vector<128x512xbf16>
    %c0_6 = arith.constant 0 : index
    %c0_7 = arith.constant 0 : index
    %10 = vector.load %arg12[%c0_6, %c0_7] : memref<128x512xbf16, #tpu.memory_space<vmem>>, vector<128x512xbf16>
    tpu.vector_store %arg12[%c0_6, %c0_7], %9 {strides = array<i32>} : memref<128x512xbf16, #tpu.memory_space<vmem>>, vector<128x512xbf16>,
    %c0_i32_8 = arith.constant 0 : i32
    %c16_i32 = arith.constant 16 : i32
    %11 = arith.muli %c0_i32_8, %c16_i32 : i32
    %12 = tpu.assume_multiple %11, 16 : i32
    %13 = arith.index_cast %12 : i32 to index
    %c0_9 = arith.constant 0 : index
    %14 = vector.load %arg12[%13, %c0_9] : memref<128x512xbf16, #tpu.memory_space<vmem>>, vector<16x512xbf16>
    %15 = arith.extf %14 : vector<16x512xbf16> to vector<16x512xf32>
    %c0_10 = arith.constant 0 : index
    %c0_11 = arith.constant 0 : index
    %16 = vector.load %arg10[%c0_10, %c0_11] : memref<16x128xbf16, #tpu.memory_space<vmem>>, vector<16x128xbf16>
    %c0_12 = arith.constant 0 : index
    %c0_13 = arith.constant 0 : index
    %17 = vector.load %arg3[%c0_12, %c0_13] : memref<128x512xbf16, #tpu.memory_space<vmem>>, vector<128x512xbf16>
    %cst_14 = arith.constant dense<0.000000e+00> : vector<16x512xf32>
    %18 = tpu.matmul %16, %17, %cst_14 {dimension_numbers = #tpu.dot_dimension_numbers<[1], [0], [0], [1], [0, 0, 1, 1], [], []>} : vector<16x128xbf16>, vector<128x512xbf16>, vector<16x512xf32> -> vector<16x512xf32>
    %19 = arith.addf %15, %18 : vector<16x512xf32>
    %20 = vector.extract_strided_slice %19 {offsets = [0, 0], sizes = [16, 384], strides = [1, 1]} : vector<16x512xf32> to vector<16x384xf32>
    %21 = arith.negf %20 : vector<16x384xf32>
    %22 = math.exp %21 : vector<16x384xf32>
    %cst_15 = arith.constant 1.000000e+00 : f32
    %23 = vector.broadcast %cst_15 : f32 to vector<16x384xf32>
    %24 = arith.addf %23, %22 : vector<16x384xf32>
    %25 = arith.divf %23, %24 : vector<16x384xf32>
    %26 = vector.extract_strided_slice %25 {offsets = [0, 0], sizes = [16, 128], strides = [1, 1]} : vector<16x384xf32> to vector<16x128xf32>
    %27 = vector.extract_strided_slice %25 {offsets = [0, 128], sizes = [16, 128], strides = [1, 1]} : vector<16x384xf32> to vector<16x128xf32>
    %28 = vector.extract_strided_slice %25 {offsets = [0, 256], sizes = [16, 128], strides = [1, 1]} : vector<16x384xf32> to vector<16x128xf32>
    %29 = vector.extract_strided_slice %19 {offsets = [0, 384], sizes = [16, 128], strides = [1, 1]} : vector<16x512xf32> to vector<16x128xf32>
    %30 = math.tanh %29 : vector<16x128xf32>
    %c0_16 = arith.constant 0 : index
    %c0_17 = arith.constant 0 : index
    %31 = vector.load %arg11[%c0_16, %c0_17] : memref<16x128xf32, #tpu.memory_space<vmem>>, vector<16x128xf32>
    %32 = arith.mulf %27, %31 : vector<16x128xf32>
    %33 = arith.mulf %26, %30 : vector<16x128xf32>
    %34 = arith.addf %32, %33 : vector<16x128xf32>
    %35 = math.tanh %34 : vector<16x128xf32>
    %36 = arith.mulf %28, %35 : vector<16x128xf32>
    %37 = arith.truncf %36 : vector<16x128xf32> to vector<16x128xbf16>
    %c0_18 = arith.constant 0 : index
    %c0_19 = arith.constant 0 : index
    %38 = vector.load %arg11[%c0_18, %c0_19] : memref<16x128xf32, #tpu.memory_space<vmem>>, vector<16x128xf32>
    tpu.vector_store %arg11[%c0_18, %c0_19], %34 {strides = array<i32>} : memref<16x128xf32, #tpu.memory_space<vmem>>, vector<16x128xf32>,
    %c0_20 = arith.constant 0 : index
    %c0_21 = arith.constant 0 : index
    %39 = vector.load %arg10[%c0_20, %c0_21] : memref<16x128xbf16, #tpu.memory_space<vmem>>, vector<16x128xbf16>
    tpu.vector_store %arg10[%c0_20, %c0_21], %37 {strides = array<i32>} : memref<16x128xbf16, #tpu.memory_space<vmem>>, vector<16x128xbf16>,
    %c1_i32 = arith.constant 1 : i32
    %c16_i32_22 = arith.constant 16 : i32
    %40 = arith.muli %c1_i32, %c16_i32_22 : i32
    %41 = tpu.assume_multiple %40, 16 : i32
    %42 = arith.index_cast %41 : i32 to index
    %c0_23 = arith.constant 0 : index
    %43 = vector.load %arg12[%42, %c0_23] : memref<128x512xbf16, #tpu.memory_space<vmem>>, vector<16x512xbf16>
    %44 = arith.extf %43 : vector<16x512xbf16> to vector<16x512xf32>
    %c0_24 = arith.constant 0 : index
    %c0_25 = arith.constant 0 : index
    %45 = vector.load %arg10[%c0_24, %c0_25] : memref<16x128xbf16, #tpu.memory_space<vmem>>, vector<16x128xbf16>
    %c0_26 = arith.constant 0 : index
    %c0_27 = arith.constant 0 : index
    %46 = vector.load %arg3[%c0_26, %c0_27] : memref<128x512xbf16, #tpu.memory_space<vmem>>, vector<128x512xbf16>
    %cst_28 = arith.constant dense<0.000000e+00> : vector<16x512xf32>
    %47 = tpu.matmul %45, %46, %cst_28 {dimension_numbers = #tpu.dot_dimension_numbers<[1], [0], [0], [1], [0, 0, 1, 1], [], []>} : vector<16x128xbf16>, vector<128x512xbf16>, vector<16x512xf32> -> vector<16x512xf32>
    %48 = arith.addf %44, %47 : vector<16x512xf32>
    %49 = vector.extract_strided_slice %48 {offsets = [0, 0], sizes = [16, 384], strides = [1, 1]} : vector<16x512xf32> to vector<16x384xf32>
    %50 = arith.negf %49 : vector<16x384xf32>
    %51 = math.exp %50 : vector<16x384xf32>
    %cst_29 = arith.constant 1.000000e+00 : f32
    %52 = vector.broadcast %cst_29 : f32 to vector<16x384xf32>
    %53 = arith.addf %52, %51 : vector<16x384xf32>
    %54 = arith.divf %52, %53 : vector<16x384xf32>
    %55 = vector.extract_strided_slice %54 {offsets = [0, 0], sizes = [16, 128], strides = [1, 1]} : vector<16x384xf32> to vector<16x128xf32>
    %56 = vector.extract_strided_slice %54 {offsets = [0, 128], sizes = [16, 128], strides = [1, 1]} : vector<16x384xf32> to vector<16x128xf32>
    %57 = vector.extract_strided_slice %54 {offsets = [0, 256], sizes = [16, 128], strides = [1, 1]} : vector<16x384xf32> to vector<16x128xf32>
    %58 = vector.extract_strided_slice %48 {offsets = [0, 384], sizes = [16, 128], strides = [1, 1]} : vector<16x512xf32> to vector<16x128xf32>
    %59 = math.tanh %58 : vector<16x128xf32>
    %c0_30 = arith.constant 0 : index
    %c0_31 = arith.constant 0 : index
    %60 = vector.load %arg11[%c0_30, %c0_31] : memref<16x128xf32, #tpu.memory_space<vmem>>, vector<16x128xf32>
    %61 = arith.mulf %56, %60 : vector<16x128xf32>
    %62 = arith.mulf %55, %59 : vector<16x128xf32>
    %63 = arith.addf %61, %62 : vector<16x128xf32>
    %64 = math.tanh %63 : vector<16x128xf32>
    %65 = arith.mulf %57, %64 : vector<16x128xf32>
    %66 = arith.truncf %65 : vector<16x128xf32> to vector<16x128xbf16>
    %c0_32 = arith.constant 0 : index
    %c0_33 = arith.constant 0 : index
    %67 = vector.load %arg11[%c0_32, %c0_33] : memref<16x128xf32, #tpu.memory_space<vmem>>, vector<16x128xf32>
    tpu.vector_store %arg11[%c0_32, %c0_33], %63 {strides = array<i32>} : memref<16x128xf32, #tpu.memory_space<vmem>>, vector<16x128xf32>,
    %c0_34 = arith.constant 0 : index
    %c0_35 = arith.constant 0 : index
    %68 = vector.load %arg10[%c0_34, %c0_35] : memref<16x128xbf16, #tpu.memory_space<vmem>>, vector<16x128xbf16>
    tpu.vector_store %arg10[%c0_34, %c0_35], %66 {strides = array<i32>} : memref<16x128xbf16, #tpu.memory_space<vmem>>, vector<16x128xbf16>,
    %c2_i32 = arith.constant 2 : i32
    %c16_i32_36 = arith.constant 16 : i32
    %69 = arith.muli %c2_i32, %c16_i32_36 : i32
    %70 = tpu.assume_multiple %69, 16 : i32
    %71 = arith.index_cast %70 : i32 to index
    %c0_37 = arith.constant 0 : index
    %72 = vector.load %arg12[%71, %c0_37] : memref<128x512xbf16, #tpu.memory_space<vmem>>, vector<16x512xbf16>
    %73 = arith.extf %72 : vector<16x512xbf16> to vector<16x512xf32>
    %c0_38 = arith.constant 0 : index
    %c0_39 = arith.constant 0 : index
    %74 = vector.load %arg10[%c0_38, %c0_39] : memref<16x128xbf16, #tpu.memory_space<vmem>>, vector<16x128xbf16>
    %c0_40 = arith.constant 0 : index
    %c0_41 = arith.constant 0 : index
    %75 = vector.load %arg3[%c0_40, %c0_41] : memref<128x512xbf16, #tpu.memory_space<vmem>>, vector<128x512xbf16>
    %cst_42 = arith.constant dense<0.000000e+00> : vector<16x512xf32>
    %76 = tpu.matmul %74, %75, %cst_42 {dimension_numbers = #tpu.dot_dimension_numbers<[1], [0], [0], [1], [0, 0, 1, 1], [], []>} : vector<16x128xbf16>, vector<128x512xbf16>, vector<16x512xf32> -> vector<16x512xf32>
    %77 = arith.addf %73, %76 : vector<16x512xf32>
    %78 = vector.extract_strided_slice %77 {offsets = [0, 0], sizes = [16, 384], strides = [1, 1]} : vector<16x512xf32> to vector<16x384xf32>
    %79 = arith.negf %78 : vector<16x384xf32>
    %80 = math.exp %79 : vector<16x384xf32>
    %cst_43 = arith.constant 1.000000e+00 : f32
    %81 = vector.broadcast %cst_43 : f32 to vector<16x384xf32>
    %82 = arith.addf %81, %80 : vector<16x384xf32>
    %83 = arith.divf %81, %82 : vector<16x384xf32>
    %84 = vector.extract_strided_slice %83 {offsets = [0, 0], sizes = [16, 128], strides = [1, 1]} : vector<16x384xf32> to vector<16x128xf32>
    %85 = vector.extract_strided_slice %83 {offsets = [0, 128], sizes = [16, 128], strides = [1, 1]} : vector<16x384xf32> to vector<16x128xf32>
    %86 = vector.extract_strided_slice %83 {offsets = [0, 256], sizes = [16, 128], strides = [1, 1]} : vector<16x384xf32> to vector<16x128xf32>
    %87 = vector.extract_strided_slice %77 {offsets = [0, 384], sizes = [16, 128], strides = [1, 1]} : vector<16x512xf32> to vector<16x128xf32>
    %88 = math.tanh %87 : vector<16x128xf32>
    %c0_44 = arith.constant 0 : index
    %c0_45 = arith.constant 0 : index
    %89 = vector.load %arg11[%c0_44, %c0_45] : memref<16x128xf32, #tpu.memory_space<vmem>>, vector<16x128xf32>
    %90 = arith.mulf %85, %89 : vector<16x128xf32>
    %91 = arith.mulf %84, %88 : vector<16x128xf32>
    %92 = arith.addf %90, %91 : vector<16x128xf32>
    %93 = math.tanh %92 : vector<16x128xf32>
    %94 = arith.mulf %86, %93 : vector<16x128xf32>
    %95 = arith.truncf %94 : vector<16x128xf32> to vector<16x128xbf16>
    %c0_46 = arith.constant 0 : index
    %c0_47 = arith.constant 0 : index
    %96 = vector.load %arg11[%c0_46, %c0_47] : memref<16x128xf32, #tpu.memory_space<vmem>>, vector<16x128xf32>
    tpu.vector_store %arg11[%c0_46, %c0_47], %92 {strides = array<i32>} : memref<16x128xf32, #tpu.memory_space<vmem>>, vector<16x128xf32>,
    %c0_48 = arith.constant 0 : index
    %c0_49 = arith.constant 0 : index
    %97 = vector.load %arg10[%c0_48, %c0_49] : memref<16x128xbf16, #tpu.memory_space<vmem>>, vector<16x128xbf16>
    tpu.vector_store %arg10[%c0_48, %c0_49], %95 {strides = array<i32>} : memref<16x128xbf16, #tpu.memory_space<vmem>>, vector<16x128xbf16>,
    %c3_i32 = arith.constant 3 : i32
    %c16_i32_50 = arith.constant 16 : i32
    %98 = arith.muli %c3_i32, %c16_i32_50 : i32
    %99 = tpu.assume_multiple %98, 16 : i32
    %100 = arith.index_cast %99 : i32 to index
    %c0_51 = arith.constant 0 : index
    %101 = vector.load %arg12[%100, %c0_51] : memref<128x512xbf16, #tpu.memory_space<vmem>>, vector<16x512xbf16>
    %102 = arith.extf %101 : vector<16x512xbf16> to vector<16x512xf32>
    %c0_52 = arith.constant 0 : index
    %c0_53 = arith.constant 0 : index
    %103 = vector.load %arg10[%c0_52, %c0_53] : memref<16x128xbf16, #tpu.memory_space<vmem>>, vector<16x128xbf16>
    %c0_54 = arith.constant 0 : index
    %c0_55 = arith.constant 0 : index
    %104 = vector.load %arg3[%c0_54, %c0_55] : memref<128x512xbf16, #tpu.memory_space<vmem>>, vector<128x512xbf16>
    %cst_56 = arith.constant dense<0.000000e+00> : vector<16x512xf32>
    %105 = tpu.matmul %103, %104, %cst_56 {dimension_numbers = #tpu.dot_dimension_numbers<[1], [0], [0], [1], [0, 0, 1, 1], [], []>} : vector<16x128xbf16>, vector<128x512xbf16>, vector<16x512xf32> -> vector<16x512xf32>
    %106 = arith.addf %102, %105 : vector<16x512xf32>
    %107 = vector.extract_strided_slice %106 {offsets = [0, 0], sizes = [16, 384], strides = [1, 1]} : vector<16x512xf32> to vector<16x384xf32>
    %108 = arith.negf %107 : vector<16x384xf32>
    %109 = math.exp %108 : vector<16x384xf32>
    %cst_57 = arith.constant 1.000000e+00 : f32
    %110 = vector.broadcast %cst_57 : f32 to vector<16x384xf32>
    %111 = arith.addf %110, %109 : vector<16x384xf32>
    %112 = arith.divf %110, %111 : vector<16x384xf32>
    %113 = vector.extract_strided_slice %112 {offsets = [0, 0], sizes = [16, 128], strides = [1, 1]} : vector<16x384xf32> to vector<16x128xf32>
    %114 = vector.extract_strided_slice %112 {offsets = [0, 128], sizes = [16, 128], strides = [1, 1]} : vector<16x384xf32> to vector<16x128xf32>
    %115 = vector.extract_strided_slice %112 {offsets = [0, 256], sizes = [16, 128], strides = [1, 1]} : vector<16x384xf32> to vector<16x128xf32>
    %116 = vector.extract_strided_slice %106 {offsets = [0, 384], sizes = [16, 128], strides = [1, 1]} : vector<16x512xf32> to vector<16x128xf32>
    %117 = math.tanh %116 : vector<16x128xf32>
    %c0_58 = arith.constant 0 : index
    %c0_59 = arith.constant 0 : index
    %118 = vector.load %arg11[%c0_58, %c0_59] : memref<16x128xf32, #tpu.memory_space<vmem>>, vector<16x128xf32>
    %119 = arith.mulf %114, %118 : vector<16x128xf32>
    %120 = arith.mulf %113, %117 : vector<16x128xf32>
    %121 = arith.addf %119, %120 : vector<16x128xf32>
    %122 = math.tanh %121 : vector<16x128xf32>
    %123 = arith.mulf %115, %122 : vector<16x128xf32>
    %124 = arith.truncf %123 : vector<16x128xf32> to vector<16x128xbf16>
    %c0_60 = arith.constant 0 : index
    %c0_61 = arith.constant 0 : index
    %125 = vector.load %arg11[%c0_60, %c0_61] : memref<16x128xf32, #tpu.memory_space<vmem>>, vector<16x128xf32>
    tpu.vector_store %arg11[%c0_60, %c0_61], %121 {strides = array<i32>} : memref<16x128xf32, #tpu.memory_space<vmem>>, vector<16x128xf32>,
    %c0_62 = arith.constant 0 : index
    %c0_63 = arith.constant 0 : index
    %126 = vector.load %arg10[%c0_62, %c0_63] : memref<16x128xbf16, #tpu.memory_space<vmem>>, vector<16x128xbf16>
    tpu.vector_store %arg10[%c0_62, %c0_63], %124 {strides = array<i32>} : memref<16x128xbf16, #tpu.memory_space<vmem>>, vector<16x128xbf16>,
    %c4_i32 = arith.constant 4 : i32
    %c16_i32_64 = arith.constant 16 : i32
    %127 = arith.muli %c4_i32, %c16_i32_64 : i32
    %128 = tpu.assume_multiple %127, 16 : i32
    %129 = arith.index_cast %128 : i32 to index
    %c0_65 = arith.constant 0 : index
    %130 = vector.load %arg12[%129, %c0_65] : memref<128x512xbf16, #tpu.memory_space<vmem>>, vector<16x512xbf16>
    %131 = arith.extf %130 : vector<16x512xbf16> to vector<16x512xf32>
    %c0_66 = arith.constant 0 : index
    %c0_67 = arith.constant 0 : index
    %132 = vector.load %arg10[%c0_66, %c0_67] : memref<16x128xbf16, #tpu.memory_space<vmem>>, vector<16x128xbf16>
    %c0_68 = arith.constant 0 : index
    %c0_69 = arith.constant 0 : index
    %133 = vector.load %arg3[%c0_68, %c0_69] : memref<128x512xbf16, #tpu.memory_space<vmem>>, vector<128x512xbf16>
    %cst_70 = arith.constant dense<0.000000e+00> : vector<16x512xf32>
    %134 = tpu.matmul %132, %133, %cst_70 {dimension_numbers = #tpu.dot_dimension_numbers<[1], [0], [0], [1], [0, 0, 1, 1], [], []>} : vector<16x128xbf16>, vector<128x512xbf16>, vector<16x512xf32> -> vector<16x512xf32>
    %135 = arith.addf %131, %134 : vector<16x512xf32>
    %136 = vector.extract_strided_slice %135 {offsets = [0, 0], sizes = [16, 384], strides = [1, 1]} : vector<16x512xf32> to vector<16x384xf32>
    %137 = arith.negf %136 : vector<16x384xf32>
    %138 = math.exp %137 : vector<16x384xf32>
    %cst_71 = arith.constant 1.000000e+00 : f32
    %139 = vector.broadcast %cst_71 : f32 to vector<16x384xf32>
    %140 = arith.addf %139, %138 : vector<16x384xf32>
    %141 = arith.divf %139, %140 : vector<16x384xf32>
    %142 = vector.extract_strided_slice %141 {offsets = [0, 0], sizes = [16, 128], strides = [1, 1]} : vector<16x384xf32> to vector<16x128xf32>
    %143 = vector.extract_strided_slice %141 {offsets = [0, 128], sizes = [16, 128], strides = [1, 1]} : vector<16x384xf32> to vector<16x128xf32>
    %144 = vector.extract_strided_slice %141 {offsets = [0, 256], sizes = [16, 128], strides = [1, 1]} : vector<16x384xf32> to vector<16x128xf32>
    %145 = vector.extract_strided_slice %135 {offsets = [0, 384], sizes = [16, 128], strides = [1, 1]} : vector<16x512xf32> to vector<16x128xf32>
    %146 = math.tanh %145 : vector<16x128xf32>
    %c0_72 = arith.constant 0 : index
    %c0_73 = arith.constant 0 : index
    %147 = vector.load %arg11[%c0_72, %c0_73] : memref<16x128xf32, #tpu.memory_space<vmem>>, vector<16x128xf32>
    %148 = arith.mulf %143, %147 : vector<16x128xf32>
    %149 = arith.mulf %142, %146 : vector<16x128xf32>
    %150 = arith.addf %148, %149 : vector<16x128xf32>
    %151 = math.tanh %150 : vector<16x128xf32>
    %152 = arith.mulf %144, %151 : vector<16x128xf32>
    %153 = arith.truncf %152 : vector<16x128xf32> to vector<16x128xbf16>
    %c0_74 = arith.constant 0 : index
    %c0_75 = arith.constant 0 : index
    %154 = vector.load %arg11[%c0_74, %c0_75] : memref<16x128xf32, #tpu.memory_space<vmem>>, vector<16x128xf32>
    tpu.vector_store %arg11[%c0_74, %c0_75], %150 {strides = array<i32>} : memref<16x128xf32, #tpu.memory_space<vmem>>, vector<16x128xf32>,
    %c0_76 = arith.constant 0 : index
    %c0_77 = arith.constant 0 : index
    %155 = vector.load %arg10[%c0_76, %c0_77] : memref<16x128xbf16, #tpu.memory_space<vmem>>, vector<16x128xbf16>
    tpu.vector_store %arg10[%c0_76, %c0_77], %153 {strides = array<i32>} : memref<16x128xbf16, #tpu.memory_space<vmem>>, vector<16x128xbf16>,
    %c5_i32 = arith.constant 5 : i32
    %c16_i32_78 = arith.constant 16 : i32
    %156 = arith.muli %c5_i32, %c16_i32_78 : i32
    %157 = tpu.assume_multiple %156, 16 : i32
    %158 = arith.index_cast %157 : i32 to index
    %c0_79 = arith.constant 0 : index
    %159 = vector.load %arg12[%158, %c0_79] : memref<128x512xbf16, #tpu.memory_space<vmem>>, vector<16x512xbf16>
    %160 = arith.extf %159 : vector<16x512xbf16> to vector<16x512xf32>
    %c0_80 = arith.constant 0 : index
    %c0_81 = arith.constant 0 : index
    %161 = vector.load %arg10[%c0_80, %c0_81] : memref<16x128xbf16, #tpu.memory_space<vmem>>, vector<16x128xbf16>
    %c0_82 = arith.constant 0 : index
    %c0_83 = arith.constant 0 : index
    %162 = vector.load %arg3[%c0_82, %c0_83] : memref<128x512xbf16, #tpu.memory_space<vmem>>, vector<128x512xbf16>
    %cst_84 = arith.constant dense<0.000000e+00> : vector<16x512xf32>
    %163 = tpu.matmul %161, %162, %cst_84 {dimension_numbers = #tpu.dot_dimension_numbers<[1], [0], [0], [1], [0, 0, 1, 1], [], []>} : vector<16x128xbf16>, vector<128x512xbf16>, vector<16x512xf32> -> vector<16x512xf32>
    %164 = arith.addf %160, %163 : vector<16x512xf32>
    %165 = vector.extract_strided_slice %164 {offsets = [0, 0], sizes = [16, 384], strides = [1, 1]} : vector<16x512xf32> to vector<16x384xf32>
    %166 = arith.negf %165 : vector<16x384xf32>
    %167 = math.exp %166 : vector<16x384xf32>
    %cst_85 = arith.constant 1.000000e+00 : f32
    %168 = vector.broadcast %cst_85 : f32 to vector<16x384xf32>
    %169 = arith.addf %168, %167 : vector<16x384xf32>
    %170 = arith.divf %168, %169 : vector<16x384xf32>
    %171 = vector.extract_strided_slice %170 {offsets = [0, 0], sizes = [16, 128], strides = [1, 1]} : vector<16x384xf32> to vector<16x128xf32>
    %172 = vector.extract_strided_slice %170 {offsets = [0, 128], sizes = [16, 128], strides = [1, 1]} : vector<16x384xf32> to vector<16x128xf32>
    %173 = vector.extract_strided_slice %170 {offsets = [0, 256], sizes = [16, 128], strides = [1, 1]} : vector<16x384xf32> to vector<16x128xf32>
    %174 = vector.extract_strided_slice %164 {offsets = [0, 384], sizes = [16, 128], strides = [1, 1]} : vector<16x512xf32> to vector<16x128xf32>
    %175 = math.tanh %174 : vector<16x128xf32>
    %c0_86 = arith.constant 0 : index
    %c0_87 = arith.constant 0 : index
    %176 = vector.load %arg11[%c0_86, %c0_87] : memref<16x128xf32, #tpu.memory_space<vmem>>, vector<16x128xf32>
    %177 = arith.mulf %172, %176 : vector<16x128xf32>
    %178 = arith.mulf %171, %175 : vector<16x128xf32>
    %179 = arith.addf %177, %178 : vector<16x128xf32>
    %180 = math.tanh %179 : vector<16x128xf32>
    %181 = arith.mulf %173, %180 : vector<16x128xf32>
    %182 = arith.truncf %181 : vector<16x128xf32> to vector<16x128xbf16>
    %c0_88 = arith.constant 0 : index
    %c0_89 = arith.constant 0 : index
    %183 = vector.load %arg11[%c0_88, %c0_89] : memref<16x128xf32, #tpu.memory_space<vmem>>, vector<16x128xf32>
    tpu.vector_store %arg11[%c0_88, %c0_89], %179 {strides = array<i32>} : memref<16x128xf32, #tpu.memory_space<vmem>>, vector<16x128xf32>,
    %c0_90 = arith.constant 0 : index
    %c0_91 = arith.constant 0 : index
    %184 = vector.load %arg10[%c0_90, %c0_91] : memref<16x128xbf16, #tpu.memory_space<vmem>>, vector<16x128xbf16>
    tpu.vector_store %arg10[%c0_90, %c0_91], %182 {strides = array<i32>} : memref<16x128xbf16, #tpu.memory_space<vmem>>, vector<16x128xbf16>,
    %c6_i32 = arith.constant 6 : i32
    %c16_i32_92 = arith.constant 16 : i32
    %185 = arith.muli %c6_i32, %c16_i32_92 : i32
    %186 = tpu.assume_multiple %185, 16 : i32
    %187 = arith.index_cast %186 : i32 to index
    %c0_93 = arith.constant 0 : index
    %188 = vector.load %arg12[%187, %c0_93] : memref<128x512xbf16, #tpu.memory_space<vmem>>, vector<16x512xbf16>
    %189 = arith.extf %188 : vector<16x512xbf16> to vector<16x512xf32>
    %c0_94 = arith.constant 0 : index
    %c0_95 = arith.constant 0 : index
    %190 = vector.load %arg10[%c0_94, %c0_95] : memref<16x128xbf16, #tpu.memory_space<vmem>>, vector<16x128xbf16>
    %c0_96 = arith.constant 0 : index
    %c0_97 = arith.constant 0 : index
    %191 = vector.load %arg3[%c0_96, %c0_97] : memref<128x512xbf16, #tpu.memory_space<vmem>>, vector<128x512xbf16>
    %cst_98 = arith.constant dense<0.000000e+00> : vector<16x512xf32>
    %192 = tpu.matmul %190, %191, %cst_98 {dimension_numbers = #tpu.dot_dimension_numbers<[1], [0], [0], [1], [0, 0, 1, 1], [], []>} : vector<16x128xbf16>, vector<128x512xbf16>, vector<16x512xf32> -> vector<16x512xf32>
    %193 = arith.addf %189, %192 : vector<16x512xf32>
    %194 = vector.extract_strided_slice %193 {offsets = [0, 0], sizes = [16, 384], strides = [1, 1]} : vector<16x512xf32> to vector<16x384xf32>
    %195 = arith.negf %194 : vector<16x384xf32>
    %196 = math.exp %195 : vector<16x384xf32>
    %cst_99 = arith.constant 1.000000e+00 : f32
    %197 = vector.broadcast %cst_99 : f32 to vector<16x384xf32>
    %198 = arith.addf %197, %196 : vector<16x384xf32>
    %199 = arith.divf %197, %198 : vector<16x384xf32>
    %200 = vector.extract_strided_slice %199 {offsets = [0, 0], sizes = [16, 128], strides = [1, 1]} : vector<16x384xf32> to vector<16x128xf32>
    %201 = vector.extract_strided_slice %199 {offsets = [0, 128], sizes = [16, 128], strides = [1, 1]} : vector<16x384xf32> to vector<16x128xf32>
    %202 = vector.extract_strided_slice %199 {offsets = [0, 256], sizes = [16, 128], strides = [1, 1]} : vector<16x384xf32> to vector<16x128xf32>
    %203 = vector.extract_strided_slice %193 {offsets = [0, 384], sizes = [16, 128], strides = [1, 1]} : vector<16x512xf32> to vector<16x128xf32>
    %204 = math.tanh %203 : vector<16x128xf32>
    %c0_100 = arith.constant 0 : index
    %c0_101 = arith.constant 0 : index
    %205 = vector.load %arg11[%c0_100, %c0_101] : memref<16x128xf32, #tpu.memory_space<vmem>>, vector<16x128xf32>
    %206 = arith.mulf %201, %205 : vector<16x128xf32>
    %207 = arith.mulf %200, %204 : vector<16x128xf32>
    %208 = arith.addf %206, %207 : vector<16x128xf32>
    %209 = math.tanh %208 : vector<16x128xf32>
    %210 = arith.mulf %202, %209 : vector<16x128xf32>
    %211 = arith.truncf %210 : vector<16x128xf32> to vector<16x128xbf16>
    %c0_102 = arith.constant 0 : index
    %c0_103 = arith.constant 0 : index
    %212 = vector.load %arg11[%c0_102, %c0_103] : memref<16x128xf32, #tpu.memory_space<vmem>>, vector<16x128xf32>
    tpu.vector_store %arg11[%c0_102, %c0_103], %208 {strides = array<i32>} : memref<16x128xf32, #tpu.memory_space<vmem>>, vector<16x128xf32>,
    %c0_104 = arith.constant 0 : index
    %c0_105 = arith.constant 0 : index
    %213 = vector.load %arg10[%c0_104, %c0_105] : memref<16x128xbf16, #tpu.memory_space<vmem>>, vector<16x128xbf16>
    tpu.vector_store %arg10[%c0_104, %c0_105], %211 {strides = array<i32>} : memref<16x128xbf16, #tpu.memory_space<vmem>>, vector<16x128xbf16>,
    %c7_i32 = arith.constant 7 : i32
    %c16_i32_106 = arith.constant 16 : i32
    %214 = arith.muli %c7_i32, %c16_i32_106 : i32
    %215 = tpu.assume_multiple %214, 16 : i32
    %216 = arith.index_cast %215 : i32 to index
    %c0_107 = arith.constant 0 : index
    %217 = vector.load %arg12[%216, %c0_107] : memref<128x512xbf16, #tpu.memory_space<vmem>>, vector<16x512xbf16>
    %218 = arith.extf %217 : vector<16x512xbf16> to vector<16x512xf32>
    %c0_108 = arith.constant 0 : index
    %c0_109 = arith.constant 0 : index
    %219 = vector.load %arg10[%c0_108, %c0_109] : memref<16x128xbf16, #tpu.memory_space<vmem>>, vector<16x128xbf16>
    %c0_110 = arith.constant 0 : index
    %c0_111 = arith.constant 0 : index
    %220 = vector.load %arg3[%c0_110, %c0_111] : memref<128x512xbf16, #tpu.memory_space<vmem>>, vector<128x512xbf16>
    %cst_112 = arith.constant dense<0.000000e+00> : vector<16x512xf32>
    %221 = tpu.matmul %219, %220, %cst_112 {dimension_numbers = #tpu.dot_dimension_numbers<[1], [0], [0], [1], [0, 0, 1, 1], [], []>} : vector<16x128xbf16>, vector<128x512xbf16>, vector<16x512xf32> -> vector<16x512xf32>
    %222 = arith.addf %218, %221 : vector<16x512xf32>
    %223 = vector.extract_strided_slice %222 {offsets = [0, 0], sizes = [16, 384], strides = [1, 1]} : vector<16x512xf32> to vector<16x384xf32>
    %224 = arith.negf %223 : vector<16x384xf32>
    %225 = math.exp %224 : vector<16x384xf32>
    %cst_113 = arith.constant 1.000000e+00 : f32
    %226 = vector.broadcast %cst_113 : f32 to vector<16x384xf32>
    %227 = arith.addf %226, %225 : vector<16x384xf32>
    %228 = arith.divf %226, %227 : vector<16x384xf32>
    %229 = vector.extract_strided_slice %228 {offsets = [0, 0], sizes = [16, 128], strides = [1, 1]} : vector<16x384xf32> to vector<16x128xf32>
    %230 = vector.extract_strided_slice %228 {offsets = [0, 128], sizes = [16, 128], strides = [1, 1]} : vector<16x384xf32> to vector<16x128xf32>
    %231 = vector.extract_strided_slice %228 {offsets = [0, 256], sizes = [16, 128], strides = [1, 1]} : vector<16x384xf32> to vector<16x128xf32>
    %232 = vector.extract_strided_slice %222 {offsets = [0, 384], sizes = [16, 128], strides = [1, 1]} : vector<16x512xf32> to vector<16x128xf32>
    %233 = math.tanh %232 : vector<16x128xf32>
    %c0_114 = arith.constant 0 : index
    %c0_115 = arith.constant 0 : index
    %234 = vector.load %arg11[%c0_114, %c0_115] : memref<16x128xf32, #tpu.memory_space<vmem>>, vector<16x128xf32>
    %235 = arith.mulf %230, %234 : vector<16x128xf32>
    %236 = arith.mulf %229, %233 : vector<16x128xf32>
    %237 = arith.addf %235, %236 : vector<16x128xf32>
    %238 = math.tanh %237 : vector<16x128xf32>
    %239 = arith.mulf %231, %238 : vector<16x128xf32>
    %240 = arith.truncf %239 : vector<16x128xf32> to vector<16x128xbf16>
    %c0_116 = arith.constant 0 : index
    %c0_117 = arith.constant 0 : index
    %241 = vector.load %arg11[%c0_116, %c0_117] : memref<16x128xf32, #tpu.memory_space<vmem>>, vector<16x128xf32>
    tpu.vector_store %arg11[%c0_116, %c0_117], %237 {strides = array<i32>} : memref<16x128xf32, #tpu.memory_space<vmem>>, vector<16x128xf32>,
    %c0_118 = arith.constant 0 : index
    %c0_119 = arith.constant 0 : index
    %242 = vector.load %arg10[%c0_118, %c0_119] : memref<16x128xbf16, #tpu.memory_space<vmem>>, vector<16x128xbf16>
    tpu.vector_store %arg10[%c0_118, %c0_119], %240 {strides = array<i32>} : memref<16x128xbf16, #tpu.memory_space<vmem>>, vector<16x128xbf16>,
    %c8_i32 = arith.constant 8 : i32
    %c0_i32_120 = arith.constant 0 : i32
    %243 = arith.cmpi eq, %arg0, %c0_i32_120 : i32
    %244 = arith.extui %243 : i1 to i32
    %c0_i32_121 = arith.constant 0 : i32
    %245 = arith.cmpi ne, %244, %c0_i32_121 : i32
    scf.if %245 {
      %c0_122 = arith.constant 0 : index
      %c0_123 = arith.constant 0 : index
      %246 = vector.load %arg10[%c0_122, %c0_123] : memref<16x128xbf16, #tpu.memory_space<vmem>>, vector<16x128xbf16>
      %c0_124 = arith.constant 0 : index
      %c0_125 = arith.constant 0 : index
      %247 = vector.load %arg7[%c0_124, %c0_125] : memref<128x4xbf16, #tpu.memory_space<vmem>>, vector<128x4xbf16>
      %cst_126 = arith.constant dense<0.000000e+00> : vector<16x4xf32>
      %248 = tpu.matmul %246, %247, %cst_126 {dimension_numbers = #tpu.dot_dimension_numbers<[1], [0], [0], [1], [0, 0, 1, 1], [], []>} : vector<16x128xbf16>, vector<128x4xbf16>, vector<16x4xf32> -> vector<16x4xf32>
      %c0_127 = arith.constant 0 : index
      %c0_128 = arith.constant 0 : index
      %249 = vector.load %arg8[%c0_127, %c0_128] : memref<1x4xf32, #tpu.memory_space<vmem>>, vector<1x4xf32>
      %250 = vector.broadcast %249 : vector<1x4xf32> to vector<16x4xf32>
      %251 = arith.addf %248, %250 : vector<16x4xf32>
      %c0_129 = arith.constant 0 : index
      %c0_130 = arith.constant 0 : index
      %252 = vector.load %arg9[%c0_129, %c0_130] : memref<16x4xf32, #tpu.memory_space<vmem>>, vector<16x4xf32>
      tpu.vector_store %arg9[%c0_129, %c0_130], %251 {strides = array<i32>} : memref<16x4xf32, #tpu.memory_space<vmem>>, vector<16x4xf32>,
    } else {
    }
    return
  }
  func.func @transform_0(%arg0: i32) -> (i32, i32) {
    %c0_i32 = arith.constant 0 : i32
    %c0_i32_0 = arith.constant 0 : i32
    return %arg0, %c0_i32 : i32, i32
  }
  func.func @transform_1(%arg0: i32) -> (i32, i32) {
    %c0_i32 = arith.constant 0 : i32
    %c0_i32_0 = arith.constant 0 : i32
    %c0_i32_1 = arith.constant 0 : i32
    return %c0_i32, %c0_i32_0 : i32, i32
  }
  func.func @transform_2(%arg0: i32) -> (i32, i32) {
    %c0_i32 = arith.constant 0 : i32
    %c0_i32_0 = arith.constant 0 : i32
    %c0_i32_1 = arith.constant 0 : i32
    return %c0_i32, %c0_i32_0 : i32, i32
  }
  func.func @transform_3(%arg0: i32) -> (i32, i32) {
    %c0_i32 = arith.constant 0 : i32
    %c0_i32_0 = arith.constant 0 : i32
    %c0_i32_1 = arith.constant 0 : i32
    return %c0_i32, %c0_i32_0 : i32, i32
  }
  func.func @transform_4(%arg0: i32) -> (i32, i32) {
    %c0_i32 = arith.constant 0 : i32
    %c0_i32_0 = arith.constant 0 : i32
    %c0_i32_1 = arith.constant 0 : i32
    return %c0_i32, %c0_i32_0 : i32, i32
  }
  func.func @transform_5(%arg0: i32) -> (i32, i32) {
    %c0_i32 = arith.constant 0 : i32
    %c0_i32_0 = arith.constant 0 : i32
    %c0_i32_1 = arith.constant 0 : i32
    return %c0_i32, %c0_i32_0 : i32, i32
  }
  func.func @transform_6(%arg0: i32) -> (i32, i32) {
    %c0_i32 = arith.constant 0 : i32
    %c0_i32_0 = arith.constant 0 : i32
    %c0_i32_1 = arith.constant 0 : i32
    return %c0_i32, %c0_i32_0 : i32, i32
  }
  func.func @transform_7(%arg0: i32) -> (i32, i32) {
    %c0_i32 = arith.constant 0 : i32
    %c0_i32_0 = arith.constant 0 : i32
    %c0_i32_1 = arith.constant 0 : i32
    return %c0_i32, %c0_i32_0 : i32, i32
  }
  func.func @transform_8(%arg0: i32) -> (i32, i32) {
    %c0_i32 = arith.constant 0 : i32
    %c0_i32_0 = arith.constant 0 : i32
    %c0_i32_1 = arith.constant 0 : i32
    return %c0_i32, %c0_i32_0 : i32, i32
  }
}

</mosaic_0001>

<bundles_post_ra>
// kernel: lstm_model_forward.2
= control target key start
LH: loop header
LB: loop body
LE: loop exit
PB: predicated region body
PF: predicated region fallthrough
CT: control target
= control target key end

     0   :  { %11 = vsyncpa [#allocation6], 0  ;;  %s4287_s21 = smov [#allocation5]   ;;  %s5090_s0 = inlined_call_operand.vmem [shape: bf16[128,4], index: 0, kind: input, shape index: {}]   ;;  %s5091_s1 = inlined_call_operand.vmem [shape: bf16[4,512], index: 1, kind: input, shape index: {}]   ;;  %s5092_s2 = inlined_call_operand.hbm [shape: bf16[128,512], index: 2, kind: input, shape index: {}]   ;;  %s5093_s3 = inlined_call_operand.vmem [shape: f32[1,512], index: 3, kind: input, shape index: {}]   ;;  %s5094_s4 = inlined_call_operand.vmem [shape: f32[1,128], index: 4, kind: input, shape index: {}]   ;;  %s5095_s5 = inlined_call_operand.vmem [shape: f32[1,128], index: 5, kind: input, shape index: {}]   ;;  %s5096_s6 = inlined_call_operand.vmem [shape: bf16[128,128], index: 6, kind: output, shape index: {}]  }
   0x1   :  { %s21_s22 = sshll.u32 %s4287_s21, 4  ;;  %s4263_s25 = scalar_lea.hbm %s5092_s2, 4096  ;;  %s22_s22 = int_to_ptr.vmem [resolvable:$true] %s21_s22 }
   0x2   :  { %p4264_p0 = scmp.ne.s32.totalorder %s5092_s2, %s4263_s25  ;;  %p4267_p1 = scmp.lt.u32.totalorder %s4263_s25, %s5092_s2 }
   0x4   :  { %p4269_p2 = pnand %p4267_p1, %p4264_p0 }
   0x6   :  { %4272 = shalt.err (!%p4269_p2)
}
   0x7   :  { %s4273_s30 = scalar_lea.vmem %s22_s22, 4096  ;;  %p4278_p4 = scmp.lt.s32.totalorder %s22_s22, %s22_s22 }
   0x8   :  { %p4274_p3 = scmp.ne.s32.totalorder %s22_s22, %s4273_s30  ;;  %p4279_p5 = scmp.lt.s32.totalorder %s4273_s30, %s4273_s30 }
   0xa   :  { %p4280_p6 = por %p4279_p5, %p4278_p4 }
   0xc   :  { %p4281_p7 = pnand %p4280_p6, %p4274_p3 }
   0xe   :  { %4284 = shalt.err (!%p4281_p7)
}
   0xf   :  { %s4288_s7 = smov 256   ;;  %s4289_s8 = smov 16  }
  0x10   :  { %27 = dma.hbm_to_vmem [thread:$0]  %s5092_s2, 4096, %s22_s22, [#allocation6], %s4288_s7, %s4288_s7, %s4289_s8  }
  0x11   :  { %4285 = dma.done.wait [#allocation6], 4096  }
  0x12   :  { %4286 = vsyncadd [#allocation6], 4294963200  ;;  %v79_v0 = vlaneseq  ;;  %v4290_v1 = vmov 1983009808   ;;  %v5097_v3 = vmov 0   ;;  %v76_v7 = vld [vmem:[%s5091_s1] sm:$0xff] }
  0x13   :  { %v142_v2 = vunpack.c.l.s4 %v4290_v1  ;;  %227 = vmatprep.mubr.bf16.mxu0 %v5097_v3  ;;  %340 = vmatprep.mubr.bf16.mxu1 %v5097_v3  ;;  %vm182_vm0 = vcmask 1041408   ;;  %v140_v9 = vcombine.high %v76_v7, %v76_v7  ;;  %v4347_v13 = vld [vmem:[#allocation5 + $0x4] ss:$16 sps:$4 sm:$0xff]   ;;  %v4352_v17 = vld [vmem:[#allocation5] ss:$16 sps:$4 sm:$0xff]   ;;  %vm157_vm1 = vcmask 31744  }
  0x14   :  { %v4341_v4 = vshrl.u32 %v79_v0, 7  ;;  %v3855_v16 = vld [vmem:[%s5090_s0] sm:$0xff]   ;;  %v4354_v18 = vld [vmem:[#allocation5 + $0xc] ss:$16 sps:$4 sm:$0xff]   ;;  %v4359_v20 = vld [vmem:[#allocation5 + $0x8] ss:$16 sps:$4 sm:$0xff]  }
  0x15   :  { %v143_v5 = vunpack.c.0.s8 %v142_v2  ;;  %v4357_v19 = vld [vmem:[#allocation5 + $0x24] ss:$16 sps:$4 sm:$0xff]   ;;  %v4363_v21 = vld [vmem:[#allocation5 + $0x2c] ss:$16 sps:$4 sm:$0xff]   ;;  %v4367_v22 = vld [vmem:[#allocation5 + $0x20] ss:$16 sps:$4 sm:$0xff]  }
  0x16   :  { %v4371_v23 = vld [vmem:[#allocation5 + $0x44] ss:$16 sps:$4 sm:$0xff]   ;;  %v3859_v24 = vld [vmem:[%s5090_s0 + $0x8] sm:$0xff]   ;;  %v4384_v27 = vld [vmem:[#allocation5 + $0x40] ss:$16 sps:$4 sm:$0xff]   ;;  %v81_v57 = vsub.s32 0, %v4341_v4 }
  0x17   :  { %v146_v6 = vsub.s32 %v143_v5, %v4341_v4  ;;  %v4378_v25 = vld [vmem:[#allocation5 + $0x28] ss:$16 sps:$4 sm:$0xff]   ;;  %v4381_v26 = vld [vmem:[#allocation5 + $0x4c] ss:$16 sps:$4 sm:$0xff]   ;;  %v4387_v28 = vld [vmem:[#allocation5 + $0x64] ss:$16 sps:$4 sm:$0xff]  }
  0x18   :  { %v4390_v29 = vld [vmem:[#allocation5 + $0x48] ss:$16 sps:$4 sm:$0xff]   ;;  %v4394_v30 = vld [vmem:[#allocation5 + $0x6c] ss:$16 sps:$4 sm:$0xff]   ;;  %v4398_v31 = vld [vmem:[#allocation5 + $0x60] ss:$16 sps:$4 sm:$0xff]  }
  0x19   :  { %v147_v8 = vrot.slane %v76_v7, %v146_v6  ;;  %v154_v12 = vrot.slane %v140_v9, %v146_v6  ;;  %v3866_v32 = vld [vmem:[%s5090_s0 + $0x10] sm:$0xff]   ;;  %v4409_v34 = vld [vmem:[#allocation5 + $0x68] ss:$16 sps:$4 sm:$0xff]   ;;  %v4412_v35 = vld [vmem:[#allocation5 + $0x8c] ss:$16 sps:$4 sm:$0xff]   ;;  %v85_v59 = vsub.s32 1, %v4341_v4 }
  0x1a   :  { %v4405_v33 = vld [vmem:[#allocation5 + $0x84] ss:$16 sps:$4 sm:$0xff]   ;;  %v4415_v36 = vld [vmem:[#allocation5 + $0x80] ss:$16 sps:$4 sm:$0xff]   ;;  %v4421_v38 = vld [vmem:[#allocation5 + $0x88] ss:$16 sps:$4 sm:$0xff]  }
  0x1b   :  { %v155_v10 = vcombine.high %v147_v8, %v147_v8  ;;  %v184_v11 = vsel %vm182_vm0, %v147_v8, 0  ;;  %v156_v14 = vcombine.high %v154_v12, %v154_v12  ;;  %v190_v15 = vsel %vm182_vm0, %v154_v12, 0  ;;  %v4418_v37 = vld [vmem:[#allocation5 + $0xa4] ss:$16 sps:$4 sm:$0xff]   ;;  %v4425_v39 = vld [vmem:[#allocation5 + $0xac] ss:$16 sps:$4 sm:$0xff]  }
  0x1c   :  { %v4429_v40 = vld [vmem:[#allocation5 + $0xa0] ss:$16 sps:$4 sm:$0xff]   ;;  %v3873_v41 = vld [vmem:[%s5090_s0 + $0x18] sm:$0xff]   ;;  %v4436_v42 = vld [vmem:[#allocation5 + $0xc4] ss:$16 sps:$4 sm:$0xff]   ;;  %v89_v60 = vsub.s32 2, %v4341_v4 }
  0x1d   :  { %3434 = vmatprep.subr.msk.bf16.mxu0 %vm182_vm0, %v155_v10  ;;  %3443 = vmatprep.subr.msk.bf16.mxu1 %vm182_vm0, %v156_v14  ;;  %v4439_v43 = vld [vmem:[#allocation5 + $0xc0] ss:$16 sps:$4 sm:$0xff]   ;;  %v4442_v44 = vld [vmem:[#allocation5 + $0xa8] ss:$16 sps:$4 sm:$0xff]   ;;  %v4445_v45 = vld [vmem:[#allocation5 + $0xe4] ss:$16 sps:$4 sm:$0xff]  }
  0x1e   :  { %196 = vmatpush1.bf16.msra.mxu0 %v184_v11  ;;  %309 = vmatpush1.bf16.msra.mxu1 %v190_v15  ;;  %v4447_v46 = vld [vmem:[#allocation5 + $0xcc] ss:$16 sps:$4 sm:$0xff]   ;;  %v4450_v47 = vld [vmem:[#allocation5 + $0xc8] ss:$16 sps:$4 sm:$0xff]   ;;  %v4456_v49 = vld [vmem:[#allocation5 + $0xe0] ss:$16 sps:$4 sm:$0xff]  }
  0x1f   :  { %693 = vmatprep.subr.bf16.mxu0 %v4347_v13  ;;  %736 = vmatprep.subr.bf16.mxu1 %v4354_v18  ;;  %v4453_v48 = vld [vmem:[#allocation5 + $0xec] ss:$16 sps:$4 sm:$0xff]   ;;  %v4462_v50 = vld [vmem:[#allocation5 + $0xe8] ss:$16 sps:$4 sm:$0xff]   ;;  %v3880_v51 = vld [vmem:[%s5090_s0 + $0x20] sm:$0xff]   ;;  %v93_v61 = vsub.s32 3, %v4341_v4 }
  0x20   :  { %v3887_v52 = vld [vmem:[%s5090_s0 + $0x28] sm:$0xff]   ;;  %v3894_v53 = vld [vmem:[%s5090_s0 + $0x30] sm:$0xff]   ;;  %v3901_v54 = vld [vmem:[%s5090_s0 + $0x38] sm:$0xff]  }
  0x21   :  { %3435 = vmatmul.mubr.msk.bf16.vlgmr.msra.gmra.mrb[0].mxu0 %vm157_vm1, %v3855_v16  ;;  %3444 = vmatmul.mubr.msk.bf16.vlgmr.msra.gmra.mrb[0].mxu1 %vm157_vm1, %v3855_v16  ;;  %v3424_v55 = vld [vmem:[%s5094_s4] ss:$0 sm:$0xff] }
  0x22   :  { %694 = vmatpush1.bf16.msra.mxu0 %v4352_v17  ;;  %237 = vmatprep.mubr.bf16.mxu0 %v5097_v3  ;;  %v49_v56 = vpack.c.bf16 %v3424_v55, %v3424_v55  ;;  %v77_v58 = vld [vmem:[%s5093_s3] sm:$0xf] }
  0x23   :  { %695 = vmatprep.subr.bf16.mxu0 %v4357_v19  ;;  %350 = vmatprep.mubr.bf16.mxu1 %v5097_v3  ;;  %v4543_v62 = vrot.slane %v77_v58, %v81_v57  ;;  %v4545_v63 = vrot.slane %v77_v58, %v85_v59  ;;  %v4547_v0 = vrot.slane %v77_v58, %v89_v60 }
  0x24   :  { %737 = vmatpush1.bf16.msra.mxu1 %v4359_v20  ;;  %v4549_v1 = vrot.slane %v77_v58, %v93_v61 }
  0x25   :  { %738 = vmatprep.subr.bf16.mxu1 %v4363_v21 }
  0x26   :  { %696 = vmatpush1.bf16.msra.mxu0 %v4367_v22 }
  0x27   :  { %697 = vmatprep.subr.bf16.mxu0 %v4371_v23 }
  0x28   :  { %739 = vmatpush1.bf16.msra.mxu1 %v4378_v25 }
  0x29   :  { %3436 = vmatmul.mubr.msk.bf16.gmra.mrb[4].mxu0 %vm157_vm1, %v3859_v24  ;;  %740 = vmatprep.subr.bf16.mxu1 %v4381_v26 }
  0x2a   :  { %247 = vmatprep.mubr.bf16.mxu0 %v5097_v3  ;;  %698 = vmatpush1.bf16.msra.mxu0 %v4384_v27 }
  0x2b   :  { %3445 = vmatmul.mubr.msk.bf16.gmra.mrb[4].mxu1 %vm157_vm1, %v3859_v24  ;;  %699 = vmatprep.subr.bf16.mxu0 %v4387_v28 }
  0x2c   :  { %360 = vmatprep.mubr.bf16.mxu1 %v5097_v3  ;;  %741 = vmatpush1.bf16.msra.mxu1 %v4390_v29 }
  0x2d   :  { %742 = vmatprep.subr.bf16.mxu1 %v4394_v30 }
  0x2e   :  { %700 = vmatpush1.bf16.msra.mxu0 %v4398_v31 }
  0x2f   :  { %701 = vmatprep.subr.bf16.mxu0 %v4405_v33 }
  0x30   :  { %743 = vmatpush1.bf16.msra.mxu1 %v4409_v34 }
  0x31   :  { %3437 = vmatmul.mubr.msk.bf16.gmra.mrb[8].mxu0 %vm157_vm1, %v3866_v32  ;;  %744 = vmatprep.subr.bf16.mxu1 %v4412_v35 }
  0x32   :  { %257 = vmatprep.mubr.bf16.mxu0 %v5097_v3  ;;  %702 = vmatpush1.bf16.msra.mxu0 %v4415_v36 }
  0x33   :  { %3446 = vmatmul.mubr.msk.bf16.gmra.mrb[8].mxu1 %vm157_vm1, %v3866_v32  ;;  %703 = vmatprep.subr.bf16.mxu0 %v4418_v37 }
  0x34   :  { %370 = vmatprep.mubr.bf16.mxu1 %v5097_v3  ;;  %745 = vmatpush1.bf16.msra.mxu1 %v4421_v38 }
  0x35   :  { %746 = vmatprep.subr.bf16.mxu1 %v4425_v39 }
  0x36   :  { %704 = vmatpush1.bf16.msra.mxu0 %v4429_v40 }
  0x37   :  { %705 = vmatprep.subr.bf16.mxu0 %v4436_v42 }
  0x38   :  { %747 = vmatpush1.bf16.msra.mxu1 %v4442_v44 }
  0x39   :  { %3438 = vmatmul.mubr.msk.bf16.gmra.mrb[12].mxu0 %vm157_vm1, %v3873_v41  ;;  %748 = vmatprep.subr.bf16.mxu1 %v4447_v46 }
  0x3a   :  { %267 = vmatprep.mubr.bf16.mxu0 %v5097_v3  ;;  %706 = vmatpush1.bf16.msra.mxu0 %v4439_v43 }
  0x3b   :  { %3447 = vmatmul.mubr.msk.bf16.gmra.mrb[12].mxu1 %vm157_vm1, %v3873_v41  ;;  %707 = vmatprep.subr.bf16.mxu0 %v4445_v45 }
  0x3c   :  { %380 = vmatprep.mubr.bf16.mxu1 %v5097_v3  ;;  %749 = vmatpush1.bf16.msra.mxu1 %v4450_v47 }
  0x3d   :  { %750 = vmatprep.subr.bf16.mxu1 %v4453_v48 }
  0x3e   :  { %708 = vmatpush1.bf16.msra.mxu0 %v4456_v49 }
  0x3f   :  { %1058 = vmatprep.subr.bf16.mxu0 %v4347_v13 }
  0x40   :  { %751 = vmatpush1.bf16.msra.mxu1 %v4462_v50 }
  0x41   :  { %3439 = vmatmul.mubr.msk.bf16.gmra.mrb[16].mxu0 %vm157_vm1, %v3880_v51  ;;  %1101 = vmatprep.subr.bf16.mxu1 %v4354_v18 }
  0x42   :  { %277 = vmatprep.mubr.bf16.mxu0 %v5097_v3 }
  0x43   :  { %3448 = vmatmul.mubr.msk.bf16.gmra.mrb[16].mxu1 %vm157_vm1, %v3880_v51 }
  0x44   :  { %390 = vmatprep.mubr.bf16.mxu1 %v5097_v3 }
  0x49   :  { %3440 = vmatmul.mubr.msk.bf16.gmra.mrb[20].mxu0 %vm157_vm1, %v3887_v52 }
  0x4a   :  { %287 = vmatprep.mubr.bf16.mxu0 %v5097_v3 }
  0x4b   :  { %3449 = vmatmul.mubr.msk.bf16.gmra.mrb[20].mxu1 %vm157_vm1, %v3887_v52 }
  0x4c   :  { %400 = vmatprep.mubr.bf16.mxu1 %v5097_v3 }
  0x51   :  { %3441 = vmatmul.mubr.msk.bf16.gmra.mrb[24].mxu0 %vm157_vm1, %v3894_v53 }
  0x52   :  { %297 = vmatprep.mubr.bf16.mxu0 %v5097_v3 }
  0x53   :  { %3450 = vmatmul.mubr.msk.bf16.gmra.mrb[24].mxu1 %vm157_vm1, %v3894_v53 }
  0x54   :  { %410 = vmatprep.mubr.bf16.mxu1 %v5097_v3 }
  0x59   :  { %3442 = vmatmul.mubr.msk.bf16.gmra.mrb[28].mxu0 %vm157_vm1, %v3901_v54 }
  0x5a   :  { %725 = vmatprep.mubr.bf16.mxu0 %v5097_v3 }
  0x5b   :  { %3451 = vmatmul.mubr.msk.bf16.gmra.mrb[28].mxu1 %vm157_vm1, %v3901_v54 }
  0x5c   :  { %768 = vmatprep.mubr.bf16.mxu1 %v5097_v3 }
  0x61   :  { %726 = vmatmul.mubr.bf16.vlgmr.msra.gmra.mrb[32].mxu0 %v49_v56 }
  0x62   :  { %1059 = vmatpush1.bf16.msra.mxu0 %v4352_v17  ;;  %1090 = vmatprep.mubr.bf16.mxu0 %v5097_v3 }
  0x63   :  { %769 = vmatmul.mubr.bf16.vlgmr.msra.gmra.mrb[32].mxu1 %v49_v56  ;;  %1060 = vmatprep.subr.bf16.mxu0 %v4357_v19 }
  0x64   :  { %1102 = vmatpush1.bf16.msra.mxu1 %v4359_v20  ;;  %1133 = vmatprep.mubr.bf16.mxu1 %v5097_v3 }
  0x65   :  { %1103 = vmatprep.subr.bf16.mxu1 %v4363_v21 }
  0x66   :  { %1061 = vmatpush1.bf16.msra.mxu0 %v4367_v22 }
  0x67   :  { %1062 = vmatprep.subr.bf16.mxu0 %v4371_v23 }
  0x68   :  { %1104 = vmatpush1.bf16.msra.mxu1 %v4378_v25 }
  0x69   :  { %1105 = vmatprep.subr.bf16.mxu1 %v4381_v26 }
  0x6a   :  { %1063 = vmatpush1.bf16.msra.mxu0 %v4384_v27 }
  0x6b   :  { %1064 = vmatprep.subr.bf16.mxu0 %v4387_v28 }
  0x6c   :  { %1106 = vmatpush1.bf16.msra.mxu1 %v4390_v29 }
  0x6d   :  { %1107 = vmatprep.subr.bf16.mxu1 %v4394_v30 }
  0x6e   :  { %1065 = vmatpush1.bf16.msra.mxu0 %v4398_v31 }
  0x6f   :  { %1066 = vmatprep.subr.bf16.mxu0 %v4405_v33 }
  0x70   :  { %1108 = vmatpush1.bf16.msra.mxu1 %v4409_v34 }
  0x71   :  { %1109 = vmatprep.subr.bf16.mxu1 %v4412_v35 }
  0x72   :  { %1067 = vmatpush1.bf16.msra.mxu0 %v4415_v36 }
  0x73   :  { %1068 = vmatprep.subr.bf16.mxu0 %v4418_v37 }
  0x74   :  { %1110 = vmatpush1.bf16.msra.mxu1 %v4421_v38 }
  0x75   :  { %1111 = vmatprep.subr.bf16.mxu1 %v4425_v39 }
  0x76   :  { %1069 = vmatpush1.bf16.msra.mxu0 %v4429_v40 }
  0x77   :  { %1070 = vmatprep.subr.bf16.mxu0 %v4436_v42 }
  0x78   :  { %1112 = vmatpush1.bf16.msra.mxu1 %v4442_v44 }
  0x79   :  { %1113 = vmatprep.subr.bf16.mxu1 %v4447_v46 }
  0x7a   :  { %1071 = vmatpush1.bf16.msra.mxu0 %v4439_v43 }
  0x7b   :  { %1072 = vmatprep.subr.bf16.mxu0 %v4445_v45 }
  0x7c   :  { %1114 = vmatpush1.bf16.msra.mxu1 %v4450_v47 }
  0x7d   :  { %1115 = vmatprep.subr.bf16.mxu1 %v4453_v48 }
  0x7e   :  { %1073 = vmatpush1.bf16.msra.mxu0 %v4456_v49 }
  0x80   :  { %1116 = vmatpush1.bf16.msra.mxu1 %v4462_v50 }
  0xf4   :  { %v229_v2 = vpop.f32.mrb[0].mxu0  ;;  %v342_v9 = vpop.f32.mrb[0].mxu1 }
  0xf5   :  { %v230_v5 = vadd.f32 %v229_v2, %v4543_v62  ;;  %v231_v6 = vpop.f32.mrb[1].mxu0  ;;  %v343_v4 = vadd.f32 %v342_v9, %v4547_v0  ;;  %v344_v12 = vpop.f32.mrb[1].mxu1 }
  0xf6   :  { %v232_v7 = vadd.f32 %v231_v6, %v4545_v63  ;;  %v233_v8 = vpop.f32.mrb[2].mxu0  ;;  %v345_v14 = vadd.f32 %v344_v12, %v4549_v1  ;;  %v346_v15 = vpop.f32.mrb[2].mxu1 }
  0xf7   :  { %v234_v10 = vadd.f32 %v233_v8, %v4543_v62  ;;  %v235_v11 = vpop.f32.mrb[3].mxu0  ;;  %v347_v17 = vadd.f32 %v346_v15, %v4547_v0  ;;  %v348_v18 = vpop.f32.mrb[3].mxu1 }
  0xf8   :  { %v236_v13 = vadd.f32 %v235_v11, %v4545_v63  ;;  %v349_v20 = vadd.f32 %v348_v18, %v4549_v1 }
  0xf9   :  { %v4557_v16 = vpack.c.bf16 %v234_v10, %v230_v5  ;;  %v4563_v22 = vpack.c.bf16 %v347_v17, %v343_v4 }
  0xfa   :  { %v4560_v19 = vpack.c.bf16 %v236_v13, %v232_v7  ;;  %v4565_v24 = vpack.c.bf16 %v349_v20, %v345_v14 }
  0xfc   :  { %v239_v23 = vpop.f32.mrb[4].mxu0 }
  0xfd   :  { %v240_v27 = vadd.f32 %v239_v23, %v4543_v62  ;;  %v241_v28 = vpop.f32.mrb[5].mxu0 }
  0xfe   :  { %v242_v31 = vadd.f32 %v241_v28, %v4545_v63  ;;  %v243_v32 = vpop.f32.mrb[6].mxu0  ;;  %v352_v33 = vpop.f32.mrb[4].mxu1 }
  0xff   :  { %v244_v36 = vadd.f32 %v243_v32, %v4543_v62  ;;  %v245_v41 = vpop.f32.mrb[7].mxu0  ;;  %v353_v51 = vadd.f32 %v352_v33, %v4547_v0  ;;  %v354_v52 = vpop.f32.mrb[5].mxu1 }
 0x100   :  { %v246_v53 = vadd.f32 %v245_v41, %v4545_v63  ;;  %v355_v54 = vadd.f32 %v354_v52, %v4549_v1  ;;  %v356_v55 = vpop.f32.mrb[6].mxu1 }
 0x101   :  { %v4573_v56 = vpack.c.bf16 %v244_v36, %v240_v27  ;;  %v357_v57 = vadd.f32 %v356_v55, %v4547_v0  ;;  %v358_v58 = vpop.f32.mrb[7].mxu1 }
 0x102   :  { %v4576_v59 = vpack.c.bf16 %v246_v53, %v242_v31  ;;  %v359_v60 = vadd.f32 %v358_v58, %v4549_v1 }
 0x103   :  { %v4579_v61 = vpack.c.bf16 %v357_v57, %v353_v51 }
 0x104   :  { %v249_v2 = vpop.f32.mrb[8].mxu0  ;;  %v4581_v5 = vpack.c.bf16 %v359_v60, %v355_v54 }
 0x105   :  { %v250_v6 = vadd.f32 %v249_v2, %v4543_v62  ;;  %v251_v7 = vpop.f32.mrb[9].mxu0 }
 0x106   :  { %v252_v8 = vadd.f32 %v251_v7, %v4545_v63  ;;  %v253_v9 = vpop.f32.mrb[10].mxu0  ;;  %v362_v10 = vpop.f32.mrb[8].mxu1 }
 0x107   :  { %v254_v11 = vadd.f32 %v253_v9, %v4543_v62  ;;  %v255_v4 = vpop.f32.mrb[11].mxu0  ;;  %v363_v12 = vadd.f32 %v362_v10, %v4547_v0  ;;  %v364_v13 = vpop.f32.mrb[9].mxu1 }
 0x108   :  { %v256_v14 = vadd.f32 %v255_v4, %v4545_v63  ;;  %v365_v15 = vadd.f32 %v364_v13, %v4549_v1  ;;  %v366_v17 = vpop.f32.mrb[10].mxu1 }
 0x109   :  { %v4589_v18 = vpack.c.bf16 %v254_v11, %v250_v6  ;;  %v367_v20 = vadd.f32 %v366_v17, %v4547_v0  ;;  %v368_v23 = vpop.f32.mrb[11].mxu1 }
 0x10a   :  { %v4592_v27 = vpack.c.bf16 %v256_v14, %v252_v8  ;;  %v369_v28 = vadd.f32 %v368_v23, %v4549_v1 }
 0x10b   :  { %v4595_v31 = vpack.c.bf16 %v367_v20, %v363_v12 }
 0x10c   :  { %v259_v32 = vpop.f32.mrb[12].mxu0  ;;  %v4597_v33 = vpack.c.bf16 %v369_v28, %v365_v15 }
 0x10d   :  { %v260_v36 = vadd.f32 %v259_v32, %v4543_v62  ;;  %v261_v41 = vpop.f32.mrb[13].mxu0 }
 0x10e   :  { %v262_v51 = vadd.f32 %v261_v41, %v4545_v63  ;;  %v263_v52 = vpop.f32.mrb[14].mxu0  ;;  %v372_v53 = vpop.f32.mrb[12].mxu1 }
 0x10f   :  { %v264_v54 = vadd.f32 %v263_v52, %v4543_v62  ;;  %v265_v55 = vpop.f32.mrb[15].mxu0  ;;  %v373_v57 = vadd.f32 %v372_v53, %v4547_v0  ;;  %v374_v58 = vpop.f32.mrb[13].mxu1 }
 0x110   :  { %v266_v60 = vadd.f32 %v265_v55, %v4545_v63  ;;  %v375_v2 = vadd.f32 %v374_v58, %v4549_v1  ;;  %v376_v6 = vpop.f32.mrb[14].mxu1 }
 0x111   :  { %v4605_v7 = vpack.c.bf16 %v264_v54, %v260_v36  ;;  %v377_v8 = vadd.f32 %v376_v6, %v4547_v0  ;;  %v378_v9 = vpop.f32.mrb[15].mxu1 }
 0x112   :  { %v4608_v10 = vpack.c.bf16 %v266_v60, %v262_v51  ;;  %v379_v11 = vadd.f32 %v378_v9, %v4549_v1 }
 0x113   :  { %v4611_v4 = vpack.c.bf16 %v377_v8, %v373_v57 }
 0x114   :  { %5117 = vst [vmem:[#allocation8_spill] sm:$0xff] %v4608_v10  ;;  %v269_v12 = vpop.f32.mrb[16].mxu0  ;;  %v4613_v13 = vpack.c.bf16 %v379_v11, %v375_v2 }
 0x115   :  { %v270_v14 = vadd.f32 %v269_v12, %v4543_v62  ;;  %v271_v15 = vpop.f32.mrb[17].mxu0 }
 0x116   :  { %5118 = vst [vmem:[#allocation9_spill] sm:$0xff] %v4613_v13  ;;  %v272_v17 = vadd.f32 %v271_v15, %v4545_v63  ;;  %v273_v20 = vpop.f32.mrb[18].mxu0  ;;  %v382_v23 = vpop.f32.mrb[16].mxu1 }
 0x117   :  { %v274_v28 = vadd.f32 %v273_v20, %v4543_v62  ;;  %v275_v32 = vpop.f32.mrb[19].mxu0  ;;  %v383_v36 = vadd.f32 %v382_v23, %v4547_v0  ;;  %v384_v41 = vpop.f32.mrb[17].mxu1 }
 0x118   :  { %v276_v51 = vadd.f32 %v275_v32, %v4545_v63  ;;  %v385_v52 = vadd.f32 %v384_v41, %v4549_v1  ;;  %v386_v53 = vpop.f32.mrb[18].mxu1 }
 0x119   :  { %v4621_v54 = vpack.c.bf16 %v274_v28, %v270_v14  ;;  %v387_v55 = vadd.f32 %v386_v53, %v4547_v0  ;;  %v388_v57 = vpop.f32.mrb[19].mxu1 }
 0x11a   :  { %v4624_v58 = vpack.c.bf16 %v276_v51, %v272_v17  ;;  %v389_v60 = vadd.f32 %v388_v57, %v4549_v1 }
 0x11b   :  { %5119 = vst [vmem:[#allocation10_spill] sm:$0xff] %v4621_v54  ;;  %v4627_v2 = vpack.c.bf16 %v387_v55, %v383_v36 }
 0x11c   :  { %5120 = vst [vmem:[#allocation11_spill] sm:$0xff] %v4624_v58  ;;  %v279_v6 = vpop.f32.mrb[20].mxu0  ;;  %v4629_v8 = vpack.c.bf16 %v389_v60, %v385_v52 }
 0x11d   :  { %5121 = vst [vmem:[#allocation12_spill] sm:$0xff] %v4627_v2  ;;  %v280_v9 = vadd.f32 %v279_v6, %v4543_v62  ;;  %v281_v11 = vpop.f32.mrb[21].mxu0 }
 0x11e   :  { %5122 = vst [vmem:[#allocation13_spill] sm:$0xff] %v4629_v8  ;;  %v282_v12 = vadd.f32 %v281_v11, %v4545_v63  ;;  %v283_v15 = vpop.f32.mrb[22].mxu0  ;;  %v392_v14 = vpop.f32.mrb[20].mxu1  ;;  %v1230_v8 = vunpack.c.h.bf16 %v4597_v33 }
 0x11f   :  { %v284_v20 = vadd.f32 %v283_v15, %v4543_v62  ;;  %v285_v23 = vpop.f32.mrb[23].mxu0  ;;  %v393_v17 = vadd.f32 %v392_v14, %v4547_v0  ;;  %v394_v28 = vpop.f32.mrb[21].mxu1 }
 0x120   :  { %v286_v32 = vadd.f32 %v285_v23, %v4545_v63  ;;  %v395_v36 = vadd.f32 %v394_v28, %v4549_v1  ;;  %v396_v41 = vpop.f32.mrb[22].mxu1 }
 0x121   :  { %v4637_v51 = vpack.c.bf16 %v284_v20, %v280_v9  ;;  %v397_v52 = vadd.f32 %v396_v41, %v4547_v0  ;;  %v398_v53 = vpop.f32.mrb[23].mxu1 }
 0x122   :  { %v4640_v55 = vpack.c.bf16 %v286_v32, %v282_v12  ;;  %v399_v57 = vadd.f32 %v398_v53, %v4549_v1 }
 0x123   :  { %5123 = vst [vmem:[#allocation14_spill] sm:$0xff] %v4637_v51  ;;  %v4643_v60 = vpack.c.bf16 %v397_v52, %v393_v17  ;;  %v1228_v51 = vunpack.c.h.bf16 %v4592_v27 }
 0x124   :  { %5124 = vst [vmem:[#allocation15_spill] sm:$0xff] %v4640_v55  ;;  %v289_v6 = vpop.f32.mrb[24].mxu0  ;;  %v4645_v11 = vpack.c.bf16 %v399_v57, %v395_v36 }
 0x125   :  { %5125 = vst [vmem:[#allocation16_spill] sm:$0xff] %v4643_v60  ;;  %v290_v15 = vadd.f32 %v289_v6, %v4543_v62  ;;  %v291_v14 = vpop.f32.mrb[25].mxu0 }
 0x126   :  { %5126 = vst [vmem:[#allocation17_spill] sm:$0xff] %v4645_v11  ;;  %v292_v23 = vadd.f32 %v291_v14, %v4545_v63  ;;  %v293_v28 = vpop.f32.mrb[26].mxu0  ;;  %v402_v9 = vpop.f32.mrb[24].mxu1 }
 0x127   :  { %v294_v20 = vadd.f32 %v293_v28, %v4543_v62  ;;  %v295_v41 = vpop.f32.mrb[27].mxu0  ;;  %v403_v12 = vadd.f32 %v402_v9, %v4547_v0  ;;  %v404_v32 = vpop.f32.mrb[25].mxu1 }
 0x128   :  { %v296_v53 = vadd.f32 %v295_v41, %v4545_v63  ;;  %v405_v17 = vadd.f32 %v404_v32, %v4549_v1  ;;  %v406_v52 = vpop.f32.mrb[26].mxu1 }
 0x129   :  { %v4653_v36 = vpack.c.bf16 %v294_v20, %v290_v15  ;;  %v407_v57 = vadd.f32 %v406_v52, %v4547_v0  ;;  %v408_v6 = vpop.f32.mrb[27].mxu1 }
 0x12a   :  { %v4656_v3 = vpack.c.bf16 %v296_v53, %v292_v23  ;;  %v409_v14 = vadd.f32 %v408_v6, %v4549_v1 }
 0x12b   :  { %5127 = vst [vmem:[#allocation18_spill] sm:$0xff] %v4653_v36  ;;  %v4659_v11 = vpack.c.bf16 %v407_v57, %v403_v12 }
 0x12c   :  { %5128 = vst [vmem:[#allocation19_spill] sm:$0xff] %v4656_v3  ;;  %v299_v28 = vpop.f32.mrb[28].mxu0  ;;  %v4661_v55 = vpack.c.bf16 %v409_v14, %v405_v17 }
 0x12d   :  { %5129 = vst [vmem:[#allocation20_spill] sm:$0xff] %v4659_v11  ;;  %v300_v9 = vadd.f32 %v299_v28, %v4543_v62  ;;  %v301_v41 = vpop.f32.mrb[29].mxu0 }
 0x12e   :  { %5130 = vst [vmem:[#allocation21_spill] sm:$0xff] %v4661_v55  ;;  %v302_v32 = vadd.f32 %v301_v41, %v4545_v63  ;;  %v303_v60 = vpop.f32.mrb[30].mxu0  ;;  %v412_v15 = vpop.f32.mrb[28].mxu1 }
 0x12f   :  { %v304_v20 = vadd.f32 %v303_v60, %v4543_v62  ;;  %v305_v52 = vpop.f32.mrb[31].mxu0  ;;  %v413_v23 = vadd.f32 %v412_v15, %v4547_v0  ;;  %v414_v53 = vpop.f32.mrb[29].mxu1  ;;  %v492_v62 = vunpack.c.l.bf16 %v4557_v16 }
 0x130   :  { %v306_v6 = vadd.f32 %v305_v52, %v4545_v63  ;;  %v415_v12 = vadd.f32 %v414_v53, %v4549_v1  ;;  %v416_v57 = vpop.f32.mrb[30].mxu1  ;;  %v493_v63 = vunpack.c.l.bf16 %v4560_v19 }
 0x131   :  { %v4669_v17 = vpack.c.bf16 %v304_v20, %v300_v9  ;;  %v417_v14 = vadd.f32 %v416_v57, %v4547_v0  ;;  %v418_v28 = vpop.f32.mrb[31].mxu1  ;;  %v496_v9 = vunpack.c.h.bf16 %v4557_v16  ;;  %v494_v0 = vunpack.c.l.bf16 %v4563_v22 }
 0x132   :  { %v4672_v55 = vpack.c.bf16 %v306_v6, %v302_v32  ;;  %v419_v41 = vadd.f32 %v418_v28, %v4549_v1  ;;  %v497_v1 = vunpack.c.h.bf16 %v4560_v19 }
 0x133   :  { %5131 = vst [vmem:[#allocation22_spill] sm:$0xff] %v4669_v17  ;;  %v4675_v3 = vpack.c.bf16 %v417_v14, %v413_v23  ;;  %v495_v23 = vunpack.c.l.bf16 %v4565_v24 }
 0x134   :  { %5132 = vst [vmem:[#allocation23_spill] sm:$0xff] %v4672_v55  ;;  %v727_v60 = vpop.f32.mrb[32].mxu0  ;;  %v4678_v15 = vpack.c.bf16 %v419_v41, %v415_v12 }
 0x135   :  { %5133 = vst [vmem:[#allocation24_spill] sm:$0xff] %v4675_v3  ;;  %v779_v52 = vadd.f32 %v727_v60, %v492_v62  ;;  %v729_v53 = vpop.f32.mrb[33].mxu0  ;;  %v499_v3 = vunpack.c.h.bf16 %v4565_v24 }
 0x136   :  { %5134 = vst [vmem:[#allocation25_spill] sm:$0xff] %v4678_v15  ;;  %v780_v20 = vadd.f32 %v729_v53, %v493_v63  ;;  %v731_v32 = vpop.f32.mrb[34].mxu0  ;;  %v770_v6 = vpop.f32.mrb[32].mxu1  ;;  %v498_v15 = vunpack.c.h.bf16 %v4563_v22 }
 0x137   :  { %v3484_v57 = vmul.f32 -1.442695, %v779_v52  ;;  %v783_v14 = vadd.f32 %v731_v32, %v496_v9  ;;  %v781_v28 = vadd.f32 %v770_v6, %v494_v0  ;;  %v733_v12 = vpop.f32.mrb[35].mxu0  ;;  %v772_v41 = vpop.f32.mrb[33].mxu1 }
 0x138   :  { %v3485_v62 = vmul.f32 -1.442695, %v780_v20  ;;  %v784_v60 = vadd.f32 %v733_v12, %v497_v1  ;;  %v782_v55 = vadd.f32 %v772_v41, %v495_v23  ;;  %v774_v16 = vpop.f32.mrb[34].mxu1 }
 0x139   :  { %4007 = vpow2.f32 %v3484_v57  ;;  %v3487_v63 = vmul.f32 -1.442695, %v783_v14  ;;  %v785_v53 = vadd.f32 %v774_v16, %v498_v15  ;;  %v776_v17 = vpop.f32.mrb[35].mxu1  ;;  %v3486_v52 = vmul.f32 -1.442695, %v781_v28 }
 0x13a   :  { %4009 = vpow2.f32 %v3485_v62  ;;  %v3488_v19 = vmul.f32 -1.442695, %v784_v60  ;;  %v786_v11 = vadd.f32 %v776_v17, %v499_v3 }
 0x13b   :  { %4011 = vpow2.f32 %v3487_v63  ;;  %v3489_v9 = vmul.f32 -1.442695, %v785_v53 }
 0x13c   :  { %4013 = vpow2.f32 %v3488_v19 }
 0x13d   :  { %4015 = vpow2.f32 %v3486_v52 }
 0x13e   :  { %4017 = vtanh.f32 %v782_v55  ;;  %v3425_v55 = vld [vmem:[%s5095_s5] ss:$0 sm:$0xff] }
 0x13f   :  { %4019 = vpow2.f32 %v3489_v9 }
 0x140   :  { %4021 = vtanh.f32 %v786_v11 }
 0x143   :  { %v4008_v0 = vpop.eup %4007 }
 0x144   :  { %v4010_v22 = vpop.eup %4009  ;;  %v805_v20 = vadd.f32 1.0, %v4008_v0 }
 0x145   :  { %v4012_v32 = vpop.eup %4011  ;;  %v806_v6 = vadd.f32 1.0, %v4010_v22 }
 0x146   :  { %4023 = vrcp.f32 %v805_v20  ;;  %v808_v24 = vadd.f32 1.0, %v4012_v32  ;;  %v4014_v15 = vpop.eup %4013 }
 0x147   :  { %4025 = vrcp.f32 %v806_v6  ;;  %v809_v1 = vadd.f32 1.0, %v4014_v15  ;;  %v4016_v3 = vpop.eup %4015  ;;  %v5135_v15 = vmov 0  }
 0x148   :  { %4027 = vrcp.f32 %v808_v24  ;;  %v4018_v17 = vpop.eup %4017  ;;  %v807_v62 = vadd.f32 1.0, %v4016_v3  ;;  %v4703_v3 = vld [vmem:[#allocation5 + $0xc] ss:$16 sps:$4 sm:$0xff]  }
 0x149   :  { %4029 = vrcp.f32 %v809_v1  ;;  %v4020_v23 = vpop.eup %4019  ;;  %v4701_v1 = vld [vmem:[#allocation5 + $0x4] ss:$16 sps:$4 sm:$0xff]   ;;  %1467 = vmatprep.subr.bf16.mxu1 %v4703_v3 }
 0x14a   :  { %v4022_v57 = vpop.eup %4021  ;;  %v810_v53 = vadd.f32 1.0, %v4020_v23  ;;  %4031 = vrcp.f32 %v807_v62  ;;  %v4707_v23 = vld [vmem:[#allocation5 + $0x8] ss:$16 sps:$4 sm:$0xff]   ;;  %1424 = vmatprep.subr.bf16.mxu0 %v4701_v1 }
 0x150   :  { %v4024_v14 = vpop.eup %4023 }
 0x151   :  { %v4026_v28 = vpop.eup %4025  ;;  %v829_v12 = vmul.f32 %v4024_v14, %v4018_v17  ;;  %v4705_v17 = vld [vmem:[#allocation5] ss:$16 sps:$4 sm:$0xff]   ;;  %v4721_v14 = vld [vmem:[#allocation5 + $0x44] ss:$16 sps:$4 sm:$0xff]  }
 0x152   :  { %v4028_v41 = vpop.eup %4027  ;;  %v827_v11 = vmul.f32 %v4026_v28, %v3425_v55  ;;  %v4724_v28 = vld [vmem:[#allocation5 + $0x40] ss:$16 sps:$4 sm:$0xff]  }
 0x153   :  { %v830_v60 = vmul.f32 %v4028_v41, %v4022_v57  ;;  %v4030_v16 = vpop.eup %4029  ;;  %v4713_v57 = vld [vmem:[#allocation5 + $0x24] ss:$16 sps:$4 sm:$0xff]   ;;  %v864_v41 = vunpack.c.h.bf16 %v4581_v5 }
 0x154   :  { %v4690_v63 = vadd.f32 %v829_v12, %v827_v11  ;;  %v828_v19 = vmul.f32 %v4030_v16, %v3425_v55  ;;  %v4032_v9 = vpop.eup %4031  ;;  %v4716_v55 = vld [vmem:[#allocation5 + $0x20] ss:$16 sps:$4 sm:$0xff]  }
 0x155   :  { %v4732_v12 = vld [vmem:[#allocation5 + $0x60] ss:$16 sps:$4 sm:$0xff]  }
 0x156   :  { %4033 = vtanh.f32 %v4690_v63  ;;  %v4693_v52 = vadd.f32 %v830_v60, %v828_v19 }
 0x157   :  { %4035 = vrcp.f32 %v810_v53 }
 0x158   :  { %4037 = vtanh.f32 %v4693_v52 }
 0x160   :  { %v4034_v0 = vpop.eup %4033 }
 0x161   :  { %v4036_v22 = vpop.eup %4035  ;;  %v835_v32 = vmul.f32 %v4034_v0, %v4032_v9 }
 0x162   :  { %v4038_v20 = vpop.eup %4037 }
 0x163   :  { %v836_v6 = vmul.f32 %v4038_v20, %v4036_v22 }
 0x165   :  { %v837_v24 = vpack.c.bf16 %v836_v6, %v835_v32 }
 0x167   :  { %3806 = vst [vmem:[%s5096_s6] sm:$0xff] %v837_v24   ;;  %1091 = vmatmul.mubr.bf16.vlgmr.msra.gmra.mrb[36].mxu0 %v837_v24  ;;  %1134 = vmatmul.mubr.bf16.vlgmr.msra.gmra.mrb[36].mxu1 %v837_v24 }
 0x168   :  { %1456 = vmatprep.mubr.bf16.mxu0 %v5135_v15  ;;  %1499 = vmatprep.mubr.bf16.mxu1 %v5135_v15 }
 0x169   :  { %1425 = vmatpush1.bf16.msra.mxu0 %v4705_v17  ;;  %1468 = vmatpush1.bf16.msra.mxu1 %v4707_v23 }
 0x16a   :  { %1469 = vmatprep.subr.bf16.mxu1 %v4363_v21  ;;  %1426 = vmatprep.subr.bf16.mxu0 %v4713_v57  ;;  %v4729_v21 = vld [vmem:[#allocation5 + $0x64] ss:$16 sps:$4 sm:$0xff]  }
 0x16d   :  { %1427 = vmatpush1.bf16.msra.mxu0 %v4716_v55  ;;  %1470 = vmatpush1.bf16.msra.mxu1 %v4378_v25  ;;  %v4737_v25 = vld [vmem:[#allocation5 + $0x80] ss:$16 sps:$4 sm:$0xff]  }
 0x16e   :  { %1471 = vmatprep.subr.bf16.mxu1 %v4381_v26  ;;  %1428 = vmatprep.subr.bf16.mxu0 %v4721_v14  ;;  %v4739_v26 = vld [vmem:[#allocation5 + $0x84] ss:$16 sps:$4 sm:$0xff]  }
 0x171   :  { %1429 = vmatpush1.bf16.msra.mxu0 %v4724_v28  ;;  %1472 = vmatpush1.bf16.msra.mxu1 %v4390_v29  ;;  %v857_v29 = vunpack.c.l.bf16 %v4573_v56 }
 0x172   :  { %1473 = vmatprep.subr.bf16.mxu1 %v4394_v30  ;;  %1430 = vmatprep.subr.bf16.mxu0 %v4729_v21  ;;  %v859_v30 = vunpack.c.l.bf16 %v4579_v61 }
 0x175   :  { %1431 = vmatpush1.bf16.msra.mxu0 %v4732_v12  ;;  %1474 = vmatpush1.bf16.msra.mxu1 %v4409_v34 }
 0x176   :  { %1475 = vmatprep.subr.bf16.mxu1 %v4412_v35  ;;  %1432 = vmatprep.subr.bf16.mxu0 %v4739_v26 }
 0x179   :  { %1433 = vmatpush1.bf16.msra.mxu0 %v4737_v25  ;;  %1476 = vmatpush1.bf16.msra.mxu1 %v4421_v38  ;;  %v860_v38 = vunpack.c.l.bf16 %v4581_v5 }
 0x17a   :  { %1434 = vmatprep.subr.bf16.mxu0 %v4418_v37  ;;  %1477 = vmatprep.subr.bf16.mxu1 %v4425_v39  ;;  %v858_v37 = vunpack.c.l.bf16 %v4576_v59 }
 0x17d   :  { %1435 = vmatpush1.bf16.msra.mxu0 %v4429_v40  ;;  %1478 = vmatpush1.bf16.msra.mxu1 %v4442_v44  ;;  %v861_v44 = vunpack.c.h.bf16 %v4573_v56 }
 0x17e   :  { %1436 = vmatprep.subr.bf16.mxu0 %v4436_v42  ;;  %1479 = vmatprep.subr.bf16.mxu1 %v4447_v46 }
 0x181   :  { %1437 = vmatpush1.bf16.msra.mxu0 %v4439_v43  ;;  %1480 = vmatpush1.bf16.msra.mxu1 %v4450_v47 }
 0x182   :  { %1438 = vmatprep.subr.bf16.mxu0 %v4445_v45  ;;  %1481 = vmatprep.subr.bf16.mxu1 %v4453_v48  ;;  %v863_v45 = vunpack.c.h.bf16 %v4579_v61 }
 0x185   :  { %1439 = vmatpush1.bf16.msra.mxu0 %v4456_v49  ;;  %1482 = vmatpush1.bf16.msra.mxu1 %v4462_v50  ;;  %v862_v50 = vunpack.c.h.bf16 %v4576_v59 }
 0x186   :  { %1790 = vmatprep.subr.bf16.mxu0 %v4701_v1  ;;  %1833 = vmatprep.subr.bf16.mxu1 %v4703_v3 }
 0x23a   :  { %v1092_v34 = vpop.f32.mrb[36].mxu0  ;;  %v1135_v35 = vpop.f32.mrb[36].mxu1 }
 0x23b   :  { %v1144_v39 = vadd.f32 %v1092_v34, %v857_v29  ;;  %v1146_v40 = vadd.f32 %v1135_v35, %v859_v30  ;;  %v1094_v42 = vpop.f32.mrb[37].mxu0  ;;  %v1137_v43 = vpop.f32.mrb[37].mxu1 }
 0x23c   :  { %v1145_v46 = vadd.f32 %v1094_v42, %v858_v37  ;;  %v1147_v47 = vadd.f32 %v1137_v43, %v860_v38  ;;  %v1096_v48 = vpop.f32.mrb[38].mxu0  ;;  %v1139_v49 = vpop.f32.mrb[38].mxu1 }
 0x23d   :  { %v3524_v11 = vmul.f32 -1.442695, %v1144_v39  ;;  %v1148_v62 = vadd.f32 %v1096_v48, %v861_v44  ;;  %v1150_v60 = vadd.f32 %v1139_v49, %v863_v45  ;;  %v1098_v16 = vpop.f32.mrb[39].mxu0  ;;  %v1141_v53 = vpop.f32.mrb[39].mxu1  ;;  %v3526_v61 = vmul.f32 -1.442695, %v1146_v40 }
 0x23e   :  { %v3525_v19 = vmul.f32 -1.442695, %v1145_v46  ;;  %v1149_v9 = vadd.f32 %v1098_v16, %v862_v50  ;;  %v1151_v0 = vadd.f32 %v1141_v53, %v864_v41 }
 0x23f   :  { %4039 = vpow2.f32 %v3524_v11  ;;  %v3527_v56 = vmul.f32 -1.442695, %v1148_v62  ;;  %v3529_v20 = vmul.f32 -1.442695, %v1150_v60 }
 0x240   :  { %v3528_v22 = vmul.f32 -1.442695, %v1149_v9  ;;  %4041 = vpow2.f32 %v3525_v19 }
 0x241   :  { %4043 = vpow2.f32 %v3527_v56  ;;  %v4796_v56 = vld [vmem:[#allocation5 + $0x4c] ss:$16 sps:$4 sm:$0xff]  }
 0x242   :  { %4045 = vpow2.f32 %v3528_v22  ;;  %v4798_v22 = vld [vmem:[#allocation5 + $0x48] ss:$16 sps:$4 sm:$0xff]  }
 0x243   :  { %4047 = vtanh.f32 %v1147_v47 }
 0x244   :  { %4049 = vpow2.f32 %v3526_v61  ;;  %v4802_v61 = vld [vmem:[#allocation5 + $0x6c] ss:$16 sps:$4 sm:$0xff]  }
 0x245   :  { %4051 = vpow2.f32 %v3529_v20  ;;  %v4804_v20 = vld [vmem:[#allocation5 + $0x68] ss:$16 sps:$4 sm:$0xff]  }
 0x249   :  { %v4040_v32 = vpop.eup %4039 }
 0x24a   :  { %v1170_v59 = vadd.f32 1.0, %v4040_v32  ;;  %v4042_v5 = vpop.eup %4041  ;;  %v4808_v32 = vld [vmem:[#allocation5 + $0x88] ss:$16 sps:$4 sm:$0xff]  }
 0x24b   :  { %v4044_v6 = vpop.eup %4043  ;;  %v1171_v24 = vadd.f32 1.0, %v4042_v5  ;;  %v4812_v5 = vld [vmem:[#allocation5 + $0xa0] ss:$16 sps:$4 sm:$0xff]  }
 0x24c   :  { %4053 = vrcp.f32 %v1170_v59  ;;  %v1173_v29 = vadd.f32 1.0, %v4044_v6  ;;  %v4046_v30 = vpop.eup %4045  ;;  %v4810_v59 = vld [vmem:[#allocation5 + $0x8c] ss:$16 sps:$4 sm:$0xff]   ;;  %v4814_v6 = vld [vmem:[#allocation5 + $0xa4] ss:$16 sps:$4 sm:$0xff]  }
 0x24d   :  { %4055 = vtanh.f32 %v1151_v0  ;;  %v1174_v34 = vadd.f32 1.0, %v4046_v30  ;;  %v4048_v35 = vpop.eup %4047  ;;  %v4792_v0 = vld [vmem:[#allocation5 + $0x28] ss:$16 sps:$4 sm:$0xff]  }
 0x24e   :  { %4057 = vrcp.f32 %v1171_v24  ;;  %v4050_v37 = vpop.eup %4049  ;;  %v4816_v24 = vld [vmem:[#allocation5 + $0xac] ss:$16 sps:$4 sm:$0xff]   ;;  %v4823_v30 = vld [vmem:[#allocation5 + $0xa8] ss:$16 sps:$4 sm:$0xff]  }
 0x24f   :  { %4059 = vrcp.f32 %v1173_v29  ;;  %v4052_v38 = vpop.eup %4051  ;;  %v1172_v45 = vadd.f32 1.0, %v4050_v37  ;;  %v4819_v29 = vld [vmem:[#allocation5 + $0xc4] ss:$16 sps:$4 sm:$0xff]  }
 0x250   :  { %4061 = vrcp.f32 %v1174_v34  ;;  %v1175_v50 = vadd.f32 1.0, %v4052_v38  ;;  %v4827_v34 = vld [vmem:[#allocation5 + $0xc0] ss:$16 sps:$4 sm:$0xff]   ;;  %v4832_v37 = vld [vmem:[#allocation5 + $0xe4] ss:$16 sps:$4 sm:$0xff]  }
 0x251   :  { %4063 = vrcp.f32 %v1172_v45  ;;  %v4835_v38 = vld [vmem:[#allocation5 + $0xc8] ss:$16 sps:$4 sm:$0xff]  }
 0x256   :  { %v4054_v39 = vpop.eup %4053 }
 0x257   :  { %v4056_v40 = vpop.eup %4055  ;;  %v1194_v42 = vmul.f32 %v4054_v39, %v4048_v35  ;;  %v4829_v35 = vld [vmem:[#allocation5 + $0xcc] ss:$16 sps:$4 sm:$0xff]   ;;  %v4839_v39 = vld [vmem:[#allocation5 + $0xe0] ss:$16 sps:$4 sm:$0xff]  }
 0x258   :  { %v4058_v43 = vpop.eup %4057 }
 0x259   :  { %v4060_v44 = vpop.eup %4059  ;;  %v1192_v46 = vmul.f32 %v4058_v43, %v4690_v63  ;;  %v1223_v43 = vunpack.c.l.bf16 %v4589_v18 }
 0x25a   :  { %v1195_v47 = vmul.f32 %v4060_v44, %v4056_v40  ;;  %v4062_v48 = vpop.eup %4061  ;;  %v4841_v40 = vld [vmem:[#allocation5 + $0xec] ss:$16 sps:$4 sm:$0xff]   ;;  %v1225_v44 = vunpack.c.l.bf16 %v4595_v31 }
 0x25b   :  { %v4768_v49 = vadd.f32 %v1194_v42, %v1192_v46  ;;  %v1193_v41 = vmul.f32 %v4062_v48, %v4693_v52  ;;  %v4064_v62 = vpop.eup %4063  ;;  %v4790_v52 = vld [vmem:[#allocation5 + $0x2c] ss:$16 sps:$4 sm:$0xff]   ;;  %v4845_v42 = vld [vmem:[#allocation5 + $0xe8] ss:$16 sps:$4 sm:$0xff]   ;;  %v1226_v48 = vunpack.c.l.bf16 %v4597_v33 }
 0x25d   :  { %4065 = vtanh.f32 %v4768_v49  ;;  %v4772_v11 = vadd.f32 %v1195_v47, %v1193_v41  ;;  %v1224_v47 = vunpack.c.l.bf16 %v4592_v27 }
 0x25e   :  { %4067 = vrcp.f32 %v1175_v50 }
 0x25f   :  { %4069 = vtanh.f32 %v4772_v11 }
 0x267   :  { %v4066_v60 = vpop.eup %4065 }
 0x268   :  { %v4068_v16 = vpop.eup %4067  ;;  %v1200_v63 = vmul.f32 %v4066_v60, %v4064_v62 }
 0x269   :  { %v4070_v53 = vpop.eup %4069 }
 0x26a   :  { %v1201_v19 = vmul.f32 %v4070_v53, %v4068_v16  ;;  %v1227_v16 = vunpack.c.h.bf16 %v4589_v18  ;;  %v1229_v53 = vunpack.c.h.bf16 %v4595_v31 }
 0x26c   :  { %v1202_v9 = vpack.c.bf16 %v1201_v19, %v1200_v63 }
 0x26e   :  { %3842 = vst [vmem:[%s5096_s6 + $0x8] sm:$0xff] %v1202_v9   ;;  %1457 = vmatmul.mubr.bf16.vlgmr.msra.gmra.mrb[40].mxu0 %v1202_v9  ;;  %1500 = vmatmul.mubr.bf16.vlgmr.msra.gmra.mrb[40].mxu1 %v1202_v9 }
 0x26f   :  { %1791 = vmatpush1.bf16.msra.mxu0 %v4705_v17  ;;  %1834 = vmatpush1.bf16.msra.mxu1 %v4707_v23 }
 0x270   :  { %1792 = vmatprep.subr.bf16.mxu0 %v4713_v57  ;;  %1822 = vmatprep.mubr.bf16.mxu0 %v5135_v15 }
 0x271   :  { %1865 = vmatprep.mubr.bf16.mxu1 %v5135_v15  ;;  %1835 = vmatprep.subr.bf16.mxu1 %v4790_v52 }
 0x273   :  { %1793 = vmatpush1.bf16.msra.mxu0 %v4716_v55  ;;  %1836 = vmatpush1.bf16.msra.mxu1 %v4792_v0 }
 0x274   :  { %1794 = vmatprep.subr.bf16.mxu0 %v4721_v14  ;;  %1837 = vmatprep.subr.bf16.mxu1 %v4796_v56 }
 0x277   :  { %1795 = vmatpush1.bf16.msra.mxu0 %v4724_v28  ;;  %1838 = vmatpush1.bf16.msra.mxu1 %v4798_v22 }
 0x278   :  { %1796 = vmatprep.subr.bf16.mxu0 %v4729_v21  ;;  %1839 = vmatprep.subr.bf16.mxu1 %v4802_v61 }
 0x27b   :  { %1797 = vmatpush1.bf16.msra.mxu0 %v4732_v12  ;;  %1840 = vmatpush1.bf16.msra.mxu1 %v4804_v20 }
 0x27c   :  { %1798 = vmatprep.subr.bf16.mxu0 %v4739_v26  ;;  %1841 = vmatprep.subr.bf16.mxu1 %v4810_v59 }
 0x27f   :  { %1799 = vmatpush1.bf16.msra.mxu0 %v4737_v25  ;;  %1842 = vmatpush1.bf16.msra.mxu1 %v4808_v32 }
 0x280   :  { %1800 = vmatprep.subr.bf16.mxu0 %v4814_v6  ;;  %1843 = vmatprep.subr.bf16.mxu1 %v4816_v24 }
 0x283   :  { %1801 = vmatpush1.bf16.msra.mxu0 %v4812_v5  ;;  %1844 = vmatpush1.bf16.msra.mxu1 %v4823_v30 }
 0x284   :  { %1802 = vmatprep.subr.bf16.mxu0 %v4819_v29  ;;  %1845 = vmatprep.subr.bf16.mxu1 %v4829_v35 }
 0x287   :  { %1803 = vmatpush1.bf16.msra.mxu0 %v4827_v34  ;;  %1846 = vmatpush1.bf16.msra.mxu1 %v4835_v38 }
 0x288   :  { %1804 = vmatprep.subr.bf16.mxu0 %v4832_v37  ;;  %1847 = vmatprep.subr.bf16.mxu1 %v4841_v40 }
 0x28b   :  { %1805 = vmatpush1.bf16.msra.mxu0 %v4839_v39  ;;  %1848 = vmatpush1.bf16.msra.mxu1 %v4845_v42 }
 0x28c   :  { %2156 = vmatprep.subr.bf16.mxu0 %v4701_v1  ;;  %2199 = vmatprep.subr.bf16.mxu1 %v4703_v3 }
 0x341   :  { %v1458_v45 = vpop.f32.mrb[40].mxu0  ;;  %v1501_v46 = vpop.f32.mrb[40].mxu1 }
 0x342   :  { %v1510_v50 = vadd.f32 %v1458_v45, %v1223_v43  ;;  %v1512_v41 = vadd.f32 %v1501_v46, %v1225_v44  ;;  %v1460_v62 = vpop.f32.mrb[41].mxu0  ;;  %v1503_v60 = vpop.f32.mrb[41].mxu1 }
 0x343   :  { %v1511_v63 = vadd.f32 %v1460_v62, %v1224_v47  ;;  %v1513_v19 = vadd.f32 %v1503_v60, %v1226_v48  ;;  %v1462_v9 = vpop.f32.mrb[42].mxu0  ;;  %v1505_v36 = vpop.f32.mrb[42].mxu1 }
 0x344   :  { %v3566_v58 = vmul.f32 -1.442695, %v1510_v50  ;;  %v1514_v2 = vadd.f32 %v1462_v9, %v1227_v16  ;;  %v1516_v54 = vadd.f32 %v1505_v36, %v1229_v53  ;;  %v1464_v13 = vpop.f32.mrb[43].mxu0  ;;  %v1507_v43 = vpop.f32.mrb[43].mxu1  ;;  %v3568_v31 = vmul.f32 -1.442695, %v1512_v41 }
 0x345   :  { %v3567_v44 = vmul.f32 -1.442695, %v1511_v63  ;;  %v1515_v45 = vadd.f32 %v1464_v13, %v1228_v51  ;;  %v1517_v46 = vadd.f32 %v1507_v43, %v1230_v8 }
 0x346   :  { %4071 = vpow2.f32 %v3566_v58  ;;  %v3569_v18 = vmul.f32 -1.442695, %v1514_v2  ;;  %v3571_v47 = vmul.f32 -1.442695, %v1516_v54 }
 0x347   :  { %v3570_v10 = vmul.f32 -1.442695, %v1515_v45  ;;  %4073 = vpow2.f32 %v3567_v44 }
 0x348   :  { %4075 = vpow2.f32 %v3569_v18 }
 0x349   :  { %4077 = vpow2.f32 %v3570_v10 }
 0x34a   :  { %4079 = vtanh.f32 %v1513_v19 }
 0x34b   :  { %4081 = vpow2.f32 %v3568_v31 }
 0x34c   :  { %4083 = vpow2.f32 %v3571_v47 }
 0x350   :  { %v4072_v48 = vpop.eup %4071 }
 0x351   :  { %v1536_v27 = vadd.f32 1.0, %v4072_v48  ;;  %v4074_v33 = vpop.eup %4073 }
 0x352   :  { %v4076_v36 = vpop.eup %4075  ;;  %v1537_v50 = vadd.f32 1.0, %v4074_v33 }
 0x353   :  { %4085 = vrcp.f32 %v1536_v27  ;;  %v1539_v62 = vadd.f32 1.0, %v4076_v36  ;;  %v4078_v13 = vpop.eup %4077  ;;  %v1591_v36 = vunpack.c.l.bf16 %v4611_v4 }
 0x354   :  { %4087 = vtanh.f32 %v1517_v46  ;;  %v1540_v58 = vadd.f32 1.0, %v4078_v13  ;;  %v4080_v2 = vpop.eup %4079  ;;  %v5136_v13 = vld [vmem:[#allocation8_spill] sm:$0xff] }
 0x355   :  { %4089 = vrcp.f32 %v1537_v50  ;;  %v4082_v10 = vpop.eup %4081 }
 0x356   :  { %4091 = vrcp.f32 %v1539_v62  ;;  %v4084_v8 = vpop.eup %4083  ;;  %v1538_v53 = vadd.f32 1.0, %v4082_v10 }
 0x357   :  { %4093 = vrcp.f32 %v1540_v58  ;;  %v1541_v44 = vadd.f32 1.0, %v4084_v8  ;;  %v1590_v58 = vunpack.c.l.bf16 %v5136_v13 }
 0x358   :  { %4095 = vrcp.f32 %v1538_v53 }
 0x35d   :  { %v4086_v54 = vpop.eup %4085 }
 0x35e   :  { %v4088_v51 = vpop.eup %4087  ;;  %v1560_v41 = vmul.f32 %v4086_v54, %v4080_v2  ;;  %v5137_v2 = vld [vmem:[#allocation9_spill] sm:$0xff] }
 0x35f   :  { %v4090_v60 = vpop.eup %4089  ;;  %v1592_v10 = vunpack.c.l.bf16 %v5137_v2 }
 0x360   :  { %v4092_v16 = vpop.eup %4091  ;;  %v1558_v63 = vmul.f32 %v4090_v60, %v4768_v49  ;;  %v1593_v60 = vunpack.c.h.bf16 %v4605_v7 }
 0x361   :  { %v1561_v19 = vmul.f32 %v4092_v16, %v4088_v51  ;;  %v4094_v9 = vpop.eup %4093 }
 0x362   :  { %v4861_v43 = vadd.f32 %v1560_v41, %v1558_v63  ;;  %v1559_v45 = vmul.f32 %v4094_v9, %v4772_v11  ;;  %v4096_v18 = vpop.eup %4095  ;;  %v1589_v11 = vunpack.c.l.bf16 %v4605_v7  ;;  %v1596_v9 = vunpack.c.h.bf16 %v5137_v2 }
 0x364   :  { %4097 = vtanh.f32 %v4861_v43  ;;  %v4865_v46 = vadd.f32 %v1561_v19, %v1559_v45  ;;  %v1594_v19 = vunpack.c.h.bf16 %v5136_v13 }
 0x365   :  { %4099 = vrcp.f32 %v1541_v44 }
 0x366   :  { %4101 = vtanh.f32 %v4865_v46 }
 0x36e   :  { %v4098_v31 = vpop.eup %4097 }
 0x36f   :  { %v4100_v47 = vpop.eup %4099  ;;  %v1566_v49 = vmul.f32 %v4098_v31, %v4096_v18 }
 0x370   :  { %v4102_v48 = vpop.eup %4101 }
 0x371   :  { %v1567_v27 = vmul.f32 %v4102_v48, %v4100_v47 }
 0x373   :  { %v1568_v33 = vpack.c.bf16 %v1567_v27, %v1566_v49 }
 0x375   :  { %3843 = vst [vmem:[%s5096_s6 + $0x10] sm:$0xff] %v1568_v33   ;;  %1823 = vmatmul.mubr.bf16.vlgmr.msra.gmra.mrb[44].mxu0 %v1568_v33  ;;  %1866 = vmatmul.mubr.bf16.vlgmr.msra.gmra.mrb[44].mxu1 %v1568_v33 }
 0x376   :  { %2157 = vmatpush1.bf16.msra.mxu0 %v4705_v17  ;;  %2200 = vmatpush1.bf16.msra.mxu1 %v4707_v23 }
 0x377   :  { %2158 = vmatprep.subr.bf16.mxu0 %v4713_v57  ;;  %2201 = vmatprep.subr.bf16.mxu1 %v4790_v52 }
 0x378   :  { %2188 = vmatprep.mubr.bf16.mxu0 %v5135_v15  ;;  %2231 = vmatprep.mubr.bf16.mxu1 %v5135_v15 }
 0x37a   :  { %2159 = vmatpush1.bf16.msra.mxu0 %v4716_v55  ;;  %2202 = vmatpush1.bf16.msra.mxu1 %v4792_v0 }
 0x37b   :  { %2160 = vmatprep.subr.bf16.mxu0 %v4721_v14  ;;  %2203 = vmatprep.subr.bf16.mxu1 %v4796_v56 }
 0x37e   :  { %2161 = vmatpush1.bf16.msra.mxu0 %v4724_v28  ;;  %2204 = vmatpush1.bf16.msra.mxu1 %v4798_v22 }
 0x37f   :  { %2162 = vmatprep.subr.bf16.mxu0 %v4729_v21  ;;  %2205 = vmatprep.subr.bf16.mxu1 %v4802_v61 }
 0x382   :  { %2163 = vmatpush1.bf16.msra.mxu0 %v4732_v12  ;;  %2206 = vmatpush1.bf16.msra.mxu1 %v4804_v20 }
 0x383   :  { %2164 = vmatprep.subr.bf16.mxu0 %v4739_v26  ;;  %2207 = vmatprep.subr.bf16.mxu1 %v4810_v59 }
 0x386   :  { %2165 = vmatpush1.bf16.msra.mxu0 %v4737_v25  ;;  %2208 = vmatpush1.bf16.msra.mxu1 %v4808_v32 }
 0x387   :  { %2166 = vmatprep.subr.bf16.mxu0 %v4814_v6  ;;  %2209 = vmatprep.subr.bf16.mxu1 %v4816_v24 }
 0x38a   :  { %2167 = vmatpush1.bf16.msra.mxu0 %v4812_v5  ;;  %2210 = vmatpush1.bf16.msra.mxu1 %v4823_v30 }
 0x38b   :  { %2168 = vmatprep.subr.bf16.mxu0 %v4819_v29  ;;  %2211 = vmatprep.subr.bf16.mxu1 %v4829_v35 }
 0x38e   :  { %2169 = vmatpush1.bf16.msra.mxu0 %v4827_v34  ;;  %2212 = vmatpush1.bf16.msra.mxu1 %v4835_v38 }
 0x38f   :  { %2170 = vmatprep.subr.bf16.mxu0 %v4832_v37  ;;  %2213 = vmatprep.subr.bf16.mxu1 %v4841_v40 }
 0x392   :  { %2171 = vmatpush1.bf16.msra.mxu0 %v4839_v39  ;;  %2214 = vmatpush1.bf16.msra.mxu1 %v4845_v42 }
 0x393   :  { %2522 = vmatprep.subr.bf16.mxu0 %v4701_v1  ;;  %2565 = vmatprep.subr.bf16.mxu1 %v4703_v3  ;;  %v1595_v1 = vunpack.c.h.bf16 %v4611_v4 }
 0x448   :  { %v1824_v50 = vpop.f32.mrb[44].mxu0  ;;  %v1867_v62 = vpop.f32.mrb[44].mxu1 }
 0x449   :  { %v1876_v8 = vadd.f32 %v1824_v50, %v1589_v11  ;;  %v1878_v54 = vadd.f32 %v1867_v62, %v1591_v36  ;;  %v1826_v51 = vpop.f32.mrb[45].mxu0  ;;  %v1869_v41 = vpop.f32.mrb[45].mxu1 }
 0x44a   :  { %v1877_v16 = vadd.f32 %v1826_v51, %v1590_v58  ;;  %v1879_v3 = vadd.f32 %v1869_v41, %v1592_v10  ;;  %v1828_v53 = vpop.f32.mrb[46].mxu0  ;;  %v1871_v63 = vpop.f32.mrb[46].mxu1 }
 0x44b   :  { %v3608_v44 = vmul.f32 -1.442695, %v1876_v8  ;;  %v1880_v45 = vadd.f32 %v1828_v53, %v1593_v60  ;;  %v1882_v18 = vadd.f32 %v1871_v63, %v1595_v1  ;;  %v1830_v31 = vpop.f32.mrb[47].mxu0  ;;  %v1873_v47 = vpop.f32.mrb[47].mxu1  ;;  %v3610_v4 = vmul.f32 -1.442695, %v1878_v54 }
 0x44c   :  { %v3609_v48 = vmul.f32 -1.442695, %v1877_v16  ;;  %v1881_v49 = vadd.f32 %v1830_v31, %v1594_v19  ;;  %v1883_v27 = vadd.f32 %v1873_v47, %v1596_v9 }
 0x44d   :  { %4103 = vpow2.f32 %v3608_v44  ;;  %v3611_v7 = vmul.f32 -1.442695, %v1880_v45  ;;  %v3613_v11 = vmul.f32 -1.442695, %v1882_v18 }
 0x44e   :  { %v3612_v33 = vmul.f32 -1.442695, %v1881_v49  ;;  %4105 = vpow2.f32 %v3609_v48 }
 0x44f   :  { %4107 = vpow2.f32 %v3611_v7 }
 0x450   :  { %4109 = vpow2.f32 %v3612_v33 }
 0x451   :  { %4111 = vtanh.f32 %v1879_v3 }
 0x452   :  { %4113 = vpow2.f32 %v3610_v4 }
 0x453   :  { %4115 = vpow2.f32 %v3613_v11 }
 0x457   :  { %v4104_v36 = vpop.eup %4103 }
 0x458   :  { %v1902_v50 = vadd.f32 1.0, %v4104_v36  ;;  %v4106_v62 = vpop.eup %4105 }
 0x459   :  { %v4108_v13 = vpop.eup %4107  ;;  %v1903_v58 = vadd.f32 1.0, %v4106_v62 }
 0x45a   :  { %4117 = vrcp.f32 %v1902_v50  ;;  %v1905_v2 = vadd.f32 1.0, %v4108_v13  ;;  %v4110_v10 = vpop.eup %4109 }
 0x45b   :  { %4119 = vtanh.f32 %v1883_v27  ;;  %v1906_v8 = vadd.f32 1.0, %v4110_v10  ;;  %v4112_v51 = vpop.eup %4111 }
 0x45c   :  { %4121 = vrcp.f32 %v1903_v58  ;;  %v4114_v41 = vpop.eup %4113 }
 0x45d   :  { %4123 = vrcp.f32 %v1905_v2  ;;  %v4116_v54 = vpop.eup %4115  ;;  %v1904_v63 = vadd.f32 1.0, %v4114_v41 }
 0x45e   :  { %4125 = vrcp.f32 %v1906_v8  ;;  %v1907_v18 = vadd.f32 1.0, %v4116_v54 }
 0x45f   :  { %4127 = vrcp.f32 %v1904_v63 }
 0x464   :  { %v4118_v60 = vpop.eup %4117 }
 0x465   :  { %v4120_v1 = vpop.eup %4119  ;;  %v1926_v16 = vmul.f32 %v4118_v60, %v4112_v51 }
 0x466   :  { %v4122_v3 = vpop.eup %4121 }
 0x467   :  { %v4124_v53 = vpop.eup %4123  ;;  %v1924_v19 = vmul.f32 %v4122_v3, %v4861_v43 }
 0x468   :  { %v1927_v9 = vmul.f32 %v4124_v53, %v4120_v1  ;;  %v4126_v44 = vpop.eup %4125 }
 0x469   :  { %v4914_v45 = vadd.f32 %v1926_v16, %v1924_v19  ;;  %v1925_v31 = vmul.f32 %v4126_v44, %v4865_v46  ;;  %v4128_v48 = vpop.eup %4127 }
 0x46b   :  { %4129 = vtanh.f32 %v4914_v45  ;;  %v4918_v47 = vadd.f32 %v1927_v9, %v1925_v31 }
 0x46c   :  { %4131 = vrcp.f32 %v1907_v18 }
 0x46d   :  { %4133 = vtanh.f32 %v4918_v47 }
 0x475   :  { %v4130_v49 = vpop.eup %4129 }
 0x476   :  { %v4132_v27 = vpop.eup %4131  ;;  %v1932_v43 = vmul.f32 %v4130_v49, %v4128_v48 }
 0x477   :  { %v4134_v7 = vpop.eup %4133 }
 0x478   :  { %v1933_v33 = vmul.f32 %v4134_v7, %v4132_v27 }
 0x47a   :  { %v1934_v4 = vpack.c.bf16 %v1933_v33, %v1932_v43 }
 0x47c   :  { %3844 = vst [vmem:[%s5096_s6 + $0x18] sm:$0xff] %v1934_v4   ;;  %2189 = vmatmul.mubr.bf16.vlgmr.msra.gmra.mrb[48].mxu0 %v1934_v4  ;;  %2232 = vmatmul.mubr.bf16.vlgmr.msra.gmra.mrb[48].mxu1 %v1934_v4 }
 0x47d   :  { %2523 = vmatpush1.bf16.msra.mxu0 %v4705_v17  ;;  %2566 = vmatpush1.bf16.msra.mxu1 %v4707_v23  ;;  %v5138_v17 = vld [vmem:[#allocation10_spill] sm:$0xff] }
 0x47e   :  { %2524 = vmatprep.subr.bf16.mxu0 %v4713_v57  ;;  %2567 = vmatprep.subr.bf16.mxu1 %v4790_v52  ;;  %v1955_v23 = vunpack.c.l.bf16 %v5138_v17  ;;  %v5139_v57 = vld [vmem:[#allocation12_spill] sm:$0xff]  ;;  %v1959_v62 = vunpack.c.h.bf16 %v5138_v17 }
 0x47f   :  { %2554 = vmatprep.mubr.bf16.mxu0 %v5135_v15  ;;  %2597 = vmatprep.mubr.bf16.mxu1 %v5135_v15  ;;  %v1961_v13 = vunpack.c.h.bf16 %v5139_v57 }
 0x481   :  { %2525 = vmatpush1.bf16.msra.mxu0 %v4716_v55  ;;  %2568 = vmatpush1.bf16.msra.mxu1 %v4792_v0  ;;  %v1957_v55 = vunpack.c.l.bf16 %v5139_v57 }
 0x482   :  { %2526 = vmatprep.subr.bf16.mxu0 %v4721_v14  ;;  %2569 = vmatprep.subr.bf16.mxu1 %v4796_v56 }
 0x485   :  { %2527 = vmatpush1.bf16.msra.mxu0 %v4724_v28  ;;  %2570 = vmatpush1.bf16.msra.mxu1 %v4798_v22 }
 0x486   :  { %2528 = vmatprep.subr.bf16.mxu0 %v4729_v21  ;;  %2571 = vmatprep.subr.bf16.mxu1 %v4802_v61  ;;  %v5140_v21 = vld [vmem:[#allocation11_spill] sm:$0xff] }
 0x487   :  { %v1960_v51 = vunpack.c.h.bf16 %v5140_v21 }
 0x489   :  { %2529 = vmatpush1.bf16.msra.mxu0 %v4732_v12  ;;  %2572 = vmatpush1.bf16.msra.mxu1 %v4804_v20  ;;  %v1956_v12 = vunpack.c.l.bf16 %v5140_v21 }
 0x48a   :  { %2530 = vmatprep.subr.bf16.mxu0 %v4739_v26  ;;  %2573 = vmatprep.subr.bf16.mxu1 %v4810_v59 }
 0x48d   :  { %2531 = vmatpush1.bf16.msra.mxu0 %v4737_v25  ;;  %2574 = vmatpush1.bf16.msra.mxu1 %v4808_v32  ;;  %v5141_v25 = vld [vmem:[#allocation13_spill] sm:$0xff] }
 0x48e   :  { %2532 = vmatprep.subr.bf16.mxu0 %v4814_v6  ;;  %2575 = vmatprep.subr.bf16.mxu1 %v4816_v24  ;;  %v1958_v26 = vunpack.c.l.bf16 %v5141_v25  ;;  %v1962_v41 = vunpack.c.h.bf16 %v5141_v25 }
 0x491   :  { %2533 = vmatpush1.bf16.msra.mxu0 %v4812_v5  ;;  %2576 = vmatpush1.bf16.msra.mxu1 %v4823_v30 }
 0x492   :  { %2534 = vmatprep.subr.bf16.mxu0 %v4819_v29  ;;  %2577 = vmatprep.subr.bf16.mxu1 %v4829_v35 }
 0x495   :  { %2535 = vmatpush1.bf16.msra.mxu0 %v4827_v34  ;;  %2578 = vmatpush1.bf16.msra.mxu1 %v4835_v38 }
 0x496   :  { %2536 = vmatprep.subr.bf16.mxu0 %v4832_v37  ;;  %2579 = vmatprep.subr.bf16.mxu1 %v4841_v40 }
 0x499   :  { %2537 = vmatpush1.bf16.msra.mxu0 %v4839_v39  ;;  %2580 = vmatpush1.bf16.msra.mxu1 %v4845_v42 }
 0x54f   :  { %v2190_v14 = vpop.f32.mrb[48].mxu0  ;;  %v2233_v28 = vpop.f32.mrb[48].mxu1 }
 0x550   :  { %v2242_v46 = vadd.f32 %v2190_v14, %v1955_v23  ;;  %v2244_v11 = vadd.f32 %v2233_v28, %v1957_v55  ;;  %v2192_v36 = vpop.f32.mrb[49].mxu0  ;;  %v2235_v50 = vpop.f32.mrb[49].mxu1 }
 0x551   :  { %v2243_v58 = vadd.f32 %v2192_v36, %v1956_v12  ;;  %v2245_v2 = vadd.f32 %v2235_v50, %v1958_v26  ;;  %v2194_v10 = vpop.f32.mrb[50].mxu0  ;;  %v2237_v8 = vpop.f32.mrb[50].mxu1 }
 0x552   :  { %v3650_v54 = vmul.f32 -1.442695, %v2242_v46  ;;  %v2246_v60 = vadd.f32 %v2194_v10, %v1959_v62  ;;  %v2248_v1 = vadd.f32 %v2237_v8, %v1961_v13  ;;  %v2196_v16 = vpop.f32.mrb[51].mxu0  ;;  %v2239_v3 = vpop.f32.mrb[51].mxu1  ;;  %v3652_v18 = vmul.f32 -1.442695, %v2244_v11 }
 0x553   :  { %v3651_v53 = vmul.f32 -1.442695, %v2243_v58  ;;  %v2247_v63 = vadd.f32 %v2196_v16, %v1960_v51  ;;  %v2249_v19 = vadd.f32 %v2239_v3, %v1962_v41  ;;  %v4979_v16 = vld [vmem:[#allocation5 + $0x8] ss:$16 sps:$4 sm:$0xff]   ;;  %v4983_v3 = vld [vmem:[#allocation5 + $0x24] ss:$16 sps:$4 sm:$0xff]  }
 0x554   :  { %4135 = vpow2.f32 %v3650_v54  ;;  %v3653_v9 = vmul.f32 -1.442695, %v2246_v60  ;;  %v3655_v31 = vmul.f32 -1.442695, %v2248_v1  ;;  %v3964_v60 = vld [vmem:[#allocation5 + $0xc] ss:$16 sps:$4 sm:$0xff]  }
 0x555   :  { %v3654_v44 = vmul.f32 -1.442695, %v2247_v63  ;;  %4137 = vpow2.f32 %v3651_v53  ;;  %v4977_v1 = vld [vmem:[#allocation5] ss:$16 sps:$4 sm:$0xff]   ;;  %2931 = vmatprep.subr.bf16.mxu1 %v3964_v60  ;;  %v4991_v63 = vld [vmem:[#allocation5 + $0x44] ss:$16 sps:$4 sm:$0xff]  }
 0x556   :  { %4139 = vpow2.f32 %v3653_v9  ;;  %v4986_v53 = vld [vmem:[#allocation5 + $0x20] ss:$16 sps:$4 sm:$0xff]  }
 0x557   :  { %4141 = vpow2.f32 %v3654_v44  ;;  %v5002_v9 = vld [vmem:[#allocation5 + $0x60] ss:$16 sps:$4 sm:$0xff]  }
 0x558   :  { %4143 = vtanh.f32 %v2245_v2 }
 0x559   :  { %4145 = vpow2.f32 %v3652_v18 }
 0x55a   :  { %4147 = vpow2.f32 %v3655_v31 }
 0x55e   :  { %v4136_v48 = vpop.eup %4135 }
 0x55f   :  { %v2268_v49 = vadd.f32 1.0, %v4136_v48  ;;  %v4138_v27 = vpop.eup %4137 }
 0x560   :  { %v4140_v7 = vpop.eup %4139  ;;  %v2269_v43 = vadd.f32 1.0, %v4138_v27 }
 0x561   :  { %4149 = vrcp.f32 %v2268_v49  ;;  %v2271_v33 = vadd.f32 1.0, %v4140_v7  ;;  %v4142_v4 = vpop.eup %4141 }
 0x562   :  { %4151 = vtanh.f32 %v2249_v19  ;;  %v2272_v17 = vadd.f32 1.0, %v4142_v4  ;;  %v4144_v23 = vpop.eup %4143  ;;  %v4994_v19 = vld [vmem:[#allocation5 + $0x40] ss:$16 sps:$4 sm:$0xff]  }
 0x563   :  { %4153 = vrcp.f32 %v2269_v43  ;;  %v4146_v57 = vpop.eup %4145 }
 0x564   :  { %4155 = vrcp.f32 %v2271_v33  ;;  %v4148_v55 = vpop.eup %4147  ;;  %v2270_v26 = vadd.f32 1.0, %v4146_v57 }
 0x565   :  { %4157 = vrcp.f32 %v2272_v17  ;;  %v2273_v62 = vadd.f32 1.0, %v4148_v55 }
 0x566   :  { %4159 = vrcp.f32 %v2270_v26 }
 0x56b   :  { %v4150_v14 = vpop.eup %4149 }
 0x56c   :  { %v4152_v28 = vpop.eup %4151  ;;  %v2292_v21 = vmul.f32 %v4150_v14, %v4144_v23 }
 0x56d   :  { %v4154_v12 = vpop.eup %4153 }
 0x56e   :  { %v4156_v25 = vpop.eup %4155  ;;  %v2290_v46 = vmul.f32 %v4154_v12, %v4914_v45 }
 0x56f   :  { %v2293_v11 = vmul.f32 %v4156_v25, %v4152_v28  ;;  %v4158_v36 = vpop.eup %4157 }
 0x570   :  { %v4965_v50 = vadd.f32 %v2292_v21, %v2290_v46  ;;  %v2291_v13 = vmul.f32 %v4158_v36, %v4918_v47  ;;  %v4160_v2 = vpop.eup %4159  ;;  %v3961_v47 = vld [vmem:[#allocation5 + $0x4] ss:$16 sps:$4 sm:$0xff]  }
 0x571   :  { %2888 = vmatprep.subr.bf16.mxu0 %v3961_v47 }
 0x572   :  { %4161 = vtanh.f32 %v4965_v50  ;;  %v4969_v58 = vadd.f32 %v2293_v11, %v2291_v13 }
 0x573   :  { %4163 = vrcp.f32 %v2273_v62 }
 0x574   :  { %4165 = vtanh.f32 %v4969_v58 }
 0x57c   :  { %v4162_v10 = vpop.eup %4161 }
 0x57d   :  { %v4164_v8 = vpop.eup %4163  ;;  %v2298_v45 = vmul.f32 %v4162_v10, %v4160_v2 }
 0x57e   :  { %v4166_v51 = vpop.eup %4165 }
 0x57f   :  { %v2299_v41 = vmul.f32 %v4166_v51, %v4164_v8 }
 0x581   :  { %v2300_v54 = vpack.c.bf16 %v2299_v41, %v2298_v45 }
 0x583   :  { %3845 = vst [vmem:[%s5096_s6 + $0x20] sm:$0xff] %v2300_v54   ;;  %2555 = vmatmul.mubr.bf16.vlgmr.msra.gmra.mrb[52].mxu0 %v2300_v54  ;;  %2598 = vmatmul.mubr.bf16.vlgmr.msra.gmra.mrb[52].mxu1 %v2300_v54 }
 0x584   :  { %2920 = vmatprep.mubr.bf16.mxu0 %v5135_v15  ;;  %2963 = vmatprep.mubr.bf16.mxu1 %v5135_v15 }
 0x585   :  { %2889 = vmatpush1.bf16.msra.mxu0 %v4977_v1  ;;  %2932 = vmatpush1.bf16.msra.mxu1 %v4979_v16 }
 0x586   :  { %2933 = vmatprep.subr.bf16.mxu1 %v4790_v52  ;;  %2890 = vmatprep.subr.bf16.mxu0 %v4983_v3  ;;  %v4999_v52 = vld [vmem:[#allocation5 + $0x64] ss:$16 sps:$4 sm:$0xff]  }
 0x589   :  { %2891 = vmatpush1.bf16.msra.mxu0 %v4986_v53  ;;  %2934 = vmatpush1.bf16.msra.mxu1 %v4792_v0  ;;  %v5007_v0 = vld [vmem:[#allocation5 + $0x80] ss:$16 sps:$4 sm:$0xff]  }
 0x58a   :  { %2935 = vmatprep.subr.bf16.mxu1 %v4796_v56  ;;  %2892 = vmatprep.subr.bf16.mxu0 %v4991_v63  ;;  %v5009_v56 = vld [vmem:[#allocation5 + $0x84] ss:$16 sps:$4 sm:$0xff]  }
 0x58d   :  { %2893 = vmatpush1.bf16.msra.mxu0 %v4994_v19  ;;  %2936 = vmatpush1.bf16.msra.mxu1 %v4798_v22  ;;  %v5142_v22 = vld [vmem:[#allocation14_spill] sm:$0xff] }
 0x58e   :  { %2937 = vmatprep.subr.bf16.mxu1 %v4802_v61  ;;  %2894 = vmatprep.subr.bf16.mxu0 %v4999_v52  ;;  %v2321_v61 = vunpack.c.l.bf16 %v5142_v22 }
 0x591   :  { %2895 = vmatpush1.bf16.msra.mxu0 %v5002_v9  ;;  %2938 = vmatpush1.bf16.msra.mxu1 %v4804_v20  ;;  %v5143_v20 = vld [vmem:[#allocation16_spill] sm:$0xff] }
 0x592   :  { %2939 = vmatprep.subr.bf16.mxu1 %v4810_v59  ;;  %2896 = vmatprep.subr.bf16.mxu0 %v5009_v56 }
 0x595   :  { %2897 = vmatpush1.bf16.msra.mxu0 %v5007_v0  ;;  %2940 = vmatpush1.bf16.msra.mxu1 %v4808_v32  ;;  %v2323_v32 = vunpack.c.l.bf16 %v5143_v20 }
 0x596   :  { %2898 = vmatprep.subr.bf16.mxu0 %v4814_v6  ;;  %2941 = vmatprep.subr.bf16.mxu1 %v4816_v24  ;;  %v5144_v6 = vld [vmem:[#allocation15_spill] sm:$0xff] }
 0x597   :  { %v2322_v24 = vunpack.c.l.bf16 %v5144_v6  ;;  %v2326_v48 = vunpack.c.h.bf16 %v5144_v6 }
 0x599   :  { %2899 = vmatpush1.bf16.msra.mxu0 %v4812_v5  ;;  %2942 = vmatpush1.bf16.msra.mxu1 %v4823_v30 }
 0x59a   :  { %2900 = vmatprep.subr.bf16.mxu0 %v4819_v29  ;;  %2943 = vmatprep.subr.bf16.mxu1 %v4829_v35  ;;  %v5145_v29 = vld [vmem:[#allocation17_spill] sm:$0xff] }
 0x59b   :  { %v2324_v30 = vunpack.c.l.bf16 %v5145_v29  ;;  %v2328_v49 = vunpack.c.h.bf16 %v5145_v29 }
 0x59d   :  { %2901 = vmatpush1.bf16.msra.mxu0 %v4827_v34  ;;  %2944 = vmatpush1.bf16.msra.mxu1 %v4835_v38 }
 0x59e   :  { %2902 = vmatprep.subr.bf16.mxu0 %v4832_v37  ;;  %2945 = vmatprep.subr.bf16.mxu1 %v4841_v40  ;;  %v2327_v40 = vunpack.c.h.bf16 %v5143_v20 }
 0x5a1   :  { %2903 = vmatpush1.bf16.msra.mxu0 %v4839_v39  ;;  %2946 = vmatpush1.bf16.msra.mxu1 %v4845_v42  ;;  %v2325_v39 = vunpack.c.h.bf16 %v5142_v22 }
 0x5a2   :  { %3254 = vmatprep.subr.bf16.mxu0 %v3961_v47  ;;  %3297 = vmatprep.subr.bf16.mxu1 %v3964_v60 }
 0x656   :  { %v2556_v59 = vpop.f32.mrb[52].mxu0  ;;  %v2599_v5 = vpop.f32.mrb[52].mxu1 }
 0x657   :  { %v2608_v34 = vadd.f32 %v2556_v59, %v2321_v61  ;;  %v2610_v35 = vadd.f32 %v2599_v5, %v2323_v32  ;;  %v2558_v37 = vpop.f32.mrb[53].mxu0  ;;  %v2601_v38 = vpop.f32.mrb[53].mxu1 }
 0x658   :  { %v2609_v42 = vadd.f32 %v2558_v37, %v2322_v24  ;;  %v2611_v44 = vadd.f32 %v2601_v38, %v2324_v30  ;;  %v2560_v18 = vpop.f32.mrb[54].mxu0  ;;  %v2603_v31 = vpop.f32.mrb[54].mxu1  ;;  %v3994_v38 = vld [vmem:[#allocation5 + $0xac] ss:$16 sps:$4 sm:$0xff]  }
 0x659   :  { %v3692_v27 = vmul.f32 -1.442695, %v2608_v34  ;;  %v2612_v7 = vadd.f32 %v2560_v18, %v2325_v39  ;;  %v2614_v43 = vadd.f32 %v2603_v31, %v2327_v40  ;;  %v2562_v33 = vpop.f32.mrb[55].mxu0  ;;  %v2605_v4 = vpop.f32.mrb[55].mxu1  ;;  %v3694_v28 = vmul.f32 -1.442695, %v2610_v35 }
 0x65a   :  { %v3693_v17 = vmul.f32 -1.442695, %v2609_v42  ;;  %v2613_v23 = vadd.f32 %v2562_v33, %v2326_v48  ;;  %v2615_v57 = vadd.f32 %v2605_v4, %v2328_v49  ;;  %v3995_v39 = vld [vmem:[#allocation5 + $0xc0] ss:$16 sps:$4 sm:$0xff]   ;;  %v4000_v40 = vld [vmem:[#allocation5 + $0xcc] ss:$16 sps:$4 sm:$0xff]  }
 0x65b   :  { %4167 = vpow2.f32 %v3692_v27  ;;  %v3695_v55 = vmul.f32 -1.442695, %v2612_v7  ;;  %v3697_v21 = vmul.f32 -1.442695, %v2614_v43  ;;  %v4003_v42 = vld [vmem:[#allocation5 + $0xe4] ss:$16 sps:$4 sm:$0xff]  }
 0x65c   :  { %v3696_v14 = vmul.f32 -1.442695, %v2613_v23  ;;  %4169 = vpow2.f32 %v3693_v17  ;;  %v4001_v18 = vld [vmem:[#allocation5 + $0xe0] ss:$16 sps:$4 sm:$0xff]   ;;  %v4006_v31 = vld [vmem:[#allocation5 + $0xec] ss:$16 sps:$4 sm:$0xff]  }
 0x65d   :  { %4171 = vpow2.f32 %v3695_v55  ;;  %v4004_v48 = vld [vmem:[#allocation5 + $0xe8] ss:$16 sps:$4 sm:$0xff]   ;;  %v5146_v49 = vld [vmem:[#allocation18_spill] sm:$0xff]  ;;  %v5147_v7 = vld [vmem:[#allocation20_spill] sm:$0xff] }
 0x65e   :  { %4173 = vpow2.f32 %v3696_v14  ;;  %v2687_v27 = vunpack.c.l.bf16 %v5146_v49  ;;  %v2689_v43 = vunpack.c.l.bf16 %v5147_v7  ;;  %v5148_v17 = vld [vmem:[#allocation19_spill] sm:$0xff] }
 0x65f   :  { %4175 = vtanh.f32 %v2611_v44  ;;  %v3998_v44 = vld [vmem:[#allocation5 + $0xc8] ss:$16 sps:$4 sm:$0xff]   ;;  %v2688_v23 = vunpack.c.l.bf16 %v5148_v17 }
 0x660   :  { %4177 = vpow2.f32 %v3694_v28 }
 0x661   :  { %4179 = vpow2.f32 %v3697_v21 }
 0x665   :  { %v4168_v12 = vpop.eup %4167 }
 0x666   :  { %v2634_v25 = vadd.f32 1.0, %v4168_v12  ;;  %v4170_v26 = vpop.eup %4169 }
 0x667   :  { %v4172_v46 = vpop.eup %4171  ;;  %v2635_v11 = vadd.f32 1.0, %v4170_v26  ;;  %v2693_v26 = vunpack.c.h.bf16 %v5147_v7 }
 0x668   :  { %4181 = vrcp.f32 %v2634_v25  ;;  %v2637_v36 = vadd.f32 1.0, %v4172_v46  ;;  %v4174_v62 = vpop.eup %4173  ;;  %v2691_v25 = vunpack.c.h.bf16 %v5146_v49 }
 0x669   :  { %4183 = vtanh.f32 %v2615_v57  ;;  %v2638_v13 = vadd.f32 1.0, %v4174_v62  ;;  %v4176_v2 = vpop.eup %4175  ;;  %v5149_v57 = vld [vmem:[#allocation21_spill] sm:$0xff] }
 0x66a   :  { %4185 = vrcp.f32 %v2635_v11  ;;  %v4178_v10 = vpop.eup %4177  ;;  %v2690_v55 = vunpack.c.l.bf16 %v5149_v57 }
 0x66b   :  { %4187 = vrcp.f32 %v2637_v36  ;;  %v4180_v8 = vpop.eup %4179  ;;  %v2636_v60 = vadd.f32 1.0, %v4178_v10 }
 0x66c   :  { %4189 = vrcp.f32 %v2638_v13  ;;  %v2639_v59 = vadd.f32 1.0, %v4180_v8  ;;  %v2692_v13 = vunpack.c.h.bf16 %v5148_v17 }
 0x66d   :  { %4191 = vrcp.f32 %v2636_v60 }
 0x672   :  { %v4182_v51 = vpop.eup %4181 }
 0x673   :  { %v4184_v45 = vpop.eup %4183  ;;  %v2658_v41 = vmul.f32 %v4182_v51, %v4176_v2  ;;  %v2694_v2 = vunpack.c.h.bf16 %v5149_v57 }
 0x674   :  { %v4186_v54 = vpop.eup %4185 }
 0x675   :  { %v4188_v47 = vpop.eup %4187  ;;  %v2656_v22 = vmul.f32 %v4186_v54, %v4965_v50 }
 0x676   :  { %v2659_v61 = vmul.f32 %v4188_v47, %v4184_v45  ;;  %v4190_v20 = vpop.eup %4189 }
 0x677   :  { %v5036_v32 = vadd.f32 %v2658_v41, %v2656_v22  ;;  %v2657_v5 = vmul.f32 %v4190_v20, %v4969_v58  ;;  %v4192_v24 = vpop.eup %4191  ;;  %v3979_v58 = vld [vmem:[#allocation5 + $0x2c] ss:$16 sps:$4 sm:$0xff]  }
 0x679   :  { %4193 = vtanh.f32 %v5036_v32  ;;  %v5040_v6 = vadd.f32 %v2659_v61, %v2657_v5 }
 0x67a   :  { %4195 = vrcp.f32 %v2639_v59 }
 0x67b   :  { %4197 = vtanh.f32 %v5040_v6 }
 0x683   :  { %v4194_v29 = vpop.eup %4193 }
 0x684   :  { %v4196_v30 = vpop.eup %4195  ;;  %v2664_v50 = vmul.f32 %v4194_v29, %v4192_v24 }
 0x685   :  { %v4198_v34 = vpop.eup %4197 }
 0x686   :  { %v2665_v35 = vmul.f32 %v4198_v34, %v4196_v30 }
 0x688   :  { %v2666_v37 = vpack.c.bf16 %v2665_v35, %v2664_v50 }
 0x68a   :  { %3846 = vst [vmem:[%s5096_s6 + $0x28] sm:$0xff] %v2666_v37   ;;  %2921 = vmatmul.mubr.bf16.vlgmr.msra.gmra.mrb[56].mxu0 %v2666_v37  ;;  %2964 = vmatmul.mubr.bf16.vlgmr.msra.gmra.mrb[56].mxu1 %v2666_v37 }
 0x68b   :  { %3255 = vmatpush1.bf16.msra.mxu0 %v4977_v1  ;;  %3298 = vmatpush1.bf16.msra.mxu1 %v4979_v16  ;;  %v3977_v1 = vld [vmem:[#allocation5 + $0x28] ss:$16 sps:$4 sm:$0xff]   ;;  %v3982_v16 = vld [vmem:[#allocation5 + $0x4c] ss:$16 sps:$4 sm:$0xff]  }
 0x68c   :  { %3256 = vmatprep.subr.bf16.mxu0 %v4983_v3  ;;  %3286 = vmatprep.mubr.bf16.mxu0 %v5135_v15  ;;  %v3985_v3 = vld [vmem:[#allocation5 + $0x6c] ss:$16 sps:$4 sm:$0xff]  }
 0x68d   :  { %3329 = vmatprep.mubr.bf16.mxu1 %v5135_v15  ;;  %3299 = vmatprep.subr.bf16.mxu1 %v3979_v58  ;;  %v3980_v15 = vld [vmem:[#allocation5 + $0x48] ss:$16 sps:$4 sm:$0xff]  }
 0x68f   :  { %3257 = vmatpush1.bf16.msra.mxu0 %v4986_v53  ;;  %3300 = vmatpush1.bf16.msra.mxu1 %v3977_v1  ;;  %v3983_v53 = vld [vmem:[#allocation5 + $0x68] ss:$16 sps:$4 sm:$0xff]  }
 0x690   :  { %3258 = vmatprep.subr.bf16.mxu0 %v4991_v63  ;;  %3301 = vmatprep.subr.bf16.mxu1 %v3982_v16  ;;  %v3986_v63 = vld [vmem:[#allocation5 + $0x88] ss:$16 sps:$4 sm:$0xff]  }
 0x693   :  { %3259 = vmatpush1.bf16.msra.mxu0 %v4994_v19  ;;  %3302 = vmatpush1.bf16.msra.mxu1 %v3980_v15  ;;  %v3988_v19 = vld [vmem:[#allocation5 + $0x8c] ss:$16 sps:$4 sm:$0xff]  }
 0x694   :  { %3260 = vmatprep.subr.bf16.mxu0 %v4999_v52  ;;  %3303 = vmatprep.subr.bf16.mxu1 %v3985_v3  ;;  %v3989_v52 = vld [vmem:[#allocation5 + $0xa0] ss:$16 sps:$4 sm:$0xff]  }
 0x697   :  { %3261 = vmatpush1.bf16.msra.mxu0 %v5002_v9  ;;  %3304 = vmatpush1.bf16.msra.mxu1 %v3983_v53  ;;  %v3991_v9 = vld [vmem:[#allocation5 + $0xa4] ss:$16 sps:$4 sm:$0xff]  }
 0x698   :  { %3262 = vmatprep.subr.bf16.mxu0 %v5009_v56  ;;  %3305 = vmatprep.subr.bf16.mxu1 %v3988_v19  ;;  %v3997_v56 = vld [vmem:[#allocation5 + $0xc4] ss:$16 sps:$4 sm:$0xff]  }
 0x69b   :  { %3263 = vmatpush1.bf16.msra.mxu0 %v5007_v0  ;;  %3306 = vmatpush1.bf16.msra.mxu1 %v3986_v63  ;;  %v3992_v0 = vld [vmem:[#allocation5 + $0xa8] ss:$16 sps:$4 sm:$0xff]  }
 0x69c   :  { %3264 = vmatprep.subr.bf16.mxu0 %v3991_v9  ;;  %3307 = vmatprep.subr.bf16.mxu1 %v3994_v38 }
 0x69f   :  { %3265 = vmatpush1.bf16.msra.mxu0 %v3989_v52  ;;  %3308 = vmatpush1.bf16.msra.mxu1 %v3992_v0 }
 0x6a0   :  { %3266 = vmatprep.subr.bf16.mxu0 %v3997_v56  ;;  %3309 = vmatprep.subr.bf16.mxu1 %v4000_v40 }
 0x6a3   :  { %3267 = vmatpush1.bf16.msra.mxu0 %v3995_v39  ;;  %3310 = vmatpush1.bf16.msra.mxu1 %v3998_v44 }
 0x6a4   :  { %3268 = vmatprep.subr.bf16.mxu0 %v4003_v42  ;;  %3311 = vmatprep.subr.bf16.mxu1 %v4006_v31 }
 0x6a7   :  { %3269 = vmatpush1.bf16.msra.mxu0 %v4001_v18  ;;  %3312 = vmatpush1.bf16.msra.mxu1 %v4004_v48 }
 0x75d   :  { %v2922_v33 = vpop.f32.mrb[56].mxu0  ;;  %v2965_v4 = vpop.f32.mrb[56].mxu1 }
 0x75e   :  { %v2974_v14 = vadd.f32 %v2922_v33, %v2687_v27  ;;  %v2976_v28 = vadd.f32 %v2965_v4, %v2689_v43  ;;  %v2924_v21 = vpop.f32.mrb[57].mxu0  ;;  %v2967_v12 = vpop.f32.mrb[57].mxu1  ;;  %v5151_v43 = vld [vmem:[#allocation24_spill] sm:$0xff] }
 0x75f   :  { %v2975_v46 = vadd.f32 %v2924_v21, %v2688_v23  ;;  %v2977_v11 = vadd.f32 %v2967_v12, %v2690_v55  ;;  %v2926_v36 = vpop.f32.mrb[58].mxu0  ;;  %v2969_v62 = vpop.f32.mrb[58].mxu1  ;;  %v3055_v33 = vunpack.c.l.bf16 %v5151_v43  ;;  %v5152_v23 = vld [vmem:[#allocation23_spill] sm:$0xff]  ;;  %v5153_v55 = vld [vmem:[#allocation25_spill] sm:$0xff] }
 0x760   :  { %v3734_v10 = vmul.f32 -1.442695, %v2974_v14  ;;  %v2978_v8 = vadd.f32 %v2926_v36, %v2691_v25  ;;  %v2980_v51 = vadd.f32 %v2969_v62, %v2693_v26  ;;  %v2928_v45 = vpop.f32.mrb[59].mxu0  ;;  %v2971_v41 = vpop.f32.mrb[59].mxu1  ;;  %v3736_v20 = vmul.f32 -1.442695, %v2976_v28 }
 0x761   :  { %v3735_v54 = vmul.f32 -1.442695, %v2975_v46  ;;  %v2979_v47 = vadd.f32 %v2928_v45, %v2692_v13  ;;  %v2981_v60 = vadd.f32 %v2971_v41, %v2694_v2  ;;  %v3054_v57 = vunpack.c.l.bf16 %v5152_v23 }
 0x762   :  { %4199 = vpow2.f32 %v3734_v10  ;;  %v3737_v22 = vmul.f32 -1.442695, %v2978_v8  ;;  %v3739_v59 = vmul.f32 -1.442695, %v2980_v51  ;;  %v3056_v14 = vunpack.c.l.bf16 %v5153_v55 }
 0x763   :  { %v3738_v61 = vmul.f32 -1.442695, %v2979_v47  ;;  %4201 = vpow2.f32 %v3735_v54  ;;  %v3059_v46 = vunpack.c.h.bf16 %v5151_v43  ;;  %v3058_v2 = vunpack.c.h.bf16 %v5152_v23 }
 0x764   :  { %4203 = vpow2.f32 %v3737_v22  ;;  %v3060_v10 = vunpack.c.h.bf16 %v5153_v55 }
 0x765   :  { %4205 = vpow2.f32 %v3738_v61 }
 0x766   :  { %4207 = vtanh.f32 %v2977_v11 }
 0x767   :  { %4209 = vpow2.f32 %v3736_v20 }
 0x768   :  { %4211 = vpow2.f32 %v3739_v59 }
 0x76c   :  { %v4200_v5 = vpop.eup %4199 }
 0x76d   :  { %v3000_v24 = vadd.f32 1.0, %v4200_v5  ;;  %v4202_v29 = vpop.eup %4201 }
 0x76e   :  { %v4204_v30 = vpop.eup %4203  ;;  %v3001_v34 = vadd.f32 1.0, %v4202_v29 }
 0x76f   :  { %4213 = vrcp.f32 %v3000_v24  ;;  %v3003_v50 = vadd.f32 1.0, %v4204_v30  ;;  %v4206_v35 = vpop.eup %4205 }
 0x770   :  { %4215 = vtanh.f32 %v2981_v60  ;;  %v3004_v37 = vadd.f32 1.0, %v4206_v35  ;;  %v4208_v58 = vpop.eup %4207 }
 0x771   :  { %4217 = vrcp.f32 %v3001_v34  ;;  %v4210_v1 = vpop.eup %4209 }
 0x772   :  { %4219 = vrcp.f32 %v3003_v50  ;;  %v4212_v16 = vpop.eup %4211  ;;  %v3002_v52 = vadd.f32 1.0, %v4210_v1 }
 0x773   :  { %4221 = vrcp.f32 %v3004_v37  ;;  %v3005_v39 = vadd.f32 1.0, %v4212_v16 }
 0x774   :  { %4223 = vrcp.f32 %v3002_v52 }
 0x779   :  { %v4214_v15 = vpop.eup %4213 }
 0x77a   :  { %v4216_v3 = vpop.eup %4215  ;;  %v3024_v53 = vmul.f32 %v4214_v15, %v4208_v58 }
 0x77b   :  { %v4218_v63 = vpop.eup %4217 }
 0x77c   :  { %v4220_v19 = vpop.eup %4219  ;;  %v3022_v9 = vmul.f32 %v4218_v63, %v5036_v32 }
 0x77d   :  { %v3025_v38 = vmul.f32 %v4220_v19, %v4216_v3  ;;  %v4222_v56 = vpop.eup %4221 }
 0x77e   :  { %v5067_v0 = vadd.f32 %v3024_v53, %v3022_v9  ;;  %v3023_v40 = vmul.f32 %v4222_v56, %v5040_v6  ;;  %v4224_v44 = vpop.eup %4223  ;;  %v5150_v6 = vld [vmem:[#allocation22_spill] sm:$0xff] }
 0x77f   :  { %v3053_v7 = vunpack.c.l.bf16 %v5150_v6  ;;  %v3057_v26 = vunpack.c.h.bf16 %v5150_v6 }
 0x780   :  { %4225 = vtanh.f32 %v5067_v0  ;;  %v5071_v42 = vadd.f32 %v3025_v38, %v3023_v40 }
 0x781   :  { %4227 = vrcp.f32 %v3005_v39 }
 0x782   :  { %4229 = vtanh.f32 %v5071_v42 }
 0x78a   :  { %v4226_v18 = vpop.eup %4225 }
 0x78b   :  { %v4228_v31 = vpop.eup %4227  ;;  %v3030_v32 = vmul.f32 %v4226_v18, %v4224_v44 }
 0x78c   :  { %v4230_v48 = vpop.eup %4229 }
 0x78d   :  { %v3031_v49 = vmul.f32 %v4230_v48, %v4228_v31 }
 0x78f   :  { %v3032_v27 = vpack.c.bf16 %v3031_v49, %v3030_v32 }
 0x791   :  { %3847 = vst [vmem:[%s5096_s6 + $0x30] sm:$0xff] %v3032_v27   ;;  %3287 = vmatmul.mubr.bf16.vlgmr.msra.gmra.mrb[60].mxu0 %v3032_v27  ;;  %3330 = vmatmul.mubr.bf16.vlgmr.msra.gmra.mrb[60].mxu1 %v3032_v27 }
 0x864   :  { %v3288_v4 = vpop.f32.mrb[60].mxu0  ;;  %v3331_v17 = vpop.f32.mrb[60].mxu1 }
 0x865   :  { %v3340_v28 = vadd.f32 %v3288_v4, %v3053_v7  ;;  %v3342_v21 = vadd.f32 %v3331_v17, %v3055_v33  ;;  %v3290_v12 = vpop.f32.mrb[61].mxu0  ;;  %v3333_v25 = vpop.f32.mrb[61].mxu1 }
 0x866   :  { %v3341_v11 = vadd.f32 %v3290_v12, %v3054_v57  ;;  %v3343_v36 = vadd.f32 %v3333_v25, %v3056_v14  ;;  %v3292_v62 = vpop.f32.mrb[62].mxu0  ;;  %v3335_v13 = vpop.f32.mrb[62].mxu1 }
 0x867   :  { %v3776_v8 = vmul.f32 -1.442695, %v3340_v28  ;;  %v3344_v51 = vadd.f32 %v3292_v62, %v3057_v26  ;;  %v3346_v45 = vadd.f32 %v3335_v13, %v3059_v46  ;;  %v3294_v41 = vpop.f32.mrb[63].mxu0  ;;  %v3337_v54 = vpop.f32.mrb[63].mxu1  ;;  %v3778_v59 = vmul.f32 -1.442695, %v3342_v21 }
 0x868   :  { %v3777_v47 = vmul.f32 -1.442695, %v3341_v11  ;;  %v3345_v60 = vadd.f32 %v3294_v41, %v3058_v2  ;;  %v3347_v22 = vadd.f32 %v3337_v54, %v3060_v10 }
 0x869   :  { %4231 = vpow2.f32 %v3776_v8  ;;  %v3779_v61 = vmul.f32 -1.442695, %v3344_v51  ;;  %v3781_v5 = vmul.f32 -1.442695, %v3346_v45 }
 0x86a   :  { %v3780_v20 = vmul.f32 -1.442695, %v3345_v60  ;;  %4233 = vpow2.f32 %v3777_v47 }
 0x86b   :  { %4235 = vpow2.f32 %v3779_v61 }
 0x86c   :  { %4237 = vpow2.f32 %v3780_v20 }
 0x86d   :  { %4239 = vtanh.f32 %v3343_v36 }
 0x86e   :  { %4241 = vpow2.f32 %v3778_v59 }
 0x86f   :  { %4243 = vpow2.f32 %v3781_v5 }
 0x873   :  { %v4232_v24 = vpop.eup %4231 }
 0x874   :  { %v3366_v29 = vadd.f32 1.0, %v4232_v24  ;;  %v4234_v30 = vpop.eup %4233 }
 0x875   :  { %v4236_v34 = vpop.eup %4235  ;;  %v3367_v50 = vadd.f32 1.0, %v4234_v30 }
 0x876   :  { %4245 = vrcp.f32 %v3366_v29  ;;  %v3369_v35 = vadd.f32 1.0, %v4236_v34  ;;  %v4238_v37 = vpop.eup %4237 }
 0x877   :  { %4247 = vtanh.f32 %v3347_v22  ;;  %v3370_v58 = vadd.f32 1.0, %v4238_v37  ;;  %v4240_v1 = vpop.eup %4239 }
 0x878   :  { %4249 = vrcp.f32 %v3367_v50  ;;  %v4242_v16 = vpop.eup %4241 }
 0x879   :  { %4251 = vrcp.f32 %v3369_v35  ;;  %v4244_v15 = vpop.eup %4243  ;;  %v3368_v52 = vadd.f32 1.0, %v4242_v16 }
 0x87a   :  { %4253 = vrcp.f32 %v3370_v58  ;;  %v3371_v44 = vadd.f32 1.0, %v4244_v15 }
 0x87b   :  { %4255 = vrcp.f32 %v3368_v52 }
 0x880   :  { %v4246_v3 = vpop.eup %4245 }
 0x881   :  { %v4248_v53 = vpop.eup %4247  ;;  %v3390_v63 = vmul.f32 %v4246_v3, %v4240_v1 }
 0x882   :  { %v4250_v19 = vpop.eup %4249 }
 0x883   :  { %v4252_v9 = vpop.eup %4251  ;;  %v3388_v38 = vmul.f32 %v4250_v19, %v5067_v0 }
 0x884   :  { %v3391_v56 = vmul.f32 %v4252_v9, %v4248_v53  ;;  %v4254_v39 = vpop.eup %4253 }
 0x885   :  { %v3392_v40 = vadd.f32 %v3390_v63, %v3388_v38  ;;  %v3389_v18 = vmul.f32 %v4254_v39, %v5071_v42  ;;  %v4256_v48 = vpop.eup %4255 }
 0x887   :  { %4257 = vtanh.f32 %v3392_v40  ;;  %v3393_v31 = vadd.f32 %v3391_v56, %v3389_v18 }
 0x888   :  { %4259 = vrcp.f32 %v3371_v44 }
 0x889   :  { %4261 = vtanh.f32 %v3393_v31 }
 0x891   :  { %v4258_v32 = vpop.eup %4257 }
 0x892   :  { %v3396_v49 = vmul.f32 %v4258_v32, %v4256_v48  ;;  %v4260_v27 = vpop.eup %4259 }
 0x893   :  { %v4262_v6 = vpop.eup %4261 }
 0x894   :  { %v3397_v7 = vmul.f32 %v4262_v6, %v4260_v27 }
 0x896   :  { %v3398_v43 = vpack.c.bf16 %v3397_v7, %v3396_v49 }
 0x898   :  { %3848 = vst [vmem:[%s5096_s6 + $0x38] sm:$0xff] %v3398_v43  }
 0x899   :  { %3416 = vsyncpa [#allocation6], 1 }

// kernel: lstm_model_forward.3
= control target key start
LH: loop header
LB: loop body
LE: loop exit
PB: predicated region body
PF: predicated region fallthrough
CT: control target
= control target key end

     0   :  { %v5642_v1 = vmov 0   ;;  %vm4451_vm0 = vmmov 0   ;;  %vm3584_vm1 = vcmask 31744   ;;  %s5633_s1 = inlined_call_operand.vmem [shape: bf16[128,512], index: 1, kind: input, shape index: {}]   ;;  %s5634_s0 = inlined_call_operand.vmem [shape: bf16[128,128], index: 0, kind: input, shape index: {}]   ;;  %s5635_s2 = inlined_call_operand.vmem [shape: bf16[128,512], index: 2, kind: input, shape index: {}]   ;;  %s5636_s4 = inlined_call_operand.vmem [shape: f32[1,128], index: 4, kind: input, shape index: {}]   ;;  %s5637_s3 = inlined_call_operand.vmem [shape: f32[1,512], index: 3, kind: input, shape index: {}]   ;;  %s5638_s5 = inlined_call_operand.vmem [shape: f32[1,128], index: 5, kind: input, shape index: {}]   ;;  %s5639_s6 = inlined_call_operand.vmem [shape: bf16[128,4], index: 6, kind: input, shape index: {}]   ;;  %s5640_s7 = inlined_call_operand.vmem [shape: f32[1,4], index: 7, kind: input, shape index: {}]   ;;  %s5641_s8 = inlined_call_operand.vmem [shape: f32[16,4], index: 8, kind: output, shape index: {}]  }
   0x1   :  { %v3985_v0 = vld [vmem:[%s5633_s1 + $0x4] ss:$16 sps:$4 sm:$0xff]   ;;  %362 = vmatprep.mubr.bf16.mxu0 %v5642_v1  ;;  %475 = vmatprep.mubr.bf16.mxu1 %v5642_v1  ;;  %v3987_v2 = vld [vmem:[%s5633_s1 + $0xc] ss:$16 sps:$4 sm:$0xff]   ;;  %v3989_v3 = vld [vmem:[%s5633_s1] ss:$16 sps:$4 sm:$0xff]  }
   0x2   :  { %330 = vmatprep.subr.bf16.mxu0 %v3985_v0  ;;  %v3990_v4 = vld [vmem:[%s5633_s1 + $0x8] ss:$16 sps:$4 sm:$0xff]   ;;  %443 = vmatprep.subr.bf16.mxu1 %v3987_v2  ;;  %v3991_v5 = vld [vmem:[%s5633_s1 + $0x24] ss:$16 sps:$4 sm:$0xff]   ;;  %v3993_v6 = vld [vmem:[%s5633_s1 + $0x2c] ss:$16 sps:$4 sm:$0xff]  }
   0x3   :  { %331 = vmatpush1.bf16.msra.mxu0 %v3989_v3  ;;  %444 = vmatpush1.bf16.msra.mxu1 %v3990_v4  ;;  %v3995_v7 = vld [vmem:[%s5633_s1 + $0x20] ss:$16 sps:$4 sm:$0xff]   ;;  %v3996_v8 = vld [vmem:[%s5633_s1 + $0x28] ss:$16 sps:$4 sm:$0xff]   ;;  %v3997_v9 = vld [vmem:[%s5633_s1 + $0x44] ss:$16 sps:$4 sm:$0xff]  }
   0x4   :  { %332 = vmatprep.subr.bf16.mxu0 %v3991_v5  ;;  %445 = vmatprep.subr.bf16.mxu1 %v3993_v6  ;;  %v3999_v10 = vld [vmem:[%s5633_s1 + $0x4c] ss:$16 sps:$4 sm:$0xff]   ;;  %v4001_v11 = vld [vmem:[%s5633_s1 + $0x40] ss:$16 sps:$4 sm:$0xff]   ;;  %v4002_v12 = vld [vmem:[%s5633_s1 + $0x48] ss:$16 sps:$4 sm:$0xff]  }
   0x5   :  { %v4003_v13 = vld [vmem:[%s5633_s1 + $0x64] ss:$16 sps:$4 sm:$0xff]   ;;  %v4005_v14 = vld [vmem:[%s5633_s1 + $0x6c] ss:$16 sps:$4 sm:$0xff]   ;;  %v4007_v15 = vld [vmem:[%s5633_s1 + $0x60] ss:$16 sps:$4 sm:$0xff]  }
   0x6   :  { %v4008_v16 = vld [vmem:[%s5633_s1 + $0x68] ss:$16 sps:$4 sm:$0xff]   ;;  %v4009_v17 = vld [vmem:[%s5633_s1 + $0x84] ss:$16 sps:$4 sm:$0xff]   ;;  %v4011_v18 = vld [vmem:[%s5633_s1 + $0x8c] ss:$16 sps:$4 sm:$0xff]  }
   0x7   :  { %333 = vmatpush1.bf16.msra.mxu0 %v3995_v7  ;;  %446 = vmatpush1.bf16.msra.mxu1 %v3996_v8  ;;  %v4013_v19 = vld [vmem:[%s5633_s1 + $0x80] ss:$16 sps:$4 sm:$0xff]   ;;  %v4014_v20 = vld [vmem:[%s5633_s1 + $0x88] ss:$16 sps:$4 sm:$0xff]   ;;  %v4015_v21 = vld [vmem:[%s5633_s1 + $0xa4] ss:$16 sps:$4 sm:$0xff]  }
   0x8   :  { %334 = vmatprep.subr.bf16.mxu0 %v3997_v9  ;;  %447 = vmatprep.subr.bf16.mxu1 %v3999_v10  ;;  %v4017_v22 = vld [vmem:[%s5633_s1 + $0xac] ss:$16 sps:$4 sm:$0xff]   ;;  %v4019_v23 = vld [vmem:[%s5633_s1 + $0xa0] ss:$16 sps:$4 sm:$0xff]   ;;  %v4020_v24 = vld [vmem:[%s5633_s1 + $0xa8] ss:$16 sps:$4 sm:$0xff]  }
   0x9   :  { %v4021_v25 = vld [vmem:[%s5633_s1 + $0xc4] ss:$16 sps:$4 sm:$0xff]   ;;  %v4023_v26 = vld [vmem:[%s5633_s1 + $0xcc] ss:$16 sps:$4 sm:$0xff]   ;;  %v4025_v27 = vld [vmem:[%s5633_s1 + $0xc0] ss:$16 sps:$4 sm:$0xff]  }
   0xa   :  { %v4026_v28 = vld [vmem:[%s5633_s1 + $0xc8] ss:$16 sps:$4 sm:$0xff]   ;;  %v4027_v29 = vld [vmem:[%s5633_s1 + $0xe4] ss:$16 sps:$4 sm:$0xff]   ;;  %v4029_v30 = vld [vmem:[%s5633_s1 + $0xec] ss:$16 sps:$4 sm:$0xff]  }
   0xb   :  { %335 = vmatpush1.bf16.msra.mxu0 %v4001_v11  ;;  %448 = vmatpush1.bf16.msra.mxu1 %v4002_v12  ;;  %v4031_v31 = vld [vmem:[%s5633_s1 + $0xe0] ss:$16 sps:$4 sm:$0xff]   ;;  %v4032_v32 = vld [vmem:[%s5633_s1 + $0xe8] ss:$16 sps:$4 sm:$0xff]   ;;  %v4598_v33 = vld [vmem:[%s5635_s2 + $0x4] ss:$16 sps:$4 sm:$0xff]   ;;  %v102_v12 = vlaneseq }
   0xc   :  { %336 = vmatprep.subr.bf16.mxu0 %v4003_v13  ;;  %449 = vmatprep.subr.bf16.mxu1 %v4005_v14  ;;  %v4603_v34 = vld [vmem:[%s5635_s2 + $0xc] ss:$16 sps:$4 sm:$0xff]   ;;  %v4033_v35 = vld [vmem:[%s5634_s0] sm:$0xff]   ;;  %v4623_v38 = vld [vmem:[%s5635_s2 + $0x8] ss:$16 sps:$4 sm:$0xff]  }
   0xd   :  { %v4611_v36 = vld [vmem:[%s5635_s2] ss:$16 sps:$4 sm:$0xff]   ;;  %v4617_v37 = vld [vmem:[%s5635_s2 + $0x24] ss:$16 sps:$4 sm:$0xff]   ;;  %v4628_v39 = vld [vmem:[%s5635_s2 + $0x2c] ss:$16 sps:$4 sm:$0xff]  }
   0xe   :  { %v4635_v40 = vld [vmem:[%s5635_s2 + $0x20] ss:$16 sps:$4 sm:$0xff]   ;;  %v4642_v41 = vld [vmem:[%s5635_s2 + $0x44] ss:$16 sps:$4 sm:$0xff]   ;;  %v4648_v42 = vld [vmem:[%s5635_s2 + $0x28] ss:$16 sps:$4 sm:$0xff]  }
   0xf   :  { %337 = vmatpush1.bf16.msra.mxu0 %v4007_v15  ;;  %450 = vmatpush1.bf16.msra.mxu1 %v4008_v16  ;;  %v4037_v43 = vld [vmem:[%s5634_s0 + $0x8] sm:$0xff]   ;;  %v4658_v44 = vld [vmem:[%s5635_s2 + $0x40] ss:$16 sps:$4 sm:$0xff]   ;;  %v4664_v45 = vld [vmem:[%s5635_s2 + $0x64] ss:$16 sps:$4 sm:$0xff]   ;;  %v103_v13 = vshrl.u32 %v102_v12, 7 }
  0x10   :  { %338 = vmatprep.subr.bf16.mxu0 %v4009_v17  ;;  %451 = vmatprep.subr.bf16.mxu1 %v4011_v18  ;;  %v4669_v46 = vld [vmem:[%s5635_s2 + $0x4c] ss:$16 sps:$4 sm:$0xff]   ;;  %v4675_v47 = vld [vmem:[%s5635_s2 + $0x48] ss:$16 sps:$4 sm:$0xff]   ;;  %v4688_v49 = vld [vmem:[%s5635_s2 + $0x60] ss:$16 sps:$4 sm:$0xff]  }
  0x11   :  { %v4680_v48 = vld [vmem:[%s5635_s2 + $0x6c] ss:$16 sps:$4 sm:$0xff]   ;;  %v4694_v50 = vld [vmem:[%s5635_s2 + $0x84] ss:$16 sps:$4 sm:$0xff]   ;;  %v4701_v51 = vld [vmem:[%s5635_s2 + $0x68] ss:$16 sps:$4 sm:$0xff]  }
  0x12   :  { %v4044_v52 = vld [vmem:[%s5634_s0 + $0x10] sm:$0xff]   ;;  %v4716_v54 = vld [vmem:[%s5635_s2 + $0x8c] ss:$16 sps:$4 sm:$0xff]   ;;  %v4728_v56 = vld [vmem:[%s5635_s2 + $0x88] ss:$16 sps:$4 sm:$0xff]   ;;  %v112_v14 = vsub.s32 2, %v103_v13 }
  0x13   :  { %339 = vmatpush1.bf16.msra.mxu0 %v4013_v19  ;;  %452 = vmatpush1.bf16.msra.mxu1 %v4014_v20  ;;  %v4710_v53 = vld [vmem:[%s5635_s2 + $0x80] ss:$16 sps:$4 sm:$0xff]   ;;  %v4722_v55 = vld [vmem:[%s5635_s2 + $0xa4] ss:$16 sps:$4 sm:$0xff]   ;;  %v4738_v58 = vld [vmem:[%s5635_s2 + $0xac] ss:$16 sps:$4 sm:$0xff]  }
  0x14   :  { %340 = vmatprep.subr.bf16.mxu0 %v4015_v21  ;;  %453 = vmatprep.subr.bf16.mxu1 %v4017_v22  ;;  %v4733_v57 = vld [vmem:[%s5635_s2 + $0xa0] ss:$16 sps:$4 sm:$0xff]   ;;  %v4745_v59 = vld [vmem:[%s5635_s2 + $0xc4] ss:$16 sps:$4 sm:$0xff]   ;;  %v4750_v60 = vld [vmem:[%s5635_s2 + $0xa8] ss:$16 sps:$4 sm:$0xff]  }
  0x15   :  { %v4051_v61 = vld [vmem:[%s5634_s0 + $0x18] sm:$0xff]   ;;  %v4762_v62 = vld [vmem:[%s5635_s2 + $0xc0] ss:$16 sps:$4 sm:$0xff]   ;;  %v4773_v0 = vld [vmem:[%s5635_s2 + $0xe4] ss:$16 sps:$4 sm:$0xff]   ;;  %v116_v15 = vsub.s32 3, %v103_v13 }
  0x16   :  { %v4768_v63 = vld [vmem:[%s5635_s2 + $0xcc] ss:$16 sps:$4 sm:$0xff]   ;;  %v4778_v2 = vld [vmem:[%s5635_s2 + $0xc8] ss:$16 sps:$4 sm:$0xff]   ;;  %v4791_v4 = vld [vmem:[%s5635_s2 + $0xe0] ss:$16 sps:$4 sm:$0xff]  }
  0x17   :  { %341 = vmatpush1.bf16.msra.mxu0 %v4019_v23  ;;  %454 = vmatpush1.bf16.msra.mxu1 %v4020_v24  ;;  %v4784_v3 = vld [vmem:[%s5635_s2 + $0xec] ss:$16 sps:$4 sm:$0xff]   ;;  %v4798_v5 = vld [vmem:[%s5635_s2 + $0xe8] ss:$16 sps:$4 sm:$0xff]   ;;  %v4058_v6 = vld [vmem:[%s5634_s0 + $0x20] sm:$0xff]   ;;  %v104_v16 = vsub.s32 0, %v103_v13 }
  0x18   :  { %342 = vmatprep.subr.bf16.mxu0 %v4021_v25  ;;  %455 = vmatprep.subr.bf16.mxu1 %v4023_v26  ;;  %v4065_v7 = vld [vmem:[%s5634_s0 + $0x28] sm:$0xff]   ;;  %v4072_v8 = vld [vmem:[%s5634_s0 + $0x30] sm:$0xff]   ;;  %v4079_v9 = vld [vmem:[%s5634_s0 + $0x38] sm:$0xff]   ;;  %v108_v18 = vsub.s32 1, %v103_v13 }
  0x19   :  { %v3598_v10 = vld [vmem:[%s5636_s4] ss:$0 sm:$0xff] }
  0x1a   :  { %v41_v11 = vpack.c.bf16 %v3598_v10, %v3598_v10  ;;  %v100_v17 = vld [vmem:[%s5637_s3] sm:$0xf] }
  0x1b   :  { %343 = vmatpush1.bf16.msra.mxu0 %v4025_v27  ;;  %456 = vmatpush1.bf16.msra.mxu1 %v4026_v28  ;;  %v4867_v19 = vrot.slane %v100_v17, %v112_v14  ;;  %v4869_v20 = vrot.slane %v100_v17, %v116_v15  ;;  %v4871_v21 = vrot.slane %v100_v17, %v104_v16 }
  0x1c   :  { %344 = vmatprep.subr.bf16.mxu0 %v4027_v29  ;;  %457 = vmatprep.subr.bf16.mxu1 %v4029_v30  ;;  %v4873_v23 = vrot.slane %v100_v17, %v108_v18 }
  0x1f   :  { %345 = vmatpush1.bf16.msra.mxu0 %v4031_v31  ;;  %458 = vmatpush1.bf16.msra.mxu1 %v4032_v32 }
  0x20   :  { %828 = vmatprep.subr.bf16.mxu0 %v4598_v33  ;;  %871 = vmatprep.subr.bf16.mxu1 %v4603_v34 }
  0x22   :  { %363 = vmatmul.mubr.bf16.vlgmr.msra.gmra.mrb[0].mxu0 %v4033_v35  ;;  %476 = vmatmul.mubr.bf16.vlgmr.msra.gmra.mrb[0].mxu1 %v4033_v35 }
  0x23   :  { %829 = vmatpush1.bf16.msra.mxu0 %v4611_v36  ;;  %372 = vmatprep.mubr.bf16.mxu0 %v5642_v1 }
  0x24   :  { %485 = vmatprep.mubr.bf16.mxu1 %v5642_v1  ;;  %830 = vmatprep.subr.bf16.mxu0 %v4617_v37 }
  0x25   :  { %872 = vmatpush1.bf16.msra.mxu1 %v4623_v38 }
  0x26   :  { %873 = vmatprep.subr.bf16.mxu1 %v4628_v39 }
  0x27   :  { %831 = vmatpush1.bf16.msra.mxu0 %v4635_v40 }
  0x28   :  { %832 = vmatprep.subr.bf16.mxu0 %v4642_v41 }
  0x29   :  { %874 = vmatpush1.bf16.msra.mxu1 %v4648_v42 }
  0x2a   :  { %373 = vmatmul.mubr.bf16.gmra.mrb[4].mxu0 %v4037_v43  ;;  %486 = vmatmul.mubr.bf16.gmra.mrb[4].mxu1 %v4037_v43 }
  0x2b   :  { %382 = vmatprep.mubr.bf16.mxu0 %v5642_v1  ;;  %495 = vmatprep.mubr.bf16.mxu1 %v5642_v1 }
  0x2c   :  { %833 = vmatpush1.bf16.msra.mxu0 %v4658_v44  ;;  %875 = vmatprep.subr.bf16.mxu1 %v4669_v46 }
  0x2d   :  { %834 = vmatprep.subr.bf16.mxu0 %v4664_v45  ;;  %876 = vmatpush1.bf16.msra.mxu1 %v4675_v47 }
  0x2e   :  { %877 = vmatprep.subr.bf16.mxu1 %v4680_v48 }
  0x30   :  { %835 = vmatpush1.bf16.msra.mxu0 %v4688_v49 }
  0x31   :  { %836 = vmatprep.subr.bf16.mxu0 %v4694_v50  ;;  %878 = vmatpush1.bf16.msra.mxu1 %v4701_v51 }
  0x32   :  { %383 = vmatmul.mubr.bf16.gmra.mrb[8].mxu0 %v4044_v52  ;;  %496 = vmatmul.mubr.bf16.gmra.mrb[8].mxu1 %v4044_v52 }
  0x33   :  { %392 = vmatprep.mubr.bf16.mxu0 %v5642_v1  ;;  %505 = vmatprep.mubr.bf16.mxu1 %v5642_v1 }
  0x34   :  { %837 = vmatpush1.bf16.msra.mxu0 %v4710_v53  ;;  %879 = vmatprep.subr.bf16.mxu1 %v4716_v54 }
  0x35   :  { %838 = vmatprep.subr.bf16.mxu0 %v4722_v55  ;;  %880 = vmatpush1.bf16.msra.mxu1 %v4728_v56 }
  0x36   :  { %881 = vmatprep.subr.bf16.mxu1 %v4738_v58 }
  0x38   :  { %839 = vmatpush1.bf16.msra.mxu0 %v4733_v57 }
  0x39   :  { %840 = vmatprep.subr.bf16.mxu0 %v4745_v59  ;;  %882 = vmatpush1.bf16.msra.mxu1 %v4750_v60 }
  0x3a   :  { %393 = vmatmul.mubr.bf16.gmra.mrb[12].mxu0 %v4051_v61  ;;  %506 = vmatmul.mubr.bf16.gmra.mrb[12].mxu1 %v4051_v61 }
  0x3b   :  { %402 = vmatprep.mubr.bf16.mxu0 %v5642_v1  ;;  %515 = vmatprep.mubr.bf16.mxu1 %v5642_v1 }
  0x3c   :  { %841 = vmatpush1.bf16.msra.mxu0 %v4762_v62  ;;  %883 = vmatprep.subr.bf16.mxu1 %v4768_v63 }
  0x3d   :  { %842 = vmatprep.subr.bf16.mxu0 %v4773_v0  ;;  %884 = vmatpush1.bf16.msra.mxu1 %v4778_v2 }
  0x3e   :  { %885 = vmatprep.subr.bf16.mxu1 %v4784_v3 }
  0x40   :  { %843 = vmatpush1.bf16.msra.mxu0 %v4791_v4 }
  0x41   :  { %886 = vmatpush1.bf16.msra.mxu1 %v4798_v5  ;;  %1184 = vmatprep.subr.bf16.mxu0 %v4598_v33 }
  0x42   :  { %403 = vmatmul.mubr.bf16.gmra.mrb[16].mxu0 %v4058_v6  ;;  %516 = vmatmul.mubr.bf16.gmra.mrb[16].mxu1 %v4058_v6 }
  0x43   :  { %412 = vmatprep.mubr.bf16.mxu0 %v5642_v1  ;;  %525 = vmatprep.mubr.bf16.mxu1 %v5642_v1 }
  0x44   :  { %1227 = vmatprep.subr.bf16.mxu1 %v4603_v34 }
  0x4a   :  { %413 = vmatmul.mubr.bf16.gmra.mrb[20].mxu0 %v4065_v7  ;;  %526 = vmatmul.mubr.bf16.gmra.mrb[20].mxu1 %v4065_v7 }
  0x4b   :  { %422 = vmatprep.mubr.bf16.mxu0 %v5642_v1  ;;  %535 = vmatprep.mubr.bf16.mxu1 %v5642_v1 }
  0x52   :  { %423 = vmatmul.mubr.bf16.gmra.mrb[24].mxu0 %v4072_v8  ;;  %536 = vmatmul.mubr.bf16.gmra.mrb[24].mxu1 %v4072_v8 }
  0x53   :  { %432 = vmatprep.mubr.bf16.mxu0 %v5642_v1  ;;  %545 = vmatprep.mubr.bf16.mxu1 %v5642_v1 }
  0x5a   :  { %433 = vmatmul.mubr.bf16.gmra.mrb[28].mxu0 %v4079_v9  ;;  %546 = vmatmul.mubr.bf16.gmra.mrb[28].mxu1 %v4079_v9 }
  0x5b   :  { %860 = vmatprep.mubr.bf16.mxu0 %v5642_v1  ;;  %903 = vmatprep.mubr.bf16.mxu1 %v5642_v1 }
  0x62   :  { %861 = vmatmul.mubr.bf16.vlgmr.msra.gmra.mrb[32].mxu0 %v41_v11  ;;  %904 = vmatmul.mubr.bf16.vlgmr.msra.gmra.mrb[32].mxu1 %v41_v11 }
  0x63   :  { %1185 = vmatpush1.bf16.msra.mxu0 %v4611_v36  ;;  %1228 = vmatpush1.bf16.msra.mxu1 %v4623_v38 }
  0x64   :  { %1186 = vmatprep.subr.bf16.mxu0 %v4617_v37  ;;  %1229 = vmatprep.subr.bf16.mxu1 %v4628_v39 }
  0x65   :  { %1216 = vmatprep.mubr.bf16.mxu0 %v5642_v1  ;;  %1259 = vmatprep.mubr.bf16.mxu1 %v5642_v1 }
  0x67   :  { %1187 = vmatpush1.bf16.msra.mxu0 %v4635_v40  ;;  %1230 = vmatpush1.bf16.msra.mxu1 %v4648_v42 }
  0x68   :  { %1188 = vmatprep.subr.bf16.mxu0 %v4642_v41  ;;  %1231 = vmatprep.subr.bf16.mxu1 %v4669_v46 }
  0x6b   :  { %1189 = vmatpush1.bf16.msra.mxu0 %v4658_v44  ;;  %1232 = vmatpush1.bf16.msra.mxu1 %v4675_v47 }
  0x6c   :  { %1190 = vmatprep.subr.bf16.mxu0 %v4664_v45  ;;  %1233 = vmatprep.subr.bf16.mxu1 %v4680_v48 }
  0x6f   :  { %1191 = vmatpush1.bf16.msra.mxu0 %v4688_v49  ;;  %1234 = vmatpush1.bf16.msra.mxu1 %v4701_v51 }
  0x70   :  { %1192 = vmatprep.subr.bf16.mxu0 %v4694_v50  ;;  %1235 = vmatprep.subr.bf16.mxu1 %v4716_v54 }
  0x73   :  { %1193 = vmatpush1.bf16.msra.mxu0 %v4710_v53  ;;  %1236 = vmatpush1.bf16.msra.mxu1 %v4728_v56 }
  0x74   :  { %1194 = vmatprep.subr.bf16.mxu0 %v4722_v55  ;;  %1237 = vmatprep.subr.bf16.mxu1 %v4738_v58 }
  0x77   :  { %1195 = vmatpush1.bf16.msra.mxu0 %v4733_v57  ;;  %1238 = vmatpush1.bf16.msra.mxu1 %v4750_v60 }
  0x78   :  { %1196 = vmatprep.subr.bf16.mxu0 %v4745_v59  ;;  %1239 = vmatprep.subr.bf16.mxu1 %v4768_v63 }
  0x7b   :  { %1197 = vmatpush1.bf16.msra.mxu0 %v4762_v62  ;;  %1240 = vmatpush1.bf16.msra.mxu1 %v4778_v2 }
  0x7c   :  { %1198 = vmatprep.subr.bf16.mxu0 %v4773_v0  ;;  %1241 = vmatprep.subr.bf16.mxu1 %v4784_v3 }
  0x7f   :  { %1199 = vmatpush1.bf16.msra.mxu0 %v4791_v4  ;;  %1242 = vmatpush1.bf16.msra.mxu1 %v4798_v5 }
  0xf5   :  { %v364_v22 = vpop.f32.mrb[0].mxu0  ;;  %v477_v24 = vpop.f32.mrb[0].mxu1 }
  0xf6   :  { %v366_v25 = vpop.f32.mrb[1].mxu0  ;;  %v478_v26 = vadd.f32 %v477_v24, %v4867_v19  ;;  %v479_v27 = vpop.f32.mrb[1].mxu1  ;;  %v365_v31 = vadd.f32 %v364_v22, %v4871_v21 }
  0xf7   :  { %v368_v28 = vpop.f32.mrb[2].mxu0  ;;  %v480_v29 = vadd.f32 %v479_v27, %v4869_v20  ;;  %v481_v30 = vpop.f32.mrb[2].mxu1  ;;  %v367_v36 = vadd.f32 %v366_v25, %v4873_v23 }
  0xf8   :  { %v369_v32 = vadd.f32 %v368_v28, %v4871_v21  ;;  %v370_v33 = vpop.f32.mrb[3].mxu0  ;;  %v482_v34 = vadd.f32 %v481_v30, %v4867_v19  ;;  %v483_v35 = vpop.f32.mrb[3].mxu1 }
  0xf9   :  { %v371_v37 = vadd.f32 %v370_v33, %v4873_v23  ;;  %v484_v38 = vadd.f32 %v483_v35, %v4869_v20 }
  0xfa   :  { %v4883_v39 = vpack.c.bf16 %v369_v32, %v365_v31  ;;  %v4885_v40 = vpack.c.bf16 %v482_v34, %v478_v26 }
  0xfb   :  { %v4887_v41 = vpack.c.bf16 %v371_v37, %v367_v36  ;;  %v4889_v42 = vpack.c.bf16 %v484_v38, %v480_v29 }
  0xfd   :  { %v374_v43 = vpop.f32.mrb[4].mxu0  ;;  %v487_v44 = vpop.f32.mrb[4].mxu1 }
  0xfe   :  { %v375_v45 = vadd.f32 %v374_v43, %v4871_v21  ;;  %v376_v46 = vpop.f32.mrb[5].mxu0  ;;  %v488_v47 = vadd.f32 %v487_v44, %v4867_v19  ;;  %v489_v49 = vpop.f32.mrb[5].mxu1 }
  0xff   :  { %v377_v50 = vadd.f32 %v376_v46, %v4873_v23  ;;  %v378_v52 = vpop.f32.mrb[6].mxu0  ;;  %v490_v53 = vadd.f32 %v489_v49, %v4869_v20  ;;  %v491_v55 = vpop.f32.mrb[6].mxu1 }
 0x100   :  { %v379_v57 = vadd.f32 %v378_v52, %v4871_v21  ;;  %v380_v61 = vpop.f32.mrb[7].mxu0  ;;  %v492_v6 = vadd.f32 %v491_v55, %v4867_v19  ;;  %v493_v7 = vpop.f32.mrb[7].mxu1 }
 0x101   :  { %v381_v8 = vadd.f32 %v380_v61, %v4873_v23  ;;  %v494_v9 = vadd.f32 %v493_v7, %v4869_v20 }
 0x102   :  { %v4899_v10 = vpack.c.bf16 %v379_v57, %v375_v45  ;;  %v4901_v11 = vpack.c.bf16 %v492_v6, %v488_v47 }
 0x103   :  { %v4903_v12 = vpack.c.bf16 %v381_v8, %v377_v50  ;;  %v4905_v13 = vpack.c.bf16 %v494_v9, %v490_v53 }
 0x105   :  { %v384_v14 = vpop.f32.mrb[8].mxu0  ;;  %v497_v15 = vpop.f32.mrb[8].mxu1 }
 0x106   :  { %v385_v16 = vadd.f32 %v384_v14, %v4871_v21  ;;  %v386_v17 = vpop.f32.mrb[9].mxu0  ;;  %v498_v18 = vadd.f32 %v497_v15, %v4867_v19  ;;  %v499_v22 = vpop.f32.mrb[9].mxu1 }
 0x107   :  { %v387_v24 = vadd.f32 %v386_v17, %v4873_v23  ;;  %v388_v25 = vpop.f32.mrb[10].mxu0  ;;  %v500_v26 = vadd.f32 %v499_v22, %v4869_v20  ;;  %v501_v27 = vpop.f32.mrb[10].mxu1 }
 0x108   :  { %v389_v28 = vadd.f32 %v388_v25, %v4871_v21  ;;  %v390_v29 = vpop.f32.mrb[11].mxu0  ;;  %v502_v30 = vadd.f32 %v501_v27, %v4867_v19  ;;  %v503_v31 = vpop.f32.mrb[11].mxu1 }
 0x109   :  { %v391_v32 = vadd.f32 %v390_v29, %v4873_v23  ;;  %v504_v33 = vadd.f32 %v503_v31, %v4869_v20 }
 0x10a   :  { %v4915_v34 = vpack.c.bf16 %v389_v28, %v385_v16  ;;  %v4917_v35 = vpack.c.bf16 %v502_v30, %v498_v18 }
 0x10b   :  { %v4919_v36 = vpack.c.bf16 %v391_v32, %v387_v24  ;;  %v4921_v37 = vpack.c.bf16 %v504_v33, %v500_v26 }
 0x10d   :  { %v394_v38 = vpop.f32.mrb[12].mxu0  ;;  %v507_v43 = vpop.f32.mrb[12].mxu1 }
 0x10e   :  { %v395_v44 = vadd.f32 %v394_v38, %v4871_v21  ;;  %v396_v45 = vpop.f32.mrb[13].mxu0  ;;  %v508_v46 = vadd.f32 %v507_v43, %v4867_v19  ;;  %v509_v47 = vpop.f32.mrb[13].mxu1 }
 0x10f   :  { %v397_v49 = vadd.f32 %v396_v45, %v4873_v23  ;;  %v398_v50 = vpop.f32.mrb[14].mxu0  ;;  %v510_v52 = vadd.f32 %v509_v47, %v4869_v20  ;;  %v511_v53 = vpop.f32.mrb[14].mxu1 }
 0x110   :  { %v399_v55 = vadd.f32 %v398_v50, %v4871_v21  ;;  %v400_v57 = vpop.f32.mrb[15].mxu0  ;;  %v512_v61 = vadd.f32 %v511_v53, %v4867_v19  ;;  %v513_v6 = vpop.f32.mrb[15].mxu1 }
 0x111   :  { %v401_v7 = vadd.f32 %v400_v57, %v4873_v23  ;;  %v514_v8 = vadd.f32 %v513_v6, %v4869_v20 }
 0x112   :  { %v4931_v9 = vpack.c.bf16 %v399_v55, %v395_v44  ;;  %v4933_v14 = vpack.c.bf16 %v512_v61, %v508_v46 }
 0x113   :  { %v4935_v15 = vpack.c.bf16 %v401_v7, %v397_v49  ;;  %v4937_v16 = vpack.c.bf16 %v514_v8, %v510_v52 }
 0x115   :  { %5662 = vst [vmem:[#allocation5_spill] sm:$0xff] %v4935_v15  ;;  %5663 = vst [vmem:[#allocation6_spill] sm:$0xff] %v4937_v16  ;;  %v404_v17 = vpop.f32.mrb[16].mxu0  ;;  %v517_v18 = vpop.f32.mrb[16].mxu1 }
 0x116   :  { %v405_v22 = vadd.f32 %v404_v17, %v4871_v21  ;;  %v406_v24 = vpop.f32.mrb[17].mxu0  ;;  %v518_v25 = vadd.f32 %v517_v18, %v4867_v19  ;;  %v519_v26 = vpop.f32.mrb[17].mxu1 }
 0x117   :  { %v407_v27 = vadd.f32 %v406_v24, %v4873_v23  ;;  %v408_v28 = vpop.f32.mrb[18].mxu0  ;;  %v520_v29 = vadd.f32 %v519_v26, %v4869_v20  ;;  %v521_v30 = vpop.f32.mrb[18].mxu1 }
 0x118   :  { %v409_v31 = vadd.f32 %v408_v28, %v4871_v21  ;;  %v410_v32 = vpop.f32.mrb[19].mxu0  ;;  %v522_v33 = vadd.f32 %v521_v30, %v4867_v19  ;;  %v523_v38 = vpop.f32.mrb[19].mxu1 }
 0x119   :  { %v411_v43 = vadd.f32 %v410_v32, %v4873_v23  ;;  %v524_v44 = vadd.f32 %v523_v38, %v4869_v20 }
 0x11a   :  { %v4947_v45 = vpack.c.bf16 %v409_v31, %v405_v22  ;;  %v4949_v46 = vpack.c.bf16 %v522_v33, %v518_v25 }
 0x11b   :  { %v4951_v47 = vpack.c.bf16 %v411_v43, %v407_v27  ;;  %v4953_v49 = vpack.c.bf16 %v524_v44, %v520_v29 }
 0x11c   :  { %5664 = vst [vmem:[#allocation7_spill] sm:$0xff] %v4947_v45  ;;  %5665 = vst [vmem:[#allocation8_spill] sm:$0xff] %v4949_v46 }
 0x11d   :  { %5666 = vst [vmem:[#allocation9_spill] sm:$0xff] %v4951_v47  ;;  %5667 = vst [vmem:[#allocation10_spill] sm:$0xff] %v4953_v49  ;;  %v414_v50 = vpop.f32.mrb[20].mxu0  ;;  %v527_v52 = vpop.f32.mrb[20].mxu1  ;;  %v1346_v49 = vunpack.c.h.bf16 %v4921_v37 }
 0x11e   :  { %v415_v53 = vadd.f32 %v414_v50, %v4871_v21  ;;  %v416_v55 = vpop.f32.mrb[21].mxu0  ;;  %v528_v57 = vadd.f32 %v527_v52, %v4867_v19  ;;  %v529_v61 = vpop.f32.mrb[21].mxu1 }
 0x11f   :  { %v417_v6 = vadd.f32 %v416_v55, %v4873_v23  ;;  %v418_v7 = vpop.f32.mrb[22].mxu0  ;;  %v530_v8 = vadd.f32 %v529_v61, %v4869_v20  ;;  %v531_v17 = vpop.f32.mrb[22].mxu1 }
 0x120   :  { %v419_v18 = vadd.f32 %v418_v7, %v4871_v21  ;;  %v420_v22 = vpop.f32.mrb[23].mxu0  ;;  %v532_v24 = vadd.f32 %v531_v17, %v4867_v19  ;;  %v533_v25 = vpop.f32.mrb[23].mxu1 }
 0x121   :  { %v421_v26 = vadd.f32 %v420_v22, %v4873_v23  ;;  %v534_v27 = vadd.f32 %v533_v25, %v4869_v20 }
 0x122   :  { %v4963_v28 = vpack.c.bf16 %v419_v18, %v415_v53  ;;  %v4965_v29 = vpack.c.bf16 %v532_v24, %v528_v57 }
 0x123   :  { %v4967_v30 = vpack.c.bf16 %v421_v26, %v417_v6  ;;  %v4969_v31 = vpack.c.bf16 %v534_v27, %v530_v8 }
 0x124   :  { %5668 = vst [vmem:[#allocation11_spill] sm:$0xff] %v4963_v28  ;;  %5669 = vst [vmem:[#allocation12_spill] sm:$0xff] %v4965_v29  ;;  %v1344_v28 = vunpack.c.h.bf16 %v4919_v36 }
 0x125   :  { %5670 = vst [vmem:[#allocation13_spill] sm:$0xff] %v4967_v30  ;;  %5671 = vst [vmem:[#allocation14_spill] sm:$0xff] %v4969_v31  ;;  %v424_v32 = vpop.f32.mrb[24].mxu0  ;;  %v537_v33 = vpop.f32.mrb[24].mxu1 }
 0x126   :  { %v425_v38 = vadd.f32 %v424_v32, %v4871_v21  ;;  %v426_v43 = vpop.f32.mrb[25].mxu0  ;;  %v538_v44 = vadd.f32 %v537_v33, %v4867_v19  ;;  %v539_v50 = vpop.f32.mrb[25].mxu1 }
 0x127   :  { %v427_v52 = vadd.f32 %v426_v43, %v4873_v23  ;;  %v428_v55 = vpop.f32.mrb[26].mxu0  ;;  %v540_v53 = vadd.f32 %v539_v50, %v4869_v20  ;;  %v541_v61 = vpop.f32.mrb[26].mxu1 }
 0x128   :  { %v429_v57 = vadd.f32 %v428_v55, %v4871_v21  ;;  %v430_v6 = vpop.f32.mrb[27].mxu0  ;;  %v542_v7 = vadd.f32 %v541_v61, %v4867_v19  ;;  %v543_v8 = vpop.f32.mrb[27].mxu1 }
 0x129   :  { %v431_v17 = vadd.f32 %v430_v6, %v4873_v23  ;;  %v544_v18 = vadd.f32 %v543_v8, %v4869_v20 }
 0x12a   :  { %v4979_v22 = vpack.c.bf16 %v429_v57, %v425_v38  ;;  %v4981_v24 = vpack.c.bf16 %v542_v7, %v538_v44 }
 0x12b   :  { %v4983_v25 = vpack.c.bf16 %v431_v17, %v427_v52  ;;  %v4985_v26 = vpack.c.bf16 %v544_v18, %v540_v53 }
 0x12c   :  { %5672 = vst [vmem:[#allocation15_spill] sm:$0xff] %v4979_v22  ;;  %5673 = vst [vmem:[#allocation16_spill] sm:$0xff] %v4981_v24 }
 0x12d   :  { %5674 = vst [vmem:[#allocation17_spill] sm:$0xff] %v4983_v25  ;;  %5675 = vst [vmem:[#allocation18_spill] sm:$0xff] %v4985_v26  ;;  %v434_v27 = vpop.f32.mrb[28].mxu0  ;;  %v547_v32 = vpop.f32.mrb[28].mxu1 }
 0x12e   :  { %v435_v33 = vadd.f32 %v434_v27, %v4871_v21  ;;  %v436_v43 = vpop.f32.mrb[29].mxu0  ;;  %v548_v50 = vadd.f32 %v547_v32, %v4867_v19  ;;  %v549_v55 = vpop.f32.mrb[29].mxu1 }
 0x12f   :  { %v437_v61 = vadd.f32 %v436_v43, %v4873_v23  ;;  %v438_v6 = vpop.f32.mrb[30].mxu0  ;;  %v550_v38 = vadd.f32 %v549_v55, %v4869_v20  ;;  %v551_v57 = vpop.f32.mrb[30].mxu1  ;;  %v627_v55 = vunpack.c.l.bf16 %v4883_v39 }
 0x130   :  { %v439_v44 = vadd.f32 %v438_v6, %v4871_v21  ;;  %v440_v52 = vpop.f32.mrb[31].mxu0  ;;  %v552_v53 = vadd.f32 %v551_v57, %v4867_v19  ;;  %v553_v7 = vpop.f32.mrb[31].mxu1  ;;  %v629_v21 = vunpack.c.l.bf16 %v4885_v40  ;;  %v628_v19 = vunpack.c.l.bf16 %v4887_v41 }
 0x131   :  { %v441_v8 = vadd.f32 %v440_v52, %v4873_v23  ;;  %v554_v17 = vadd.f32 %v553_v7, %v4869_v20  ;;  %v630_v23 = vunpack.c.l.bf16 %v4889_v42 }
 0x132   :  { %v4995_v18 = vpack.c.bf16 %v439_v44, %v435_v33  ;;  %v4997_v27 = vpack.c.bf16 %v552_v53, %v548_v50  ;;  %v631_v50 = vunpack.c.h.bf16 %v4883_v39 }
 0x133   :  { %v4999_v32 = vpack.c.bf16 %v441_v8, %v437_v61  ;;  %v5001_v43 = vpack.c.bf16 %v554_v17, %v550_v38  ;;  %v633_v61 = vunpack.c.h.bf16 %v4885_v40  ;;  %v632_v8 = vunpack.c.h.bf16 %v4887_v41 }
 0x134   :  { %5676 = vst [vmem:[#allocation19_spill] sm:$0xff] %v4995_v18  ;;  %5677 = vst [vmem:[#allocation20_spill] sm:$0xff] %v4997_v27  ;;  %v634_v17 = vunpack.c.h.bf16 %v4889_v42 }
 0x135   :  { %5678 = vst [vmem:[#allocation21_spill] sm:$0xff] %v4999_v32  ;;  %5679 = vst [vmem:[#allocation22_spill] sm:$0xff] %v5001_v43  ;;  %v862_v6 = vpop.f32.mrb[32].mxu0  ;;  %v905_v1 = vpop.f32.mrb[32].mxu1 }
 0x136   :  { %v914_v57 = vadd.f32 %v862_v6, %v627_v55  ;;  %v916_v20 = vadd.f32 %v905_v1, %v629_v21  ;;  %v864_v33 = vpop.f32.mrb[33].mxu0  ;;  %v907_v44 = vpop.f32.mrb[33].mxu1 }
 0x137   :  { %v915_v38 = vadd.f32 %v864_v33, %v628_v19  ;;  %v917_v52 = vadd.f32 %v907_v44, %v630_v23  ;;  %v866_v53 = vpop.f32.mrb[34].mxu0  ;;  %v909_v7 = vpop.f32.mrb[34].mxu1 }
 0x138   :  { %v3672_v43 = vmul.f32 -1.442695, %v914_v57  ;;  %v918_v32 = vadd.f32 %v866_v53, %v631_v50  ;;  %v920_v27 = vadd.f32 %v909_v7, %v633_v61  ;;  %v868_v18 = vpop.f32.mrb[35].mxu0  ;;  %v911_v55 = vpop.f32.mrb[35].mxu1  ;;  %v3674_v40 = vmul.f32 -1.442695, %v916_v20 }
 0x139   :  { %v3673_v1 = vmul.f32 -1.442695, %v915_v38  ;;  %v919_v21 = vadd.f32 %v868_v18, %v632_v8  ;;  %v921_v6 = vadd.f32 %v911_v55, %v634_v17  ;;  %v3599_v50 = vld [vmem:[%s5638_s5] ss:$0 sm:$0xff] }
 0x13a   :  { %4193 = vpow2.f32 %v3672_v43  ;;  %v3675_v39 = vmul.f32 -1.442695, %v918_v32  ;;  %v3677_v19 = vmul.f32 -1.442695, %v920_v27 }
 0x13b   :  { %v3676_v26 = vmul.f32 -1.442695, %v919_v21  ;;  %4195 = vpow2.f32 %v3673_v1 }
 0x13c   :  { %4197 = vpow2.f32 %v3675_v39 }
 0x13d   :  { %4199 = vpow2.f32 %v3676_v26 }
 0x13e   :  { %4201 = vtanh.f32 %v917_v52 }
 0x13f   :  { %4203 = vpow2.f32 %v3674_v40 }
 0x140   :  { %4205 = vpow2.f32 %v3677_v19 }
 0x144   :  { %v4194_v23 = vpop.eup %4193 }
 0x145   :  { %v940_v41 = vadd.f32 1.0, %v4194_v23  ;;  %v4196_v42 = vpop.eup %4195 }
 0x146   :  { %v4198_v57 = vpop.eup %4197  ;;  %v941_v33 = vadd.f32 1.0, %v4196_v42 }
 0x147   :  { %4207 = vrcp.f32 %v940_v41  ;;  %v943_v44 = vadd.f32 1.0, %v4198_v57  ;;  %v4200_v18 = vpop.eup %4199 }
 0x148   :  { %4209 = vtanh.f32 %v921_v6  ;;  %v944_v32 = vadd.f32 1.0, %v4200_v18  ;;  %v4202_v43 = vpop.eup %4201  ;;  %v5025_v18 = vld [vmem:[%s5635_s2 + $0x4] ss:$16 sps:$4 sm:$0xff]  }
 0x149   :  { %4211 = vrcp.f32 %v941_v33  ;;  %v4204_v26 = vpop.eup %4203  ;;  %1540 = vmatprep.subr.bf16.mxu0 %v5025_v18 }
 0x14a   :  { %4213 = vrcp.f32 %v943_v44  ;;  %v4206_v20 = vpop.eup %4205  ;;  %v942_v7 = vadd.f32 1.0, %v4204_v26  ;;  %v5680_v44 = vmov 0   ;;  %v5040_v26 = vld [vmem:[%s5635_s2 + $0x8] ss:$16 sps:$4 sm:$0xff]  }
 0x14b   :  { %4215 = vrcp.f32 %v944_v32  ;;  %v945_v21 = vadd.f32 1.0, %v4206_v20  ;;  %v5030_v32 = vld [vmem:[%s5635_s2 + $0xc] ss:$16 sps:$4 sm:$0xff]   ;;  %v5049_v20 = vld [vmem:[%s5635_s2 + $0x24] ss:$16 sps:$4 sm:$0xff]  }
 0x14c   :  { %4217 = vrcp.f32 %v942_v7  ;;  %1583 = vmatprep.subr.bf16.mxu1 %v5030_v32  ;;  %v5088_v7 = vld [vmem:[%s5635_s2 + $0x48] ss:$16 sps:$4 sm:$0xff]  }
 0x151   :  { %v4208_v27 = vpop.eup %4207 }
 0x152   :  { %v4210_v61 = vpop.eup %4209  ;;  %v964_v38 = vmul.f32 %v4208_v27, %v4202_v43  ;;  %v5035_v43 = vld [vmem:[%s5635_s2] ss:$16 sps:$4 sm:$0xff]   ;;  %v5054_v27 = vld [vmem:[%s5635_s2 + $0x2c] ss:$16 sps:$4 sm:$0xff]  }
 0x153   :  { %v4212_v52 = vpop.eup %4211 }
 0x154   :  { %v4214_v53 = vpop.eup %4213  ;;  %v962_v8 = vmul.f32 %v4212_v52, %v3599_v50  ;;  %v5078_v52 = vld [vmem:[%s5635_s2 + $0x4c] ss:$16 sps:$4 sm:$0xff]  }
 0x155   :  { %v965_v17 = vmul.f32 %v4214_v53, %v4210_v61  ;;  %v4216_v55 = vpop.eup %4215  ;;  %v5064_v61 = vld [vmem:[%s5635_s2 + $0x28] ss:$16 sps:$4 sm:$0xff]   ;;  %v5083_v53 = vld [vmem:[%s5635_s2 + $0x40] ss:$16 sps:$4 sm:$0xff]  }
 0x156   :  { %v5014_v1 = vadd.f32 %v964_v38, %v962_v8  ;;  %v963_v6 = vmul.f32 %v4216_v55, %v3599_v50  ;;  %v4218_v40 = vpop.eup %4217  ;;  %v5059_v50 = vld [vmem:[%s5635_s2 + $0x20] ss:$16 sps:$4 sm:$0xff]   ;;  %v5073_v38 = vld [vmem:[%s5635_s2 + $0x44] ss:$16 sps:$4 sm:$0xff]  }
 0x157   :  { %v5097_v8 = vld [vmem:[%s5635_s2 + $0x64] ss:$16 sps:$4 sm:$0xff]   ;;  %v5111_v55 = vld [vmem:[%s5635_s2 + $0x80] ss:$16 sps:$4 sm:$0xff]  }
 0x158   :  { %4219 = vtanh.f32 %v5014_v1  ;;  %v5017_v39 = vadd.f32 %v965_v17, %v963_v6  ;;  %v5103_v17 = vld [vmem:[%s5635_s2 + $0x60] ss:$16 sps:$4 sm:$0xff]  }
 0x159   :  { %4221 = vrcp.f32 %v945_v21  ;;  %v5122_v21 = vld [vmem:[%s5635_s2 + $0xa4] ss:$16 sps:$4 sm:$0xff]  }
 0x15a   :  { %4223 = vtanh.f32 %v5017_v39 }
 0x162   :  { %v4220_v19 = vpop.eup %4219 }
 0x163   :  { %v4222_v23 = vpop.eup %4221  ;;  %v970_v42 = vmul.f32 %v4220_v19, %v4218_v40 }
 0x164   :  { %v4224_v41 = vpop.eup %4223 }
 0x165   :  { %v971_v57 = vmul.f32 %v4224_v41, %v4222_v23  ;;  %v988_v41 = vunpack.c.h.bf16 %v4903_v12 }
 0x167   :  { %v972_v33 = vpack.c.bf16 %v971_v57, %v970_v42  ;;  %v990_v42 = vunpack.c.h.bf16 %v4905_v13 }
 0x169   :  { %1217 = vmatmul.mubr.bf16.vlgmr.msra.gmra.mrb[36].mxu0 %v972_v33  ;;  %1260 = vmatmul.mubr.bf16.vlgmr.msra.gmra.mrb[36].mxu1 %v972_v33 }
 0x16a   :  { %1572 = vmatprep.mubr.bf16.mxu0 %v5680_v44  ;;  %1615 = vmatprep.mubr.bf16.mxu1 %v5680_v44 }
 0x16b   :  { %1541 = vmatpush1.bf16.msra.mxu0 %v5035_v43  ;;  %1584 = vmatpush1.bf16.msra.mxu1 %v5040_v26 }
 0x16c   :  { %1542 = vmatprep.subr.bf16.mxu0 %v5049_v20  ;;  %1585 = vmatprep.subr.bf16.mxu1 %v5054_v27 }
 0x16f   :  { %1543 = vmatpush1.bf16.msra.mxu0 %v5059_v50  ;;  %1586 = vmatpush1.bf16.msra.mxu1 %v5064_v61 }
 0x170   :  { %1544 = vmatprep.subr.bf16.mxu0 %v5073_v38  ;;  %1587 = vmatprep.subr.bf16.mxu1 %v5078_v52 }
 0x173   :  { %1545 = vmatpush1.bf16.msra.mxu0 %v5083_v53  ;;  %1588 = vmatpush1.bf16.msra.mxu1 %v5088_v7 }
 0x174   :  { %1589 = vmatprep.subr.bf16.mxu1 %v4680_v48  ;;  %1546 = vmatprep.subr.bf16.mxu0 %v5097_v8  ;;  %v5116_v48 = vld [vmem:[%s5635_s2 + $0x84] ss:$16 sps:$4 sm:$0xff]  }
 0x177   :  { %1547 = vmatpush1.bf16.msra.mxu0 %v5103_v17  ;;  %1590 = vmatpush1.bf16.msra.mxu1 %v4701_v51  ;;  %v5130_v51 = vld [vmem:[%s5635_s2 + $0xa0] ss:$16 sps:$4 sm:$0xff]  }
 0x178   :  { %1591 = vmatprep.subr.bf16.mxu1 %v4716_v54  ;;  %1548 = vmatprep.subr.bf16.mxu0 %v5116_v48  ;;  %v983_v54 = vunpack.c.l.bf16 %v4899_v10 }
 0x17b   :  { %1549 = vmatpush1.bf16.msra.mxu0 %v5111_v55  ;;  %1592 = vmatpush1.bf16.msra.mxu1 %v4728_v56  ;;  %v985_v56 = vunpack.c.l.bf16 %v4901_v11 }
 0x17c   :  { %1550 = vmatprep.subr.bf16.mxu0 %v5122_v21  ;;  %1593 = vmatprep.subr.bf16.mxu1 %v4738_v58 }
 0x17f   :  { %1551 = vmatpush1.bf16.msra.mxu0 %v5130_v51  ;;  %1594 = vmatpush1.bf16.msra.mxu1 %v4750_v60  ;;  %v984_v60 = vunpack.c.l.bf16 %v4903_v12 }
 0x180   :  { %1552 = vmatprep.subr.bf16.mxu0 %v4745_v59  ;;  %1595 = vmatprep.subr.bf16.mxu1 %v4768_v63 }
 0x183   :  { %1553 = vmatpush1.bf16.msra.mxu0 %v4762_v62  ;;  %1596 = vmatpush1.bf16.msra.mxu1 %v4778_v2  ;;  %v986_v62 = vunpack.c.l.bf16 %v4905_v13 }
 0x184   :  { %1554 = vmatprep.subr.bf16.mxu0 %v4773_v0  ;;  %1597 = vmatprep.subr.bf16.mxu1 %v4784_v3 }
 0x187   :  { %1555 = vmatpush1.bf16.msra.mxu0 %v4791_v4  ;;  %1598 = vmatpush1.bf16.msra.mxu1 %v4798_v5  ;;  %v987_v4 = vunpack.c.h.bf16 %v4899_v10  ;;  %v989_v5 = vunpack.c.h.bf16 %v4901_v11 }
 0x188   :  { %1896 = vmatprep.subr.bf16.mxu0 %v5025_v18  ;;  %1939 = vmatprep.subr.bf16.mxu1 %v5030_v32 }
 0x23c   :  { %v1218_v58 = vpop.f32.mrb[36].mxu0  ;;  %v1261_v59 = vpop.f32.mrb[36].mxu1 }
 0x23d   :  { %v1270_v63 = vadd.f32 %v1218_v58, %v983_v54  ;;  %v1272_v0 = vadd.f32 %v1261_v59, %v985_v56  ;;  %v1220_v2 = vpop.f32.mrb[37].mxu0  ;;  %v1263_v3 = vpop.f32.mrb[37].mxu1 }
 0x23e   :  { %v1271_v6 = vadd.f32 %v1220_v2, %v984_v60  ;;  %v1273_v40 = vadd.f32 %v1263_v3, %v986_v62  ;;  %v1222_v19 = vpop.f32.mrb[38].mxu0  ;;  %v1265_v23 = vpop.f32.mrb[38].mxu1 }
 0x23f   :  { %v3710_v57 = vmul.f32 -1.442695, %v1270_v63  ;;  %v1274_v33 = vadd.f32 %v1222_v19, %v987_v4  ;;  %v1276_v25 = vadd.f32 %v1265_v23, %v989_v5  ;;  %v1224_v24 = vpop.f32.mrb[39].mxu0  ;;  %v1267_v54 = vpop.f32.mrb[39].mxu1  ;;  %v3712_v11 = vmul.f32 -1.442695, %v1272_v0 }
 0x240   :  { %v3711_v56 = vmul.f32 -1.442695, %v1271_v6  ;;  %v1275_v58 = vadd.f32 %v1224_v24, %v988_v41  ;;  %v1277_v59 = vadd.f32 %v1267_v54, %v990_v42 }
 0x241   :  { %4225 = vpow2.f32 %v3710_v57  ;;  %v3713_v10 = vmul.f32 -1.442695, %v1274_v33  ;;  %v3715_v60 = vmul.f32 -1.442695, %v1276_v25 }
 0x242   :  { %v3714_v22 = vmul.f32 -1.442695, %v1275_v58  ;;  %4227 = vpow2.f32 %v3711_v56 }
 0x243   :  { %4229 = vpow2.f32 %v3713_v10 }
 0x244   :  { %4231 = vpow2.f32 %v3714_v22 }
 0x245   :  { %4233 = vtanh.f32 %v1273_v40 }
 0x246   :  { %4235 = vpow2.f32 %v3712_v11 }
 0x247   :  { %4237 = vpow2.f32 %v3715_v60 }
 0x24b   :  { %v4226_v62 = vpop.eup %4225 }
 0x24c   :  { %v1296_v12 = vadd.f32 1.0, %v4226_v62  ;;  %v4228_v13 = vpop.eup %4227 }
 0x24d   :  { %v4230_v63 = vpop.eup %4229  ;;  %v1297_v2 = vadd.f32 1.0, %v4228_v13 }
 0x24e   :  { %4239 = vrcp.f32 %v1296_v12  ;;  %v1299_v3 = vadd.f32 1.0, %v4230_v63  ;;  %v4232_v24 = vpop.eup %4231  ;;  %v5188_v63 = vld [vmem:[%s5635_s2 + $0x68] ss:$16 sps:$4 sm:$0xff]  }
 0x24f   :  { %4241 = vtanh.f32 %v1277_v59  ;;  %v1300_v4 = vadd.f32 1.0, %v4232_v24  ;;  %v4234_v5 = vpop.eup %4233  ;;  %v5205_v24 = vld [vmem:[%s5635_s2 + $0xac] ss:$16 sps:$4 sm:$0xff]  }
 0x250   :  { %4243 = vrcp.f32 %v1297_v2  ;;  %v4236_v22 = vpop.eup %4235  ;;  %v5195_v2 = vld [vmem:[%s5635_s2 + $0x88] ss:$16 sps:$4 sm:$0xff]  }
 0x251   :  { %4245 = vrcp.f32 %v1299_v3  ;;  %v4238_v0 = vpop.eup %4237  ;;  %v1298_v41 = vadd.f32 1.0, %v4236_v22  ;;  %v5200_v3 = vld [vmem:[%s5635_s2 + $0x8c] ss:$16 sps:$4 sm:$0xff]   ;;  %v5222_v22 = vld [vmem:[%s5635_s2 + $0xa8] ss:$16 sps:$4 sm:$0xff]  }
 0x252   :  { %4247 = vrcp.f32 %v1300_v4  ;;  %v1301_v56 = vadd.f32 1.0, %v4238_v0  ;;  %v5210_v4 = vld [vmem:[%s5635_s2 + $0xc0] ss:$16 sps:$4 sm:$0xff]   ;;  %v5228_v0 = vld [vmem:[%s5635_s2 + $0xe4] ss:$16 sps:$4 sm:$0xff]  }
 0x253   :  { %4249 = vrcp.f32 %v1298_v41  ;;  %v1339_v41 = vunpack.c.l.bf16 %v4915_v34 }
 0x258   :  { %v4240_v25 = vpop.eup %4239 }
 0x259   :  { %v4242_v6 = vpop.eup %4241  ;;  %v1320_v40 = vmul.f32 %v4240_v25, %v4234_v5  ;;  %v5215_v5 = vld [vmem:[%s5635_s2 + $0xc4] ss:$16 sps:$4 sm:$0xff]   ;;  %v5234_v25 = vld [vmem:[%s5635_s2 + $0xcc] ss:$16 sps:$4 sm:$0xff]  }
 0x25a   :  { %v4244_v19 = vpop.eup %4243 }
 0x25b   :  { %v4246_v23 = vpop.eup %4245  ;;  %v1318_v42 = vmul.f32 %v4244_v19, %v5014_v1  ;;  %v5253_v19 = vld [vmem:[%s5635_s2 + $0xec] ss:$16 sps:$4 sm:$0xff]  }
 0x25c   :  { %v1321_v57 = vmul.f32 %v4246_v23, %v4242_v6  ;;  %v4248_v33 = vpop.eup %4247  ;;  %v5240_v6 = vld [vmem:[%s5635_s2 + $0xe0] ss:$16 sps:$4 sm:$0xff]   ;;  %v5261_v23 = vld [vmem:[%s5635_s2 + $0xe8] ss:$16 sps:$4 sm:$0xff]  }
 0x25d   :  { %v5155_v54 = vadd.f32 %v1320_v40, %v1318_v42  ;;  %v1319_v58 = vmul.f32 %v4248_v33, %v5017_v39  ;;  %v4250_v10 = vpop.eup %4249  ;;  %v5183_v39 = vld [vmem:[%s5635_s2 + $0x6c] ss:$16 sps:$4 sm:$0xff]   ;;  %v5247_v40 = vld [vmem:[%s5635_s2 + $0xc8] ss:$16 sps:$4 sm:$0xff]   ;;  %v1341_v42 = vunpack.c.l.bf16 %v4917_v35 }
 0x25f   :  { %4251 = vtanh.f32 %v5155_v54  ;;  %v5159_v59 = vadd.f32 %v1321_v57, %v1319_v58  ;;  %v1342_v58 = vunpack.c.l.bf16 %v4921_v37 }
 0x260   :  { %4253 = vrcp.f32 %v1301_v56  ;;  %v1340_v56 = vunpack.c.l.bf16 %v4919_v36 }
 0x261   :  { %4255 = vtanh.f32 %v5159_v59 }
 0x269   :  { %v4252_v11 = vpop.eup %4251 }
 0x26a   :  { %v4254_v60 = vpop.eup %4253  ;;  %v1326_v1 = vmul.f32 %v4252_v11, %v4250_v10 }
 0x26b   :  { %v4256_v62 = vpop.eup %4255 }
 0x26c   :  { %v1327_v12 = vmul.f32 %v4256_v62, %v4254_v60 }
 0x26e   :  { %v1328_v13 = vpack.c.bf16 %v1327_v12, %v1326_v1  ;;  %v1343_v1 = vunpack.c.h.bf16 %v4915_v34  ;;  %v1345_v12 = vunpack.c.h.bf16 %v4917_v35 }
 0x270   :  { %1573 = vmatmul.mubr.bf16.vlgmr.msra.gmra.mrb[40].mxu0 %v1328_v13  ;;  %1616 = vmatmul.mubr.bf16.vlgmr.msra.gmra.mrb[40].mxu1 %v1328_v13 }
 0x271   :  { %1897 = vmatpush1.bf16.msra.mxu0 %v5035_v43  ;;  %1940 = vmatpush1.bf16.msra.mxu1 %v5040_v26 }
 0x272   :  { %1898 = vmatprep.subr.bf16.mxu0 %v5049_v20  ;;  %1941 = vmatprep.subr.bf16.mxu1 %v5054_v27 }
 0x273   :  { %1928 = vmatprep.mubr.bf16.mxu0 %v5680_v44  ;;  %1971 = vmatprep.mubr.bf16.mxu1 %v5680_v44 }
 0x275   :  { %1899 = vmatpush1.bf16.msra.mxu0 %v5059_v50  ;;  %1942 = vmatpush1.bf16.msra.mxu1 %v5064_v61 }
 0x276   :  { %1900 = vmatprep.subr.bf16.mxu0 %v5073_v38  ;;  %1943 = vmatprep.subr.bf16.mxu1 %v5078_v52 }
 0x279   :  { %1901 = vmatpush1.bf16.msra.mxu0 %v5083_v53  ;;  %1944 = vmatpush1.bf16.msra.mxu1 %v5088_v7 }
 0x27a   :  { %1902 = vmatprep.subr.bf16.mxu0 %v5097_v8  ;;  %1945 = vmatprep.subr.bf16.mxu1 %v5183_v39 }
 0x27d   :  { %1903 = vmatpush1.bf16.msra.mxu0 %v5103_v17  ;;  %1946 = vmatpush1.bf16.msra.mxu1 %v5188_v63 }
 0x27e   :  { %1904 = vmatprep.subr.bf16.mxu0 %v5116_v48  ;;  %1947 = vmatprep.subr.bf16.mxu1 %v5200_v3 }
 0x281   :  { %1905 = vmatpush1.bf16.msra.mxu0 %v5111_v55  ;;  %1948 = vmatpush1.bf16.msra.mxu1 %v5195_v2 }
 0x282   :  { %1906 = vmatprep.subr.bf16.mxu0 %v5122_v21  ;;  %1949 = vmatprep.subr.bf16.mxu1 %v5205_v24 }
 0x285   :  { %1907 = vmatpush1.bf16.msra.mxu0 %v5130_v51  ;;  %1950 = vmatpush1.bf16.msra.mxu1 %v5222_v22 }
 0x286   :  { %1908 = vmatprep.subr.bf16.mxu0 %v5215_v5  ;;  %1951 = vmatprep.subr.bf16.mxu1 %v5234_v25 }
 0x289   :  { %1909 = vmatpush1.bf16.msra.mxu0 %v5210_v4  ;;  %1952 = vmatpush1.bf16.msra.mxu1 %v5247_v40 }
 0x28a   :  { %1910 = vmatprep.subr.bf16.mxu0 %v5228_v0  ;;  %1953 = vmatprep.subr.bf16.mxu1 %v5253_v19 }
 0x28d   :  { %1911 = vmatpush1.bf16.msra.mxu0 %v5240_v6  ;;  %1954 = vmatpush1.bf16.msra.mxu1 %v5261_v23 }
 0x28e   :  { %2252 = vmatprep.subr.bf16.mxu0 %v5025_v18  ;;  %2295 = vmatprep.subr.bf16.mxu1 %v5030_v32 }
 0x343   :  { %v1574_v57 = vpop.f32.mrb[40].mxu0  ;;  %v1617_v33 = vpop.f32.mrb[40].mxu1 }
 0x344   :  { %v1626_v10 = vadd.f32 %v1574_v57, %v1339_v41  ;;  %v1628_v11 = vadd.f32 %v1617_v33, %v1341_v42  ;;  %v1576_v60 = vpop.f32.mrb[41].mxu0  ;;  %v1619_v62 = vpop.f32.mrb[41].mxu1 }
 0x345   :  { %v1627_v13 = vadd.f32 %v1576_v60, %v1340_v56  ;;  %v1629_v31 = vadd.f32 %v1619_v62, %v1342_v58  ;;  %v1578_v30 = vpop.f32.mrb[42].mxu0  ;;  %v1621_v29 = vpop.f32.mrb[42].mxu1 }
 0x346   :  { %v3748_v47 = vmul.f32 -1.442695, %v1626_v10  ;;  %v1630_v46 = vadd.f32 %v1578_v30, %v1343_v1  ;;  %v1632_v45 = vadd.f32 %v1621_v29, %v1345_v12  ;;  %v1580_v16 = vpop.f32.mrb[43].mxu0  ;;  %v1623_v41 = vpop.f32.mrb[43].mxu1  ;;  %v3750_v35 = vmul.f32 -1.442695, %v1628_v11 }
 0x347   :  { %v3749_v42 = vmul.f32 -1.442695, %v1627_v13  ;;  %v1631_v57 = vadd.f32 %v1580_v16, %v1344_v28  ;;  %v1633_v33 = vadd.f32 %v1623_v41, %v1346_v49 }
 0x348   :  { %4257 = vpow2.f32 %v3748_v47  ;;  %v3751_v34 = vmul.f32 -1.442695, %v1630_v46  ;;  %v3753_v56 = vmul.f32 -1.442695, %v1632_v45 }
 0x349   :  { %v3752_v15 = vmul.f32 -1.442695, %v1631_v57  ;;  %4259 = vpow2.f32 %v3749_v42 }
 0x34a   :  { %4261 = vpow2.f32 %v3751_v34 }
 0x34b   :  { %4263 = vpow2.f32 %v3752_v15 }
 0x34c   :  { %4265 = vtanh.f32 %v1629_v31 }
 0x34d   :  { %4267 = vpow2.f32 %v3750_v35 }
 0x34e   :  { %4269 = vpow2.f32 %v3753_v56 }
 0x352   :  { %v4258_v58 = vpop.eup %4257 }
 0x353   :  { %v1652_v36 = vadd.f32 1.0, %v4258_v58  ;;  %v4260_v37 = vpop.eup %4259 }
 0x354   :  { %v4262_v29 = vpop.eup %4261  ;;  %v1653_v30 = vadd.f32 1.0, %v4260_v37 }
 0x355   :  { %4271 = vrcp.f32 %v1652_v36  ;;  %v1655_v10 = vadd.f32 1.0, %v4262_v29  ;;  %v4264_v16 = vpop.eup %4263  ;;  %v1697_v29 = vunpack.c.l.bf16 %v4933_v14 }
 0x356   :  { %4273 = vtanh.f32 %v1633_v33  ;;  %v1656_v46 = vadd.f32 1.0, %v4264_v16  ;;  %v4266_v47 = vpop.eup %4265  ;;  %v5681_v16 = vld [vmem:[#allocation5_spill] sm:$0xff] }
 0x357   :  { %4275 = vrcp.f32 %v1653_v30  ;;  %v4268_v15 = vpop.eup %4267 }
 0x358   :  { %4277 = vrcp.f32 %v1655_v10  ;;  %v4270_v49 = vpop.eup %4269  ;;  %v1654_v62 = vadd.f32 1.0, %v4268_v15 }
 0x359   :  { %4279 = vrcp.f32 %v1656_v46  ;;  %v1657_v42 = vadd.f32 1.0, %v4270_v49  ;;  %v1696_v46 = vunpack.c.l.bf16 %v5681_v16 }
 0x35a   :  { %4281 = vrcp.f32 %v1654_v62 }
 0x35f   :  { %v4272_v45 = vpop.eup %4271 }
 0x360   :  { %v4274_v28 = vpop.eup %4273  ;;  %v1676_v31 = vmul.f32 %v4272_v45, %v4266_v47  ;;  %v5682_v47 = vld [vmem:[#allocation6_spill] sm:$0xff] }
 0x361   :  { %v4276_v11 = vpop.eup %4275  ;;  %v1698_v15 = vunpack.c.l.bf16 %v5682_v47 }
 0x362   :  { %v4278_v60 = vpop.eup %4277  ;;  %v1674_v1 = vmul.f32 %v4276_v11, %v5155_v54  ;;  %v1699_v11 = vunpack.c.h.bf16 %v4931_v9 }
 0x363   :  { %v1677_v12 = vmul.f32 %v4278_v60, %v4274_v28  ;;  %v4280_v13 = vpop.eup %4279 }
 0x364   :  { %v5275_v41 = vadd.f32 %v1676_v31, %v1674_v1  ;;  %v1675_v57 = vmul.f32 %v4280_v13, %v5159_v59  ;;  %v4282_v34 = vpop.eup %4281  ;;  %v1695_v59 = vunpack.c.l.bf16 %v4931_v9  ;;  %v1702_v13 = vunpack.c.h.bf16 %v5682_v47 }
 0x366   :  { %4283 = vtanh.f32 %v5275_v41  ;;  %v5279_v33 = vadd.f32 %v1677_v12, %v1675_v57  ;;  %v1700_v12 = vunpack.c.h.bf16 %v5681_v16 }
 0x367   :  { %4285 = vrcp.f32 %v1657_v42 }
 0x368   :  { %4287 = vtanh.f32 %v5279_v33 }
 0x370   :  { %v4284_v35 = vpop.eup %4283 }
 0x371   :  { %v4286_v56 = vpop.eup %4285  ;;  %v1682_v54 = vmul.f32 %v4284_v35, %v4282_v34 }
 0x372   :  { %v4288_v58 = vpop.eup %4287 }
 0x373   :  { %v1683_v36 = vmul.f32 %v4288_v58, %v4286_v56 }
 0x375   :  { %v1684_v37 = vpack.c.bf16 %v1683_v36, %v1682_v54 }
 0x377   :  { %1929 = vmatmul.mubr.bf16.vlgmr.msra.gmra.mrb[44].mxu0 %v1684_v37  ;;  %1972 = vmatmul.mubr.bf16.vlgmr.msra.gmra.mrb[44].mxu1 %v1684_v37 }
 0x378   :  { %2253 = vmatpush1.bf16.msra.mxu0 %v5035_v43  ;;  %2296 = vmatpush1.bf16.msra.mxu1 %v5040_v26 }
 0x379   :  { %2254 = vmatprep.subr.bf16.mxu0 %v5049_v20  ;;  %2297 = vmatprep.subr.bf16.mxu1 %v5054_v27 }
 0x37a   :  { %2284 = vmatprep.mubr.bf16.mxu0 %v5680_v44  ;;  %2327 = vmatprep.mubr.bf16.mxu1 %v5680_v44 }
 0x37c   :  { %2255 = vmatpush1.bf16.msra.mxu0 %v5059_v50  ;;  %2298 = vmatpush1.bf16.msra.mxu1 %v5064_v61 }
 0x37d   :  { %2256 = vmatprep.subr.bf16.mxu0 %v5073_v38  ;;  %2299 = vmatprep.subr.bf16.mxu1 %v5078_v52 }
 0x380   :  { %2257 = vmatpush1.bf16.msra.mxu0 %v5083_v53  ;;  %2300 = vmatpush1.bf16.msra.mxu1 %v5088_v7 }
 0x381   :  { %2258 = vmatprep.subr.bf16.mxu0 %v5097_v8  ;;  %2301 = vmatprep.subr.bf16.mxu1 %v5183_v39 }
 0x384   :  { %2259 = vmatpush1.bf16.msra.mxu0 %v5103_v17  ;;  %2302 = vmatpush1.bf16.msra.mxu1 %v5188_v63 }
 0x385   :  { %2260 = vmatprep.subr.bf16.mxu0 %v5116_v48  ;;  %2303 = vmatprep.subr.bf16.mxu1 %v5200_v3 }
 0x388   :  { %2261 = vmatpush1.bf16.msra.mxu0 %v5111_v55  ;;  %2304 = vmatpush1.bf16.msra.mxu1 %v5195_v2 }
 0x389   :  { %2262 = vmatprep.subr.bf16.mxu0 %v5122_v21  ;;  %2305 = vmatprep.subr.bf16.mxu1 %v5205_v24 }
 0x38c   :  { %2263 = vmatpush1.bf16.msra.mxu0 %v5130_v51  ;;  %2306 = vmatpush1.bf16.msra.mxu1 %v5222_v22 }
 0x38d   :  { %2264 = vmatprep.subr.bf16.mxu0 %v5215_v5  ;;  %2307 = vmatprep.subr.bf16.mxu1 %v5234_v25 }
 0x390   :  { %2265 = vmatpush1.bf16.msra.mxu0 %v5210_v4  ;;  %2308 = vmatpush1.bf16.msra.mxu1 %v5247_v40 }
 0x391   :  { %2266 = vmatprep.subr.bf16.mxu0 %v5228_v0  ;;  %2309 = vmatprep.subr.bf16.mxu1 %v5253_v19 }
 0x394   :  { %2267 = vmatpush1.bf16.msra.mxu0 %v5240_v6  ;;  %2310 = vmatpush1.bf16.msra.mxu1 %v5261_v23 }
 0x395   :  { %2608 = vmatprep.subr.bf16.mxu0 %v5025_v18  ;;  %2651 = vmatprep.subr.bf16.mxu1 %v5030_v32  ;;  %v1701_v18 = vunpack.c.h.bf16 %v4933_v14 }
 0x44a   :  { %v1930_v30 = vpop.f32.mrb[44].mxu0  ;;  %v1973_v10 = vpop.f32.mrb[44].mxu1 }
 0x44b   :  { %v1982_v49 = vadd.f32 %v1930_v30, %v1695_v59  ;;  %v1984_v45 = vadd.f32 %v1973_v10, %v1697_v29  ;;  %v1932_v28 = vpop.f32.mrb[45].mxu0  ;;  %v1975_v31 = vpop.f32.mrb[45].mxu1 }
 0x44c   :  { %v1983_v60 = vadd.f32 %v1932_v28, %v1696_v46  ;;  %v1985_v32 = vadd.f32 %v1975_v31, %v1698_v15  ;;  %v1934_v62 = vpop.f32.mrb[46].mxu0  ;;  %v1977_v1 = vpop.f32.mrb[46].mxu1 }
 0x44d   :  { %v3786_v42 = vmul.f32 -1.442695, %v1982_v49  ;;  %v1986_v57 = vadd.f32 %v1934_v62, %v1699_v11  ;;  %v1988_v34 = vadd.f32 %v1977_v1, %v1701_v18  ;;  %v1936_v35 = vpop.f32.mrb[47].mxu0  ;;  %v1979_v56 = vpop.f32.mrb[47].mxu1  ;;  %v3788_v14 = vmul.f32 -1.442695, %v1984_v45 }
 0x44e   :  { %v3787_v58 = vmul.f32 -1.442695, %v1983_v60  ;;  %v1987_v54 = vadd.f32 %v1936_v35, %v1700_v12  ;;  %v1989_v36 = vadd.f32 %v1979_v56, %v1702_v13 }
 0x44f   :  { %4289 = vpow2.f32 %v3786_v42  ;;  %v3789_v9 = vmul.f32 -1.442695, %v1986_v57  ;;  %v3791_v59 = vmul.f32 -1.442695, %v1988_v34 }
 0x450   :  { %v3790_v37 = vmul.f32 -1.442695, %v1987_v54  ;;  %4291 = vpow2.f32 %v3787_v58 }
 0x451   :  { %4293 = vpow2.f32 %v3789_v9 }
 0x452   :  { %4295 = vpow2.f32 %v3790_v37 }
 0x453   :  { %4297 = vtanh.f32 %v1985_v32 }
 0x454   :  { %4299 = vpow2.f32 %v3788_v14 }
 0x455   :  { %4301 = vpow2.f32 %v3791_v59 }
 0x459   :  { %v4290_v29 = vpop.eup %4289 }
 0x45a   :  { %v2008_v30 = vadd.f32 1.0, %v4290_v29  ;;  %v4292_v10 = vpop.eup %4291 }
 0x45b   :  { %v4294_v16 = vpop.eup %4293  ;;  %v2009_v46 = vadd.f32 1.0, %v4292_v10 }
 0x45c   :  { %4303 = vrcp.f32 %v2008_v30  ;;  %v2011_v47 = vadd.f32 1.0, %v4294_v16  ;;  %v4296_v15 = vpop.eup %4295 }
 0x45d   :  { %4305 = vtanh.f32 %v1989_v36  ;;  %v2012_v49 = vadd.f32 1.0, %v4296_v15  ;;  %v4298_v28 = vpop.eup %4297 }
 0x45e   :  { %4307 = vrcp.f32 %v2009_v46  ;;  %v4300_v31 = vpop.eup %4299 }
 0x45f   :  { %4309 = vrcp.f32 %v2011_v47  ;;  %v4302_v45 = vpop.eup %4301  ;;  %v2010_v1 = vadd.f32 1.0, %v4300_v31 }
 0x460   :  { %4311 = vrcp.f32 %v2012_v49  ;;  %v2013_v34 = vadd.f32 1.0, %v4302_v45 }
 0x461   :  { %4313 = vrcp.f32 %v2010_v1 }
 0x466   :  { %v4304_v11 = vpop.eup %4303 }
 0x467   :  { %v4306_v18 = vpop.eup %4305  ;;  %v2032_v60 = vmul.f32 %v4304_v11, %v4298_v28 }
 0x468   :  { %v4308_v32 = vpop.eup %4307 }
 0x469   :  { %v4310_v62 = vpop.eup %4309  ;;  %v2030_v12 = vmul.f32 %v4308_v32, %v5275_v41 }
 0x46a   :  { %v2033_v13 = vmul.f32 %v4310_v62, %v4306_v18  ;;  %v4312_v42 = vpop.eup %4311 }
 0x46b   :  { %v5325_v57 = vadd.f32 %v2032_v60, %v2030_v12  ;;  %v2031_v35 = vmul.f32 %v4312_v42, %v5279_v33  ;;  %v4314_v58 = vpop.eup %4313 }
 0x46d   :  { %4315 = vtanh.f32 %v5325_v57  ;;  %v5329_v56 = vadd.f32 %v2033_v13, %v2031_v35 }
 0x46e   :  { %4317 = vrcp.f32 %v2013_v34 }
 0x46f   :  { %4319 = vtanh.f32 %v5329_v56 }
 0x477   :  { %v4316_v54 = vpop.eup %4315 }
 0x478   :  { %v4318_v36 = vpop.eup %4317  ;;  %v2038_v41 = vmul.f32 %v4316_v54, %v4314_v58 }
 0x479   :  { %v4320_v9 = vpop.eup %4319 }
 0x47a   :  { %v2039_v37 = vmul.f32 %v4320_v9, %v4318_v36 }
 0x47c   :  { %v2040_v14 = vpack.c.bf16 %v2039_v37, %v2038_v41 }
 0x47e   :  { %2285 = vmatmul.mubr.bf16.vlgmr.msra.gmra.mrb[48].mxu0 %v2040_v14  ;;  %2328 = vmatmul.mubr.bf16.vlgmr.msra.gmra.mrb[48].mxu1 %v2040_v14 }
 0x47f   :  { %2609 = vmatpush1.bf16.msra.mxu0 %v5035_v43  ;;  %2652 = vmatpush1.bf16.msra.mxu1 %v5040_v26  ;;  %v5683_v43 = vld [vmem:[#allocation7_spill] sm:$0xff] }
 0x480   :  { %2610 = vmatprep.subr.bf16.mxu0 %v5049_v20  ;;  %2653 = vmatprep.subr.bf16.mxu1 %v5054_v27  ;;  %v2051_v26 = vunpack.c.l.bf16 %v5683_v43  ;;  %v5684_v20 = vld [vmem:[#allocation8_spill] sm:$0xff] }
 0x481   :  { %2640 = vmatprep.mubr.bf16.mxu0 %v5680_v44  ;;  %2683 = vmatprep.mubr.bf16.mxu1 %v5680_v44  ;;  %v2053_v27 = vunpack.c.l.bf16 %v5684_v20 }
 0x483   :  { %2611 = vmatpush1.bf16.msra.mxu0 %v5059_v50  ;;  %2654 = vmatpush1.bf16.msra.mxu1 %v5064_v61 }
 0x484   :  { %2612 = vmatprep.subr.bf16.mxu0 %v5073_v38  ;;  %2655 = vmatprep.subr.bf16.mxu1 %v5078_v52  ;;  %v5685_v38 = vld [vmem:[#allocation9_spill] sm:$0xff] }
 0x485   :  { %v2052_v52 = vunpack.c.l.bf16 %v5685_v38  ;;  %v2056_v10 = vunpack.c.h.bf16 %v5685_v38 }
 0x487   :  { %2613 = vmatpush1.bf16.msra.mxu0 %v5083_v53  ;;  %2656 = vmatpush1.bf16.msra.mxu1 %v5088_v7  ;;  %v5686_v53 = vld [vmem:[#allocation10_spill] sm:$0xff] }
 0x488   :  { %2614 = vmatprep.subr.bf16.mxu0 %v5097_v8  ;;  %2657 = vmatprep.subr.bf16.mxu1 %v5183_v39  ;;  %v2054_v7 = vunpack.c.l.bf16 %v5686_v53  ;;  %v2058_v16 = vunpack.c.h.bf16 %v5686_v53 }
 0x48b   :  { %2615 = vmatpush1.bf16.msra.mxu0 %v5103_v17  ;;  %2658 = vmatpush1.bf16.msra.mxu1 %v5188_v63 }
 0x48c   :  { %2616 = vmatprep.subr.bf16.mxu0 %v5116_v48  ;;  %2659 = vmatprep.subr.bf16.mxu1 %v5200_v3 }
 0x48f   :  { %2617 = vmatpush1.bf16.msra.mxu0 %v5111_v55  ;;  %2660 = vmatpush1.bf16.msra.mxu1 %v5195_v2 }
 0x490   :  { %2618 = vmatprep.subr.bf16.mxu0 %v5122_v21  ;;  %2661 = vmatprep.subr.bf16.mxu1 %v5205_v24  ;;  %v2055_v21 = vunpack.c.h.bf16 %v5683_v43 }
 0x493   :  { %2619 = vmatpush1.bf16.msra.mxu0 %v5130_v51  ;;  %2662 = vmatpush1.bf16.msra.mxu1 %v5222_v22  ;;  %v2057_v51 = vunpack.c.h.bf16 %v5684_v20 }
 0x494   :  { %2620 = vmatprep.subr.bf16.mxu0 %v5215_v5  ;;  %2663 = vmatprep.subr.bf16.mxu1 %v5234_v25 }
 0x497   :  { %2621 = vmatpush1.bf16.msra.mxu0 %v5210_v4  ;;  %2664 = vmatpush1.bf16.msra.mxu1 %v5247_v40 }
 0x498   :  { %2622 = vmatprep.subr.bf16.mxu0 %v5228_v0  ;;  %2665 = vmatprep.subr.bf16.mxu1 %v5253_v19 }
 0x49b   :  { %2623 = vmatpush1.bf16.msra.mxu0 %v5240_v6  ;;  %2666 = vmatpush1.bf16.msra.mxu1 %v5261_v23 }
 0x551   :  { %v2286_v50 = vpop.f32.mrb[48].mxu0  ;;  %v2329_v61 = vpop.f32.mrb[48].mxu1 }
 0x552   :  { %v2338_v8 = vadd.f32 %v2286_v50, %v2051_v26  ;;  %v2340_v17 = vadd.f32 %v2329_v61, %v2053_v27  ;;  %v2288_v55 = vpop.f32.mrb[49].mxu0  ;;  %v2331_v48 = vpop.f32.mrb[49].mxu1 }
 0x553   :  { %v2339_v33 = vadd.f32 %v2288_v55, %v2052_v52  ;;  %v2341_v59 = vadd.f32 %v2331_v48, %v2054_v7  ;;  %v2290_v29 = vpop.f32.mrb[50].mxu0  ;;  %v2333_v30 = vpop.f32.mrb[50].mxu1 }
 0x554   :  { %v3824_v46 = vmul.f32 -1.442695, %v2338_v8  ;;  %v2342_v47 = vadd.f32 %v2290_v29, %v2055_v21  ;;  %v2344_v15 = vadd.f32 %v2333_v30, %v2057_v51  ;;  %v2292_v49 = vpop.f32.mrb[51].mxu0  ;;  %v2335_v28 = vpop.f32.mrb[51].mxu1  ;;  %v3826_v32 = vmul.f32 -1.442695, %v2340_v17 }
 0x555   :  { %v3825_v31 = vmul.f32 -1.442695, %v2339_v33  ;;  %v2343_v45 = vadd.f32 %v2292_v49, %v2056_v10  ;;  %v2345_v11 = vadd.f32 %v2335_v28, %v2058_v16  ;;  %v5391_v29 = vld [vmem:[%s5635_s2] ss:$16 sps:$4 sm:$0xff]   ;;  %v5396_v30 = vld [vmem:[%s5635_s2 + $0x8] ss:$16 sps:$4 sm:$0xff]  }
 0x556   :  { %4321 = vpow2.f32 %v3824_v46  ;;  %v3827_v18 = vmul.f32 -1.442695, %v2342_v47  ;;  %v3829_v62 = vmul.f32 -1.442695, %v2344_v15  ;;  %v5403_v10 = vld [vmem:[%s5635_s2 + $0x24] ss:$16 sps:$4 sm:$0xff]  }
 0x557   :  { %v3828_v60 = vmul.f32 -1.442695, %v2343_v45  ;;  %4323 = vpow2.f32 %v3825_v31  ;;  %v5408_v16 = vld [vmem:[%s5635_s2 + $0x2c] ss:$16 sps:$4 sm:$0xff]   ;;  %v5413_v46 = vld [vmem:[%s5635_s2 + $0x20] ss:$16 sps:$4 sm:$0xff]  }
 0x558   :  { %4325 = vpow2.f32 %v3827_v18  ;;  %v5418_v47 = vld [vmem:[%s5635_s2 + $0x28] ss:$16 sps:$4 sm:$0xff]   ;;  %v5427_v15 = vld [vmem:[%s5635_s2 + $0x44] ss:$16 sps:$4 sm:$0xff]   ;;  %v5432_v49 = vld [vmem:[%s5635_s2 + $0x4c] ss:$16 sps:$4 sm:$0xff]  }
 0x559   :  { %4327 = vpow2.f32 %v3828_v60  ;;  %v5437_v28 = vld [vmem:[%s5635_s2 + $0x40] ss:$16 sps:$4 sm:$0xff]   ;;  %v5442_v31 = vld [vmem:[%s5635_s2 + $0x48] ss:$16 sps:$4 sm:$0xff]   ;;  %v5451_v45 = vld [vmem:[%s5635_s2 + $0x64] ss:$16 sps:$4 sm:$0xff]  }
 0x55a   :  { %4329 = vtanh.f32 %v2341_v59  ;;  %v4142_v59 = vld [vmem:[%s5635_s2 + $0xc] ss:$16 sps:$4 sm:$0xff]   ;;  %v5465_v18 = vld [vmem:[%s5635_s2 + $0x80] ss:$16 sps:$4 sm:$0xff]   ;;  %v5476_v60 = vld [vmem:[%s5635_s2 + $0xa4] ss:$16 sps:$4 sm:$0xff]  }
 0x55b   :  { %4331 = vpow2.f32 %v3826_v32  ;;  %3007 = vmatprep.subr.bf16.mxu1 %v4142_v59  ;;  %v5689_v32 = vld [vmem:[#allocation13_spill] sm:$0xff] }
 0x55c   :  { %4333 = vpow2.f32 %v3829_v62  ;;  %v5690_v62 = vld [vmem:[#allocation14_spill] sm:$0xff] }
 0x560   :  { %v4322_v1 = vpop.eup %4321 }
 0x561   :  { %v2364_v12 = vadd.f32 1.0, %v4322_v1  ;;  %v4324_v13 = vpop.eup %4323 }
 0x562   :  { %v4326_v42 = vpop.eup %4325  ;;  %v2365_v34 = vadd.f32 1.0, %v4324_v13 }
 0x563   :  { %4335 = vrcp.f32 %v2364_v12  ;;  %v2367_v35 = vadd.f32 1.0, %v4326_v42  ;;  %v4328_v58 = vpop.eup %4327 }
 0x564   :  { %4337 = vtanh.f32 %v2345_v11  ;;  %v2368_v54 = vadd.f32 1.0, %v4328_v58  ;;  %v4330_v36 = vpop.eup %4329  ;;  %v5457_v11 = vld [vmem:[%s5635_s2 + $0x60] ss:$16 sps:$4 sm:$0xff]   ;;  %v2412_v58 = vunpack.c.h.bf16 %v5689_v32 }
 0x565   :  { %4339 = vrcp.f32 %v2365_v34  ;;  %v4332_v9 = vpop.eup %4331 }
 0x566   :  { %4341 = vrcp.f32 %v2367_v35  ;;  %v4334_v41 = vpop.eup %4333  ;;  %v2366_v27 = vadd.f32 1.0, %v4332_v9 }
 0x567   :  { %4343 = vrcp.f32 %v2368_v54  ;;  %v2369_v53 = vadd.f32 1.0, %v4334_v41  ;;  %v2414_v54 = vunpack.c.h.bf16 %v5690_v62 }
 0x568   :  { %4345 = vrcp.f32 %v2366_v27 }
 0x56d   :  { %v4336_v37 = vpop.eup %4335 }
 0x56e   :  { %v4338_v14 = vpop.eup %4337  ;;  %v2388_v43 = vmul.f32 %v4336_v37, %v4330_v36 }
 0x56f   :  { %v4340_v26 = vpop.eup %4339 }
 0x570   :  { %v4342_v20 = vpop.eup %4341  ;;  %v2386_v50 = vmul.f32 %v4340_v26, %v5325_v57 }
 0x571   :  { %v2389_v61 = vmul.f32 %v4342_v20, %v4338_v14  ;;  %v4344_v38 = vpop.eup %4343 }
 0x572   :  { %v5373_v52 = vadd.f32 %v2388_v43, %v2386_v50  ;;  %v2387_v7 = vmul.f32 %v4344_v38, %v5329_v56  ;;  %v4346_v17 = vpop.eup %4345  ;;  %v4139_v56 = vld [vmem:[%s5635_s2 + $0x4] ss:$16 sps:$4 sm:$0xff]  }
 0x573   :  { %2964 = vmatprep.subr.bf16.mxu0 %v4139_v56 }
 0x574   :  { %4347 = vtanh.f32 %v5373_v52  ;;  %v5377_v8 = vadd.f32 %v2389_v61, %v2387_v7 }
 0x575   :  { %4349 = vrcp.f32 %v2369_v53 }
 0x576   :  { %4351 = vtanh.f32 %v5377_v8 }
 0x57e   :  { %v4348_v55 = vpop.eup %4347 }
 0x57f   :  { %v4350_v48 = vpop.eup %4349  ;;  %v2394_v57 = vmul.f32 %v4348_v55, %v4346_v17 }
 0x580   :  { %v4352_v21 = vpop.eup %4351 }
 0x581   :  { %v2395_v51 = vmul.f32 %v4352_v21, %v4350_v48 }
 0x583   :  { %v2396_v33 = vpack.c.bf16 %v2395_v51, %v2394_v57 }
 0x585   :  { %2641 = vmatmul.mubr.bf16.vlgmr.msra.gmra.mrb[52].mxu0 %v2396_v33  ;;  %2684 = vmatmul.mubr.bf16.vlgmr.msra.gmra.mrb[52].mxu1 %v2396_v33 }
 0x586   :  { %2996 = vmatprep.mubr.bf16.mxu0 %v5680_v44  ;;  %3039 = vmatprep.mubr.bf16.mxu1 %v5680_v44 }
 0x587   :  { %2965 = vmatpush1.bf16.msra.mxu0 %v5391_v29  ;;  %3008 = vmatpush1.bf16.msra.mxu1 %v5396_v30 }
 0x588   :  { %2966 = vmatprep.subr.bf16.mxu0 %v5403_v10  ;;  %3009 = vmatprep.subr.bf16.mxu1 %v5408_v16 }
 0x58b   :  { %2967 = vmatpush1.bf16.msra.mxu0 %v5413_v46  ;;  %3010 = vmatpush1.bf16.msra.mxu1 %v5418_v47 }
 0x58c   :  { %2968 = vmatprep.subr.bf16.mxu0 %v5427_v15  ;;  %3011 = vmatprep.subr.bf16.mxu1 %v5432_v49 }
 0x58f   :  { %2969 = vmatpush1.bf16.msra.mxu0 %v5437_v28  ;;  %3012 = vmatpush1.bf16.msra.mxu1 %v5442_v31 }
 0x590   :  { %3013 = vmatprep.subr.bf16.mxu1 %v5183_v39  ;;  %2970 = vmatprep.subr.bf16.mxu0 %v5451_v45  ;;  %v5470_v39 = vld [vmem:[%s5635_s2 + $0x84] ss:$16 sps:$4 sm:$0xff]  }
 0x593   :  { %2971 = vmatpush1.bf16.msra.mxu0 %v5457_v11  ;;  %3014 = vmatpush1.bf16.msra.mxu1 %v5188_v63  ;;  %v5484_v63 = vld [vmem:[%s5635_s2 + $0xa0] ss:$16 sps:$4 sm:$0xff]  }
 0x594   :  { %3015 = vmatprep.subr.bf16.mxu1 %v5200_v3  ;;  %2972 = vmatprep.subr.bf16.mxu0 %v5470_v39 }
 0x597   :  { %2973 = vmatpush1.bf16.msra.mxu0 %v5465_v18  ;;  %3016 = vmatpush1.bf16.msra.mxu1 %v5195_v2  ;;  %v5687_v2 = vld [vmem:[#allocation11_spill] sm:$0xff] }
 0x598   :  { %2974 = vmatprep.subr.bf16.mxu0 %v5476_v60  ;;  %3017 = vmatprep.subr.bf16.mxu1 %v5205_v24  ;;  %v2407_v3 = vunpack.c.l.bf16 %v5687_v2  ;;  %v5688_v24 = vld [vmem:[#allocation12_spill] sm:$0xff] }
 0x59b   :  { %2975 = vmatpush1.bf16.msra.mxu0 %v5484_v63  ;;  %3018 = vmatpush1.bf16.msra.mxu1 %v5222_v22 }
 0x59c   :  { %2976 = vmatprep.subr.bf16.mxu0 %v5215_v5  ;;  %3019 = vmatprep.subr.bf16.mxu1 %v5234_v25  ;;  %v2409_v5 = vunpack.c.l.bf16 %v5688_v24 }
 0x59f   :  { %2977 = vmatpush1.bf16.msra.mxu0 %v5210_v4  ;;  %3020 = vmatpush1.bf16.msra.mxu1 %v5247_v40  ;;  %v2408_v4 = vunpack.c.l.bf16 %v5689_v32  ;;  %v2410_v40 = vunpack.c.l.bf16 %v5690_v62 }
 0x5a0   :  { %2978 = vmatprep.subr.bf16.mxu0 %v5228_v0  ;;  %3021 = vmatprep.subr.bf16.mxu1 %v5253_v19 }
 0x5a3   :  { %2979 = vmatpush1.bf16.msra.mxu0 %v5240_v6  ;;  %3022 = vmatpush1.bf16.msra.mxu1 %v5261_v23  ;;  %v2411_v6 = vunpack.c.h.bf16 %v5687_v2  ;;  %v2413_v23 = vunpack.c.h.bf16 %v5688_v24 }
 0x5a4   :  { %3320 = vmatprep.subr.bf16.mxu0 %v4139_v56  ;;  %3363 = vmatprep.subr.bf16.mxu1 %v4142_v59 }
 0x658   :  { %v2642_v22 = vpop.f32.mrb[52].mxu0  ;;  %v2685_v25 = vpop.f32.mrb[52].mxu1 }
 0x659   :  { %v2694_v1 = vadd.f32 %v2642_v22, %v2407_v3  ;;  %v2696_v0 = vadd.f32 %v2685_v25, %v2409_v5  ;;  %v2644_v12 = vpop.f32.mrb[53].mxu0  ;;  %v2687_v19 = vpop.f32.mrb[53].mxu1 }
 0x65a   :  { %v2695_v13 = vadd.f32 %v2644_v12, %v2408_v4  ;;  %v2697_v42 = vadd.f32 %v2687_v19, %v2410_v40  ;;  %v2646_v34 = vpop.f32.mrb[54].mxu0  ;;  %v2689_v35 = vpop.f32.mrb[54].mxu1 }
 0x65b   :  { %v3862_v36 = vmul.f32 -1.442695, %v2694_v1  ;;  %v2698_v9 = vadd.f32 %v2646_v34, %v2411_v6  ;;  %v2700_v41 = vadd.f32 %v2689_v35, %v2413_v23  ;;  %v2648_v37 = vpop.f32.mrb[55].mxu0  ;;  %v2691_v14 = vpop.f32.mrb[55].mxu1  ;;  %v3864_v61 = vmul.f32 -1.442695, %v2696_v0 }
 0x65c   :  { %v3863_v43 = vmul.f32 -1.442695, %v2695_v13  ;;  %v2699_v26 = vadd.f32 %v2648_v37, %v2412_v58  ;;  %v2701_v20 = vadd.f32 %v2691_v14, %v2414_v54  ;;  %v5693_v54 = vld [vmem:[#allocation17_spill] sm:$0xff] }
 0x65d   :  { %4353 = vpow2.f32 %v3862_v36  ;;  %v3865_v27 = vmul.f32 -1.442695, %v2698_v9  ;;  %v3867_v38 = vmul.f32 -1.442695, %v2700_v41  ;;  %v2764_v36 = vunpack.c.l.bf16 %v5693_v54  ;;  %v5694_v9 = vld [vmem:[#allocation18_spill] sm:$0xff] }
 0x65e   :  { %v3866_v50 = vmul.f32 -1.442695, %v2699_v26  ;;  %4355 = vpow2.f32 %v3863_v43  ;;  %v2766_v41 = vunpack.c.l.bf16 %v5694_v9 }
 0x65f   :  { %4357 = vpow2.f32 %v3865_v27 }
 0x660   :  { %4359 = vpow2.f32 %v3866_v50 }
 0x661   :  { %4361 = vtanh.f32 %v2697_v42 }
 0x662   :  { %4363 = vpow2.f32 %v3864_v61 }
 0x663   :  { %4365 = vpow2.f32 %v3867_v38 }
 0x667   :  { %v4354_v53 = vpop.eup %4353 }
 0x668   :  { %v2720_v7 = vadd.f32 1.0, %v4354_v53  ;;  %v4356_v17 = vpop.eup %4355 }
 0x669   :  { %v4358_v55 = vpop.eup %4357  ;;  %v2721_v48 = vadd.f32 1.0, %v4356_v17  ;;  %v2770_v17 = vunpack.c.h.bf16 %v5694_v9  ;;  %v4191_v9 = vld [vmem:[%s5639_s6 + $0x30] sm:$0xff]  }
 0x66a   :  { %4367 = vrcp.f32 %v2720_v7  ;;  %v2723_v21 = vadd.f32 1.0, %v4358_v55  ;;  %v4360_v57 = vpop.eup %4359  ;;  %v2768_v7 = vunpack.c.h.bf16 %v5693_v54  ;;  %v4189_v54 = vld [vmem:[%s5639_s6 + $0x20] sm:$0xff]  }
 0x66b   :  { %4369 = vtanh.f32 %v2701_v20  ;;  %v2724_v51 = vadd.f32 1.0, %v4360_v57  ;;  %v4362_v33 = vpop.eup %4361 }
 0x66c   :  { %4371 = vrcp.f32 %v2721_v48  ;;  %v4364_v56 = vpop.eup %4363 }
 0x66d   :  { %4373 = vrcp.f32 %v2723_v21  ;;  %v4366_v59 = vpop.eup %4365  ;;  %v2722_v25 = vadd.f32 1.0, %v4364_v56 }
 0x66e   :  { %4375 = vrcp.f32 %v2724_v51  ;;  %v2725_v1 = vadd.f32 1.0, %v4366_v59 }
 0x66f   :  { %4377 = vrcp.f32 %v2722_v25 }
 0x674   :  { %v4368_v2 = vpop.eup %4367 }
 0x675   :  { %v4370_v3 = vpop.eup %4369  ;;  %v2744_v24 = vmul.f32 %v4368_v2, %v4362_v33 }
 0x676   :  { %v4372_v5 = vpop.eup %4371 }
 0x677   :  { %v4374_v22 = vpop.eup %4373  ;;  %v2742_v32 = vmul.f32 %v4372_v5, %v5373_v52 }
 0x678   :  { %v2745_v4 = vmul.f32 %v4374_v22, %v4370_v3  ;;  %v4376_v62 = vpop.eup %4375 }
 0x679   :  { %v5507_v40 = vadd.f32 %v2744_v24, %v2742_v32  ;;  %v2743_v0 = vmul.f32 %v4376_v62, %v5377_v8  ;;  %v4378_v19 = vpop.eup %4377  ;;  %v4164_v8 = vld [vmem:[%s5635_s2 + $0x68] ss:$16 sps:$4 sm:$0xff]  }
 0x67b   :  { %4379 = vtanh.f32 %v5507_v40  ;;  %v5511_v12 = vadd.f32 %v2745_v4, %v2743_v0 }
 0x67c   :  { %4381 = vrcp.f32 %v2725_v1 }
 0x67d   :  { %4383 = vtanh.f32 %v5511_v12 }
 0x685   :  { %v4380_v6 = vpop.eup %4379 }
 0x686   :  { %v4382_v23 = vpop.eup %4381  ;;  %v2750_v52 = vmul.f32 %v4380_v6, %v4378_v19 }
 0x687   :  { %v4384_v13 = vpop.eup %4383 }
 0x688   :  { %v2751_v42 = vmul.f32 %v4384_v13, %v4382_v23 }
 0x68a   :  { %v2752_v34 = vpack.c.bf16 %v2751_v42, %v2750_v52 }
 0x68c   :  { %2997 = vmatmul.mubr.bf16.vlgmr.msra.gmra.mrb[56].mxu0 %v2752_v34  ;;  %3040 = vmatmul.mubr.bf16.vlgmr.msra.gmra.mrb[56].mxu1 %v2752_v34 }
 0x68d   :  { %3321 = vmatpush1.bf16.msra.mxu0 %v5391_v29  ;;  %3364 = vmatpush1.bf16.msra.mxu1 %v5396_v30  ;;  %v4167_v29 = vld [vmem:[%s5635_s2 + $0x88] ss:$16 sps:$4 sm:$0xff]   ;;  %v4169_v30 = vld [vmem:[%s5635_s2 + $0x8c] ss:$16 sps:$4 sm:$0xff]  }
 0x68e   :  { %3322 = vmatprep.subr.bf16.mxu0 %v5403_v10  ;;  %3365 = vmatprep.subr.bf16.mxu1 %v5408_v16  ;;  %v4172_v10 = vld [vmem:[%s5635_s2 + $0xac] ss:$16 sps:$4 sm:$0xff]   ;;  %v4173_v16 = vld [vmem:[%s5635_s2 + $0xc0] ss:$16 sps:$4 sm:$0xff]  }
 0x68f   :  { %3352 = vmatprep.mubr.bf16.mxu0 %v5680_v44  ;;  %3395 = vmatprep.mubr.bf16.mxu1 %v5680_v44  ;;  %v4166_v44 = vld [vmem:[%s5635_s2 + $0x6c] ss:$16 sps:$4 sm:$0xff]  }
 0x691   :  { %3323 = vmatpush1.bf16.msra.mxu0 %v5413_v46  ;;  %3366 = vmatpush1.bf16.msra.mxu1 %v5418_v47  ;;  %v4175_v46 = vld [vmem:[%s5635_s2 + $0xc4] ss:$16 sps:$4 sm:$0xff]   ;;  %v4170_v47 = vld [vmem:[%s5635_s2 + $0xa8] ss:$16 sps:$4 sm:$0xff]  }
 0x692   :  { %3324 = vmatprep.subr.bf16.mxu0 %v5427_v15  ;;  %3367 = vmatprep.subr.bf16.mxu1 %v5432_v49  ;;  %v4181_v15 = vld [vmem:[%s5635_s2 + $0xe4] ss:$16 sps:$4 sm:$0xff]   ;;  %v4178_v49 = vld [vmem:[%s5635_s2 + $0xcc] ss:$16 sps:$4 sm:$0xff]  }
 0x695   :  { %3325 = vmatpush1.bf16.msra.mxu0 %v5437_v28  ;;  %3368 = vmatpush1.bf16.msra.mxu1 %v5442_v31  ;;  %v4179_v28 = vld [vmem:[%s5635_s2 + $0xe0] ss:$16 sps:$4 sm:$0xff]   ;;  %v4176_v31 = vld [vmem:[%s5635_s2 + $0xc8] ss:$16 sps:$4 sm:$0xff]  }
 0x696   :  { %3326 = vmatprep.subr.bf16.mxu0 %v5451_v45  ;;  %3369 = vmatprep.subr.bf16.mxu1 %v4166_v44  ;;  %v4184_v45 = vld [vmem:[%s5635_s2 + $0xec] ss:$16 sps:$4 sm:$0xff]  }
 0x699   :  { %3327 = vmatpush1.bf16.msra.mxu0 %v5457_v11  ;;  %3370 = vmatpush1.bf16.msra.mxu1 %v4164_v8  ;;  %v4182_v11 = vld [vmem:[%s5635_s2 + $0xe8] ss:$16 sps:$4 sm:$0xff]  }
 0x69a   :  { %3328 = vmatprep.subr.bf16.mxu0 %v5470_v39  ;;  %3371 = vmatprep.subr.bf16.mxu1 %v4169_v30 }
 0x69d   :  { %3329 = vmatpush1.bf16.msra.mxu0 %v5465_v18  ;;  %3372 = vmatpush1.bf16.msra.mxu1 %v4167_v29  ;;  %v5691_v18 = vld [vmem:[#allocation15_spill] sm:$0xff] }
 0x69e   :  { %3330 = vmatprep.subr.bf16.mxu0 %v5476_v60  ;;  %3373 = vmatprep.subr.bf16.mxu1 %v4172_v10  ;;  %v2763_v39 = vunpack.c.l.bf16 %v5691_v18  ;;  %v5692_v60 = vld [vmem:[#allocation16_spill] sm:$0xff]  ;;  %v2767_v20 = vunpack.c.h.bf16 %v5691_v18 }
 0x69f   :  { %v2769_v27 = vunpack.c.h.bf16 %v5692_v60 }
 0x6a1   :  { %3331 = vmatpush1.bf16.msra.mxu0 %v5484_v63  ;;  %3374 = vmatpush1.bf16.msra.mxu1 %v4170_v47  ;;  %v2765_v63 = vunpack.c.l.bf16 %v5692_v60  ;;  %v4450_v60 = vmov 0.0  }
 0x6a2   :  { %3332 = vmatprep.subr.bf16.mxu0 %v4175_v46  ;;  %3375 = vmatprep.subr.bf16.mxu1 %v4178_v49 }
 0x6a5   :  { %3333 = vmatpush1.bf16.msra.mxu0 %v4173_v16  ;;  %3376 = vmatpush1.bf16.msra.mxu1 %v4176_v31 }
 0x6a6   :  { %3334 = vmatprep.subr.bf16.mxu0 %v4181_v15  ;;  %3377 = vmatprep.subr.bf16.mxu1 %v4184_v45 }
 0x6a9   :  { %3335 = vmatpush1.bf16.msra.mxu0 %v4179_v28  ;;  %3378 = vmatpush1.bf16.msra.mxu1 %v4182_v11 }
 0x6aa   :  { %3962 = vmatprep.subr.bf16.mxu0 %v4450_v60 }
 0x75f   :  { %v2998_v35 = vpop.f32.mrb[56].mxu0  ;;  %v3041_v58 = vpop.f32.mrb[56].mxu1 }
 0x760   :  { %v3050_v37 = vadd.f32 %v2998_v35, %v2763_v39  ;;  %v3052_v14 = vadd.f32 %v3041_v58, %v2765_v63  ;;  %v3000_v43 = vpop.f32.mrb[57].mxu0  ;;  %v3043_v26 = vpop.f32.mrb[57].mxu1  ;;  %v4186_v63 = vld [vmem:[%s5639_s6 + $0x8] sm:$0xff]   ;;  %v4187_v35 = vld [vmem:[%s5639_s6 + $0x10] sm:$0xff]   ;;  %v4188_v58 = vld [vmem:[%s5639_s6 + $0x18] sm:$0xff]  }
 0x761   :  { %v3051_v50 = vadd.f32 %v3000_v43, %v2764_v36  ;;  %v3053_v61 = vadd.f32 %v3043_v26, %v2766_v41  ;;  %v3002_v38 = vpop.f32.mrb[58].mxu0  ;;  %v3045_v53 = vpop.f32.mrb[58].mxu1  ;;  %v4190_v36 = vld [vmem:[%s5639_s6 + $0x28] sm:$0xff]   ;;  %v4192_v41 = vld [vmem:[%s5639_s6 + $0x38] sm:$0xff]  }
 0x762   :  { %v3900_v55 = vmul.f32 -1.442695, %v3050_v37  ;;  %v3054_v48 = vadd.f32 %v3002_v38, %v2767_v20  ;;  %v3056_v21 = vadd.f32 %v3045_v53, %v2769_v27  ;;  %v3004_v57 = vpop.f32.mrb[59].mxu0  ;;  %v3047_v51 = vpop.f32.mrb[59].mxu1  ;;  %v3902_v24 = vmul.f32 -1.442695, %v3052_v14 }
 0x763   :  { %v3901_v33 = vmul.f32 -1.442695, %v3051_v50  ;;  %v3055_v56 = vadd.f32 %v3004_v57, %v2768_v7  ;;  %v3057_v59 = vadd.f32 %v3047_v51, %v2770_v17  ;;  %v5695_v37 = vld [vmem:[#allocation19_spill] sm:$0xff]  ;;  %v5696_v43 = vld [vmem:[#allocation20_spill] sm:$0xff]  ;;  %v5697_v50 = vld [vmem:[#allocation21_spill] sm:$0xff] }
 0x764   :  { %4385 = vpow2.f32 %v3900_v55  ;;  %v3903_v2 = vmul.f32 -1.442695, %v3054_v48  ;;  %v3905_v5 = vmul.f32 -1.442695, %v3056_v21  ;;  %v3119_v14 = vunpack.c.l.bf16 %v5695_v37  ;;  %v5698_v38 = vld [vmem:[#allocation22_spill] sm:$0xff] }
 0x765   :  { %v3904_v3 = vmul.f32 -1.442695, %v3055_v56  ;;  %4387 = vpow2.f32 %v3901_v33  ;;  %v3121_v26 = vunpack.c.l.bf16 %v5696_v43  ;;  %v3122_v53 = vunpack.c.l.bf16 %v5698_v38 }
 0x766   :  { %4389 = vpow2.f32 %v3903_v2  ;;  %v3123_v21 = vunpack.c.h.bf16 %v5695_v37  ;;  %v3125_v57 = vunpack.c.h.bf16 %v5696_v43  ;;  %v3124_v2 = vunpack.c.h.bf16 %v5697_v50 }
 0x767   :  { %4391 = vpow2.f32 %v3904_v3  ;;  %v3126_v3 = vunpack.c.h.bf16 %v5698_v38 }
 0x768   :  { %4393 = vtanh.f32 %v3053_v61  ;;  %v3120_v61 = vunpack.c.l.bf16 %v5697_v50 }
 0x769   :  { %4395 = vpow2.f32 %v3902_v24 }
 0x76a   :  { %4397 = vpow2.f32 %v3905_v5 }
 0x76e   :  { %v4386_v22 = vpop.eup %4385 }
 0x76f   :  { %v3076_v25 = vadd.f32 1.0, %v4386_v22  ;;  %v4388_v32 = vpop.eup %4387 }
 0x770   :  { %v4390_v4 = vpop.eup %4389  ;;  %v3077_v62 = vadd.f32 1.0, %v4388_v32 }
 0x771   :  { %4399 = vrcp.f32 %v3076_v25  ;;  %v3079_v1 = vadd.f32 1.0, %v4390_v4  ;;  %v4392_v0 = vpop.eup %4391 }
 0x772   :  { %4401 = vtanh.f32 %v3057_v59  ;;  %v3080_v19 = vadd.f32 1.0, %v4392_v0  ;;  %v4394_v6 = vpop.eup %4393 }
 0x773   :  { %4403 = vrcp.f32 %v3077_v62  ;;  %v4396_v23 = vpop.eup %4395 }
 0x774   :  { %4405 = vrcp.f32 %v3079_v1  ;;  %v4398_v13 = vpop.eup %4397  ;;  %v3078_v29 = vadd.f32 1.0, %v4396_v23 }
 0x775   :  { %4407 = vrcp.f32 %v3080_v19  ;;  %v3081_v47 = vadd.f32 1.0, %v4398_v13 }
 0x776   :  { %4409 = vrcp.f32 %v3078_v29 }
 0x77b   :  { %v4400_v52 = vpop.eup %4399 }
 0x77c   :  { %v4402_v42 = vpop.eup %4401  ;;  %v3100_v34 = vmul.f32 %v4400_v52, %v4394_v6 }
 0x77d   :  { %v4404_v44 = vpop.eup %4403 }
 0x77e   :  { %v4406_v8 = vpop.eup %4405  ;;  %v3098_v30 = vmul.f32 %v4404_v44, %v5507_v40 }
 0x77f   :  { %v3101_v10 = vmul.f32 %v4406_v8, %v4402_v42  ;;  %v4408_v16 = vpop.eup %4407 }
 0x780   :  { %v5583_v46 = vadd.f32 %v3100_v34, %v3098_v30  ;;  %v3099_v15 = vmul.f32 %v4408_v16, %v5511_v12  ;;  %v4410_v28 = vpop.eup %4409  ;;  %v4185_v12 = vld [vmem:[%s5639_s6] sm:$0xff]  }
 0x782   :  { %4411 = vtanh.f32 %v5583_v46  ;;  %v5587_v49 = vadd.f32 %v3101_v10, %v3099_v15 }
 0x783   :  { %4413 = vrcp.f32 %v3081_v47 }
 0x784   :  { %4415 = vtanh.f32 %v5587_v49 }
 0x78c   :  { %v4412_v31 = vpop.eup %4411 }
 0x78d   :  { %v4414_v45 = vpop.eup %4413  ;;  %v3106_v40 = vmul.f32 %v4412_v31, %v4410_v28 }
 0x78e   :  { %v4416_v11 = vpop.eup %4415 }
 0x78f   :  { %v3107_v18 = vmul.f32 %v4416_v11, %v4414_v45 }
 0x791   :  { %v3108_v39 = vpack.c.bf16 %v3107_v18, %v3106_v40 }
 0x793   :  { %3353 = vmatmul.mubr.bf16.vlgmr.msra.gmra.mrb[60].mxu0 %v3108_v39  ;;  %3396 = vmatmul.mubr.bf16.vlgmr.msra.gmra.mrb[60].mxu1 %v3108_v39 }
 0x794   :  { %3963 = vmatpush3.bf16.msra.mxu0 %v4185_v12  ;;  %3978 = vmatprep.mubr.msk.bf16.mxu0 %vm4451_vm0, %v4450_v60 }
 0x795   :  { %3964 = vmatprep.subr.bf16.mxu0 %v4450_v60 }
 0x798   :  { %3965 = vmatpush3.bf16.msra.mxu0 %v4186_v63 }
 0x799   :  { %3966 = vmatprep.subr.bf16.mxu0 %v4450_v60 }
 0x79c   :  { %3967 = vmatpush3.bf16.msra.mxu0 %v4187_v35 }
 0x79d   :  { %3968 = vmatprep.subr.bf16.mxu0 %v4450_v60 }
 0x7a0   :  { %3969 = vmatpush3.bf16.msra.mxu0 %v4188_v58 }
 0x7a1   :  { %3970 = vmatprep.subr.bf16.mxu0 %v4450_v60 }
 0x7a4   :  { %3971 = vmatpush3.bf16.msra.mxu0 %v4189_v54 }
 0x7a5   :  { %3972 = vmatprep.subr.bf16.mxu0 %v4450_v60 }
 0x7a8   :  { %3973 = vmatpush3.bf16.msra.mxu0 %v4190_v36 }
 0x7a9   :  { %3974 = vmatprep.subr.bf16.mxu0 %v4450_v60 }
 0x7ac   :  { %3975 = vmatpush3.bf16.msra.mxu0 %v4191_v9 }
 0x7ad   :  { %3976 = vmatprep.subr.bf16.mxu0 %v4450_v60 }
 0x7b0   :  { %3977 = vmatpush3.bf16.msra.mxu0 %v4192_v41 }
 0x866   :  { %v3354_v20 = vpop.f32.mrb[60].mxu0  ;;  %v3397_v27 = vpop.f32.mrb[60].mxu1 }
 0x867   :  { %v3406_v7 = vadd.f32 %v3354_v20, %v3119_v14  ;;  %v3408_v17 = vadd.f32 %v3397_v27, %v3121_v26  ;;  %v3356_v55 = vpop.f32.mrb[61].mxu0  ;;  %v3399_v48 = vpop.f32.mrb[61].mxu1 }
 0x868   :  { %v3407_v51 = vadd.f32 %v3356_v55, %v3120_v61  ;;  %v3409_v33 = vadd.f32 %v3399_v48, %v3122_v53  ;;  %v3358_v56 = vpop.f32.mrb[62].mxu0  ;;  %v3401_v59 = vpop.f32.mrb[62].mxu1 }
 0x869   :  { %v3938_v24 = vmul.f32 -1.442695, %v3406_v7  ;;  %v3410_v5 = vadd.f32 %v3358_v56, %v3123_v21  ;;  %v3412_v22 = vadd.f32 %v3401_v59, %v3125_v57  ;;  %v3360_v25 = vpop.f32.mrb[63].mxu0  ;;  %v3403_v32 = vpop.f32.mrb[63].mxu1  ;;  %v3940_v6 = vmul.f32 -1.442695, %v3408_v17 }
 0x86a   :  { %v3939_v4 = vmul.f32 -1.442695, %v3407_v51  ;;  %v3411_v62 = vadd.f32 %v3360_v25, %v3124_v2  ;;  %v3413_v1 = vadd.f32 %v3403_v32, %v3126_v3 }
 0x86b   :  { %4417 = vpow2.f32 %v3938_v24  ;;  %v3941_v0 = vmul.f32 -1.442695, %v3410_v5  ;;  %v3943_v23 = vmul.f32 -1.442695, %v3412_v22 }
 0x86c   :  { %v3942_v19 = vmul.f32 -1.442695, %v3411_v62  ;;  %4419 = vpow2.f32 %v3939_v4 }
 0x86d   :  { %4421 = vpow2.f32 %v3941_v0 }
 0x86e   :  { %4423 = vpow2.f32 %v3942_v19 }
 0x86f   :  { %4425 = vtanh.f32 %v3409_v33 }
 0x870   :  { %4427 = vpow2.f32 %v3940_v6 }
 0x871   :  { %4429 = vpow2.f32 %v3943_v23 }
 0x875   :  { %v4418_v13 = vpop.eup %4417 }
 0x876   :  { %v3432_v52 = vadd.f32 1.0, %v4418_v13  ;;  %v4420_v42 = vpop.eup %4419 }
 0x877   :  { %v4422_v34 = vpop.eup %4421  ;;  %v3433_v44 = vadd.f32 1.0, %v4420_v42 }
 0x878   :  { %4431 = vrcp.f32 %v3432_v52  ;;  %v3435_v8 = vadd.f32 1.0, %v4422_v34  ;;  %v4424_v29 = vpop.eup %4423 }
 0x879   :  { %4433 = vtanh.f32 %v3413_v1  ;;  %v3436_v30 = vadd.f32 1.0, %v4424_v29  ;;  %v4426_v10 = vpop.eup %4425 }
 0x87a   :  { %4435 = vrcp.f32 %v3433_v44  ;;  %v4428_v16 = vpop.eup %4427 }
 0x87b   :  { %4437 = vrcp.f32 %v3435_v8  ;;  %v4430_v47 = vpop.eup %4429  ;;  %v3434_v11 = vadd.f32 1.0, %v4428_v16 }
 0x87c   :  { %4439 = vrcp.f32 %v3436_v30  ;;  %v3437_v63 = vadd.f32 1.0, %v4430_v47 }
 0x87d   :  { %4441 = vrcp.f32 %v3434_v11 }
 0x882   :  { %v4432_v15 = vpop.eup %4431 }
 0x883   :  { %v4434_v28 = vpop.eup %4433  ;;  %v3456_v31 = vmul.f32 %v4432_v15, %v4426_v10 }
 0x884   :  { %v4436_v45 = vpop.eup %4435 }
 0x885   :  { %v4438_v40 = vpop.eup %4437  ;;  %v3454_v18 = vmul.f32 %v4436_v45, %v5583_v46  ;;  %v3944_v46 = vld [vmem:[%s5640_s7] ss:$0 sm:$0xff] }
 0x886   :  { %v3457_v39 = vmul.f32 %v4438_v40, %v4434_v28  ;;  %v4440_v12 = vpop.eup %4439 }
 0x887   :  { %v3458_v60 = vadd.f32 %v3456_v31, %v3454_v18  ;;  %v3455_v35 = vmul.f32 %v4440_v12, %v5587_v49  ;;  %v4442_v54 = vpop.eup %4441 }
 0x889   :  { %4443 = vtanh.f32 %v3458_v60  ;;  %v3459_v58 = vadd.f32 %v3457_v39, %v3455_v35 }
 0x88a   :  { %4445 = vrcp.f32 %v3437_v63 }
 0x88b   :  { %4447 = vtanh.f32 %v3459_v58 }
 0x893   :  { %v4444_v36 = vpop.eup %4443 }
 0x894   :  { %v3462_v9 = vmul.f32 %v4444_v36, %v4442_v54  ;;  %v4446_v41 = vpop.eup %4445 }
 0x895   :  { %v4448_v37 = vpop.eup %4447 }
 0x896   :  { %v3463_v14 = vmul.f32 %v4448_v37, %v4446_v41 }
 0x898   :  { %v3464_v43 = vpack.c.bf16 %v3463_v14, %v3462_v9 }
 0x89a   :  { %3979 = vmatmul.mubr.bf16.vlgmr.msra.gmra.mrb[64].mxu0 %v3464_v43 }
 0x96d   :  { %v3577_v26 = vpop.f32.mrb[64].mxu0 }
 0x96e   :  { %v3578_v20 = vadd.f32 %v3944_v46, %v3577_v26  ;;  %v3980_v49 = vpop.f32.mrb[65].mxu0 }
 0x96f   :  { %v3580_v27 = vpop.f32.mrb[66].mxu0 }
 0x970   :  { %3585 = vst.msk [vmem:[%s5641_s8] sm:$0xff] %vm3584_vm1, %v3578_v20  ;;  %v3581_v50 = vadd.f32 %v3944_v46, %v3580_v27  ;;  %v3981_v61 = vpop.f32.mrb[67].mxu0 }
 0x972   :  { %3586 = vst.msk [vmem:[%s5641_s8 + $0x8] sm:$0xff] %vm3584_vm1, %v3581_v50 }

</bundles_post_ra>
